<compile_context>
chip_gen: v5e
topology: v5e:2x2
jax: 0.10.0
libtpu: 0.0.40
codegen_flags: <defaults>
</compile_context>

<pallas_src>
import math
from functools import partial

import jax
import jax.numpy as jnp
from jax import lax
from jax.experimental import pallas as pl
from jax.experimental.pallas import tpu as pltpu


def _self_attention_kernel(x_hbm_ref, xres_ref, gamma_ref, beta_ref, gmat_ref,
                           wq_ref, wk_ref, wv_ref, bq_ref, bk_ref, bv_ref,
                           wproj_ref, bproj_ref, o_ref,
                           x_s, q_s, k_s, v_s, dma_sem,
                           *, eps, exp_dtype):
    b = pl.program_id(0)
    qi = pl.program_id(1)
    C = x_s.shape[0]
    T = x_s.shape[1]
    tq = o_ref.shape[2]
    n_panels = T // tq
    G = gmat_ref.shape[0]

    # ---- once per batch slab: GroupNorm + qkv 1x1 conv, cached in VMEM ----
    @pl.when(qi == 0)
    def _compute_qkv():
        # Manual single-buffered DMA of this batch's [C, T] slab (the residual
        # read uses its own small per-tile block, so the big f32 slab is not
        # double-buffered by the pipeline).
        cp = pltpu.make_async_copy(x_hbm_ref.at[b], x_s, dma_sem)
        cp.start()
        cp.wait()

        gmat = gmat_ref[...]                                   # [G, C] one-hot
        n = float((C // G) * T)

        # Panelized single-pass stats: f32 temporaries stay at [C, tq].
        def stats_body(p, carry):
            s1, s2 = carry
            off = pl.multiple_of(p * tq, tq)
            xp = x_s[:, pl.ds(off, tq)]                        # [C, tq] f32
            return (s1 + jnp.sum(xp, axis=1, keepdims=True),
                    s2 + jnp.sum(xp * xp, axis=1, keepdims=True))
        s1, s2 = lax.fori_loop(
            0, n_panels, stats_body,
            (jnp.zeros((C, 1), jnp.float32), jnp.zeros((C, 1), jnp.float32)))

        gmean = jnp.dot(gmat, s1, preferred_element_type=jnp.float32) / n   # [G,1]
        gmsq = jnp.dot(gmat, s2, preferred_element_type=jnp.float32) / n    # [G,1]
        gvar = jnp.maximum(gmsq - gmean * gmean, 0.0)          # clamp cancellation
        grstd = lax.rsqrt(gvar + eps)
        mean_c = lax.dot_general(gmat, gmean, (((0,), (0,)), ((), ())),
                                 preferred_element_type=jnp.float32)        # [C,1]
        rstd_c = lax.dot_general(gmat, grstd, (((0,), (0,)), ((), ())),
                                 preferred_element_type=jnp.float32)        # [C,1]
        scale_c = rstd_c * gamma_ref[...]
        shift_c = beta_ref[...] - mean_c * scale_c

        wq = wq_ref[...]
        wk = wk_ref[...]
        wv = wv_ref[...]
        bq = bq_ref[...]
        bk = bk_ref[...]
        bv = bv_ref[...]

        # Panelized normalize + qkv projections: pre-cast f32 matmul outputs are
        # [*, tq] instead of [*, T].  q/v are produced in [T, C] layout so the
        # per-tile attention matmuls are transpose-free; the attention scale is
        # already folded into wq/bq host-side.
        def qkv_body(p, carry):
            off = pl.multiple_of(p * tq, tq)
            xp = x_s[:, pl.ds(off, tq)]                        # [C, tq] f32
            xnp = (xp * scale_c + shift_c).astype(jnp.bfloat16)
            k_s[:, pl.ds(off, tq)] = (
                jnp.dot(wk, xnp, preferred_element_type=jnp.float32) + bk
            ).astype(jnp.bfloat16)                             # [C, tq]
            q_s[pl.ds(off, tq), :] = (
                lax.dot_general(xnp, wq, (((0,), (1,)), ((), ())),
                                preferred_element_type=jnp.float32) + bq
            ).astype(jnp.bfloat16)                             # [tq, C]
            v_s[pl.ds(off, tq), :] = (
                lax.dot_general(xnp, wv, (((0,), (1,)), ((), ())),
                                preferred_element_type=jnp.float32) + bv
            ).astype(jnp.bfloat16)                             # [tq, C]
            return carry
        lax.fori_loop(0, n_panels, qkv_body, jnp.int32(0))

    # ---- attention for this query tile: scores are only [tq, T], never [T, T] ----
    start = pl.multiple_of(qi * tq, tq)
    q_tile = q_s[pl.ds(start, tq), :]                          # [tq, C] bf16
    s = jnp.dot(q_tile, k_s[...],
                preferred_element_type=jnp.float32)            # [tq, T] f32
    m = jnp.max(s, axis=-1, keepdims=True)                     # [tq, 1] f32
    p = jnp.exp((s - m).astype(exp_dtype))                     # bf16 exp on v6e/v7x
    l = jnp.sum(p.astype(jnp.float32), axis=-1, keepdims=True)  # f32 row-sum
    h = jnp.dot(p.astype(jnp.bfloat16), v_s[...],
                preferred_element_type=jnp.float32)            # [tq, C] f32
    h = (h * pl.reciprocal(l)).astype(jnp.bfloat16)            # exact recip, tq rows

    # ---- proj_out (1x1 conv) + residual ----
    proj = lax.dot_general(wproj_ref[...], h, (((1,), (1,)), ((), ())),
                           preferred_element_type=jnp.float32) + bproj_ref[...]
    o_ref[0] = (xres_ref[0] + proj).astype(o_ref.dtype)


def _tpu_generation():
    try:
        kind = jax.devices()[0].device_kind.lower()
    except Exception:
        return 6
    for gen in (7, 6, 5, 4, 3):
        if f"v{gen}" in kind or f"tpu{gen}" in kind:
            return gen
    return 6


def _vmem_capacity_bytes(gen):
    try:
        return int(pltpu.get_tpu_info().vmem_capacity_bytes)
    except Exception:
        return (64 << 20) if gen >= 7 else (128 << 20)


def _pick_tq(T, gen):
    # 256-wide query tiles fill the v6e/v7x 256x256 MXU; 128 fills v5e's 128x128.
    prefs = (256, 128) if gen >= 6 else (128,)
    for cand in prefs:
        if T % cand == 0:
            return cand
    return T


def _vmem_bytes_estimate(C, T, tq, G):
    f32, bf16 = 4, 2
    grid_blocks = 2 * (C * tq * f32) * 2                       # residual-x + out tiles, double-buffered
    consts = 2 * (4 * C * C * bf16 + (6 * C + G * C) * f32)    # weights/biases/affine/gmat, double-buffered
    scratch = C * T * f32 + 3 * T * C * bf16                   # x slab (single-buffered) + q/k/v
    qkv_live = C * tq * (bf16 + 3 * f32) + 8 * C * f32         # per-panel temporaries at qi==0
    attn_live = 2 * tq * T * f32 + 3 * tq * C * f32            # scores + exp + h/proj temporaries
    return grid_blocks + consts + scratch + max(qkv_live, attn_live)


def self_attention_pallas(x, params, *, num_groups, eps=1e-5, tq=None):
    B, C, H, W = x.shape
    T = H * W
    G = num_groups
    assert C % G == 0

    gen = _tpu_generation()
    if tq is None:
        tq = _pick_tq(T, gen)
    assert T % tq == 0
    n_q = T // tq
    exp_dtype = jnp.bfloat16 if gen >= 6 else jnp.float32      # v5e EUP has no bf16 path

    # f32 stats / residual even if a caller hands us bf16 activations.
    x3 = x.reshape(B, C, T).astype(jnp.float32)

    scale2 = 1.0 / math.sqrt(C)                                # (1/sqrt(sqrt(C)))**2, folded into q
    wqkv = params["wqkv"]
    bqkv = params["bqkv"]
    wq = (wqkv[0:C] * scale2).astype(jnp.bfloat16)             # [C, C]
    wk = wqkv[C:2 * C].astype(jnp.bfloat16)                    # [C, C]
    wv = wqkv[2 * C:3 * C].astype(jnp.bfloat16)                # [C, C]
    bq = (bqkv[0:C] * scale2).reshape(1, C).astype(jnp.float32)
    bk = bqkv[C:2 * C].reshape(C, 1).astype(jnp.float32)
    bv = bqkv[2 * C:3 * C].reshape(1, C).astype(jnp.float32)
    wproj = params["wproj"].astype(jnp.bfloat16)               # [C, C]
    bproj = params["bproj"].reshape(C, 1).astype(jnp.float32)
    gamma = params["gamma"].reshape(C, 1).astype(jnp.float32)
    beta = params["beta"].reshape(C, 1).astype(jnp.float32)

    # one-hot group-assignment matrix for the tiny per-group channel reduction
    gmat = ((jnp.arange(C) // (C // G))[None, :] == jnp.arange(G)[:, None]).astype(jnp.float32)

    cap = _vmem_capacity_bytes(gen)                            # physical VMEM per core
    est = _vmem_bytes_estimate(C, T, tq, G)
    vmem_limit = int(min(int(0.8 * cap), max(32 << 20, int(1.5 * est) + (4 << 20))))

    out = pl.pallas_call(
        partial(_self_attention_kernel, eps=eps, exp_dtype=exp_dtype),
        out_shape=jax.ShapeDtypeStruct((B, C, T), x.dtype),
        grid_spec=pltpu.PrefetchScalarGridSpec(
            num_scalar_prefetch=0,
            grid=(B, n_q),
            in_specs=[
                pl.BlockSpec(memory_space=pl.ANY),                    # x slab (HBM, manual DMA)
                pl.BlockSpec((1, C, tq), lambda b, qi: (b, 0, qi)),   # x residual tile
                pl.BlockSpec((C, 1), lambda b, qi: (0, 0)),           # gamma
                pl.BlockSpec((C, 1), lambda b, qi: (0, 0)),           # beta
                pl.BlockSpec((G, C), lambda b, qi: (0, 0)),           # group one-hot
                pl.BlockSpec((C, C), lambda b, qi: (0, 0)),           # W_q (scaled)
                pl.BlockSpec((C, C), lambda b, qi: (0, 0)),           # W_k
                pl.BlockSpec((C, C), lambda b, qi: (0, 0)),           # W_v
                pl.BlockSpec((1, C), lambda b, qi: (0, 0)),           # b_q (scaled)
                pl.BlockSpec((C, 1), lambda b, qi: (0, 0)),           # b_k
                pl.BlockSpec((1, C), lambda b, qi: (0, 0)),           # b_v
                pl.BlockSpec((C, C), lambda b, qi: (0, 0)),           # W_proj
                pl.BlockSpec((C, 1), lambda b, qi: (0, 0)),           # b_proj
            ],
            out_specs=pl.BlockSpec((1, C, tq), lambda b, qi: (b, 0, qi)),
            scratch_shapes=[
                pltpu.VMEM((C, T), jnp.float32),                      # x slab (single-buffered)
                pltpu.VMEM((T, C), jnp.bfloat16),                     # q (scale folded in)
                pltpu.VMEM((C, T), jnp.bfloat16),                     # k
                pltpu.VMEM((T, C), jnp.bfloat16),                     # v
                pltpu.SemaphoreType.DMA(()),                          # slab-DMA semaphore
            ],
        ),
        compiler_params=pltpu.CompilerParams(
            dimension_semantics=("parallel", "arbitrary"),
            vmem_limit_bytes=vmem_limit),
    )(x3, x3, gamma, beta, gmat, wq, wk, wv, bq, bk, bv, wproj, bproj)
    return out.reshape(B, C, H, W)


def self_attention_ref(x, params, *, num_groups, eps=1e-5):
    """Pure-JAX (f32) reference mirroring the PyTorch forward."""
    B, C, H, W = x.shape
    T = H * W
    xr = x.reshape(B, C, T)
    xg = xr.reshape(B, num_groups, C // num_groups, T)
    mean = xg.mean(axis=(2, 3), keepdims=True)
    var = ((xg - mean) ** 2).mean(axis=(2, 3), keepdims=True)
    xn = ((xg - mean) / jnp.sqrt(var + eps)).reshape(B, C, T)
    xn = xn * params["gamma"][None, :, None] + params["beta"][None, :, None]
    qkv = jnp.einsum("oc,bct->bot", params["wqkv"], xn) + params["bqkv"][None, :, None]
    q, k, v = jnp.split(qkv, 3, axis=1)
    scale = 1.0 / math.sqrt(math.sqrt(C))
    w = jnp.einsum("bct,bcs->bts", q * scale, k * scale)
    w = jax.nn.softmax(w, axis=-1)
    h = jnp.einsum("bts,bcs->bct", w, v)
    h = jnp.einsum("oc,bct->bot", params["wproj"], h) + params["bproj"][None, :, None]
    return (xr + h).reshape(B, C, H, W)


if __name__ == "__main__":
    B, C, H, W = 2, 4, 16, 16            # channels=4, n_head=1 (module defaults)
    num_groups = min(C // 4, 32)         # GroupNorm grouping from __init__
    key = jax.random.PRNGKey(0)
    kx, kg, kb, kw1, kb1, kw2, kb2 = jax.random.split(key, 7)

    x = jax.random.normal(kx, (B, C, H, W), dtype=jnp.float32)

    bound = 1.0 / math.sqrt(C)
    params = {
        "gamma": jax.random.normal(kg, (C,), dtype=jnp.float32) * 0.1 + 1.0,
        "beta": jax.random.normal(kb, (C,), dtype=jnp.float32) * 0.1,
        "wqkv": jax.random.uniform(kw1, (3 * C, C), jnp.float32, -bound, bound),
        "bqkv": jax.random.uniform(kb1, (3 * C,), jnp.float32, -bound, bound),
        # NOTE: the PyTorch module zero-inits proj_out (zero_module); we use small
        # nonzero values so the full attention+projection path is exercised.
        "wproj": jax.random.uniform(kw2, (C, C), jnp.float32, -bound, bound),
        "bproj": jax.random.uniform(kb2, (C,), jnp.float32, -bound, bound),
    }

    out = self_attention_pallas(x, params, num_groups=num_groups)
    out = jax.block_until_ready(out)

    ref = self_attention_ref(x, params, num_groups=num_groups)
    assert out.shape == (B, C, H, W)
    err = float(jnp.abs(out - ref).max())
    # bf16 MXU operands (f32 accumulation) + bf16 exp (v6e/v7x) vs f32 reference.
    assert jnp.allclose(out, ref, atol=5e-2, rtol=5e-2), err
    print("KERNEL_OK")
</pallas_src>

<mosaic_0001>
module attributes {stable_mosaic.version = 11 : i64} {
  func.func @_self_attention_kernel(%arg0: i32, %arg1: i32, %arg2: memref<2x4x256xf32, #tpu.memory_space<any>>, %arg3: memref<1x4x256xf32, #tpu.memory_space<vmem>>, %arg4: memref<4x1xf32, #tpu.memory_space<vmem>>, %arg5: memref<4x1xf32, #tpu.memory_space<vmem>>, %arg6: memref<1x4xf32, #tpu.memory_space<vmem>>, %arg7: memref<4x4xbf16, #tpu.memory_space<vmem>>, %arg8: memref<4x4xbf16, #tpu.memory_space<vmem>>, %arg9: memref<4x4xbf16, #tpu.memory_space<vmem>>, %arg10: memref<1x4xf32, #tpu.memory_space<vmem>>, %arg11: memref<4x1xf32, #tpu.memory_space<vmem>>, %arg12: memref<1x4xf32, #tpu.memory_space<vmem>>, %arg13: memref<4x4xbf16, #tpu.memory_space<vmem>>, %arg14: memref<4x1xf32, #tpu.memory_space<vmem>>, %arg15: memref<1x4x256xf32, #tpu.memory_space<vmem>>, %arg16: memref<4x256xf32, #tpu.memory_space<vmem>>, %arg17: memref<256x4xbf16, #tpu.memory_space<vmem>>, %arg18: memref<4x256xbf16, #tpu.memory_space<vmem>>, %arg19: memref<256x4xbf16, #tpu.memory_space<vmem>>, %arg20: memref<!tpu.dma_semaphore, #tpu.memory_space<semaphore_mem>>) attributes {dimension_semantics = [#tpu.dimension_semantics<parallel>, #tpu.dimension_semantics<arbitrary>], iteration_bounds = array<i64: 2, 1>, scalar_prefetch = 0 : i64, scratch_operands = 5 : i64, tpu.core_type = #tpu.core_type<tc>, window_params = [{}, {transform_indices = @transform_1, window_bounds = array<i64: 1, 4, 256>}, {pipeline_mode = #tpu.pipeline_mode<synchronous>, transform_indices = @transform_2, window_bounds = array<i64: 4, 1>}, {pipeline_mode = #tpu.pipeline_mode<synchronous>, transform_indices = @transform_3, window_bounds = array<i64: 4, 1>}, {pipeline_mode = #tpu.pipeline_mode<synchronous>, transform_indices = @transform_4, window_bounds = array<i64: 1, 4>}, {pipeline_mode = #tpu.pipeline_mode<synchronous>, transform_indices = @transform_5, window_bounds = array<i64: 4, 4>}, {pipeline_mode = #tpu.pipeline_mode<synchronous>, transform_indices = @transform_6, window_bounds = array<i64: 4, 4>}, {pipeline_mode = #tpu.pipeline_mode<synchronous>, transform_indices = @transform_7, window_bounds = array<i64: 4, 4>}, {pipeline_mode = #tpu.pipeline_mode<synchronous>, transform_indices = @transform_8, window_bounds = array<i64: 1, 4>}, {pipeline_mode = #tpu.pipeline_mode<synchronous>, transform_indices = @transform_9, window_bounds = array<i64: 4, 1>}, {pipeline_mode = #tpu.pipeline_mode<synchronous>, transform_indices = @transform_10, window_bounds = array<i64: 1, 4>}, {pipeline_mode = #tpu.pipeline_mode<synchronous>, transform_indices = @transform_11, window_bounds = array<i64: 4, 4>}, {pipeline_mode = #tpu.pipeline_mode<synchronous>, transform_indices = @transform_12, window_bounds = array<i64: 4, 1>}, {transform_indices = @transform_13, window_bounds = array<i64: 1, 4, 256>}]} {
    %c0_i32 = arith.constant 0 : i32
    %0 = arith.cmpi eq, %arg1, %c0_i32 : i32
    %1 = arith.extui %0 : i1 to i32
    %c0_i32_0 = arith.constant 0 : i32
    %2 = arith.cmpi ne, %1, %c0_i32_0 : i32
    scf.if %2 {
      %c0_i32_19 = arith.constant 0 : i32
      %c0_i32_20 = arith.constant 0 : i32
      %35 = tpu.memref_slice %arg2[%arg0, %c0_i32_19, %c0_i32_20] : memref<2x4x256xf32, #tpu.memory_space<any>> -> memref<1x4x256xf32, #tpu.memory_space<any>>
      %36 = tpu.memref_squeeze %35 : memref<1x4x256xf32, #tpu.memory_space<any>> -> memref<4x256xf32, #tpu.memory_space<any>>
      tpu.enqueue_dma source(%36 : memref<4x256xf32, #tpu.memory_space<any>>) target(%arg16 : memref<4x256xf32, #tpu.memory_space<vmem>>) target_semaphore(%arg20 : memref<!tpu.dma_semaphore, #tpu.memory_space<semaphore_mem>>)
      %c0_i32_21 = arith.constant 0 : i32
      %c0_i32_22 = arith.constant 0 : i32
      %37 = tpu.memref_slice %arg2[%arg0, %c0_i32_21, %c0_i32_22] : memref<2x4x256xf32, #tpu.memory_space<any>> -> memref<1x4x256xf32, #tpu.memory_space<any>>
      %38 = tpu.memref_squeeze %37 : memref<1x4x256xf32, #tpu.memory_space<any>> -> memref<4x256xf32, #tpu.memory_space<any>>
      tpu.wait_dma2 semaphore(%arg20 : memref<!tpu.dma_semaphore, #tpu.memory_space<semaphore_mem>>) src(%38 : memref<4x256xf32, #tpu.memory_space<any>>) dst(%arg16 : memref<4x256xf32, #tpu.memory_space<vmem>>)
      %c0_23 = arith.constant 0 : index
      %c0_24 = arith.constant 0 : index
      %39 = vector.load %arg6[%c0_23, %c0_24] : memref<1x4xf32, #tpu.memory_space<vmem>>, vector<1x4xf32>
      %cst_25 = arith.constant 0.000000e+00 : f32
      %40 = vector.broadcast %cst_25 : f32 to vector<4x1xf32>
      %cst_26 = arith.constant 0.000000e+00 : f32
      %41 = vector.broadcast %cst_26 : f32 to vector<4x1xf32>
      %c0_i32_27 = arith.constant 0 : i32
      %c256_i32_28 = arith.constant 256 : i32
      %42 = arith.muli %c0_i32_27, %c256_i32_28 : i32
      %43 = tpu.assume_multiple %42, 256 : i32
      %c0_29 = arith.constant 0 : index
      %44 = arith.index_cast %43 : i32 to index
      %45 = vector.load %arg16[%c0_29, %44] : memref<4x256xf32, #tpu.memory_space<vmem>>, vector<4x256xf32>
      %cst_30 = arith.constant dense<0.000000e+00> : vector<4xf32>
      %46 = vector.multi_reduction <add>, %45, %cst_30 [1] : vector<4x256xf32> to vector<4xf32>
      %47 = vector.shape_cast %46 : vector<4xf32> to vector<4x1xf32>
      %48 = arith.addf %40, %47 : vector<4x1xf32>
      %49 = arith.mulf %45, %45 : vector<4x256xf32>
      %cst_31 = arith.constant dense<0.000000e+00> : vector<4xf32>
      %50 = vector.multi_reduction <add>, %49, %cst_31 [1] : vector<4x256xf32> to vector<4xf32>
      %51 = vector.shape_cast %50 : vector<4xf32> to vector<4x1xf32>
      %52 = arith.addf %41, %51 : vector<4x1xf32>
      %c1_i32 = arith.constant 1 : i32
      %cst_32 = arith.constant dense<0.000000e+00> : vector<1x1xf32>
      %53 = tpu.matmul %39, %48, %cst_32 {dimension_numbers = #tpu.dot_dimension_numbers<[1], [0], [0], [1], [0, 0, 1, 1], [], []>} : vector<1x4xf32>, vector<4x1xf32>, vector<1x1xf32> -> vector<1x1xf32>
      %cst_33 = arith.constant 1.024000e+03 : f32
      %54 = vector.broadcast %cst_33 : f32 to vector<1x1xf32>
      %55 = arith.divf %53, %54 : vector<1x1xf32>
      %cst_34 = arith.constant dense<0.000000e+00> : vector<1x1xf32>
      %56 = tpu.matmul %39, %52, %cst_34 {dimension_numbers = #tpu.dot_dimension_numbers<[1], [0], [0], [1], [0, 0, 1, 1], [], []>} : vector<1x4xf32>, vector<4x1xf32>, vector<1x1xf32> -> vector<1x1xf32>
      %cst_35 = arith.constant 1.024000e+03 : f32
      %57 = vector.broadcast %cst_35 : f32 to vector<1x1xf32>
      %58 = arith.divf %56, %57 : vector<1x1xf32>
      %59 = arith.mulf %55, %55 : vector<1x1xf32>
      %60 = arith.subf %58, %59 : vector<1x1xf32>
      %cst_36 = arith.constant 0.000000e+00 : f32
      %61 = vector.broadcast %cst_36 : f32 to vector<1x1xf32>
      %62 = arith.maximumf %60, %61 : vector<1x1xf32>
      %cst_37 = arith.constant 9.99999974E-6 : f32
      %63 = vector.broadcast %cst_37 : f32 to vector<1x1xf32>
      %64 = arith.addf %62, %63 : vector<1x1xf32>
      %65 = math.rsqrt %64 : vector<1x1xf32>
      %cst_38 = arith.constant dense<0.000000e+00> : vector<4x1xf32>
      %66 = tpu.matmul %39, %55, %cst_38 {dimension_numbers = #tpu.dot_dimension_numbers<[0], [0], [1], [1], [0, 1, 1, 1], [], []>} : vector<1x4xf32>, vector<1x1xf32>, vector<4x1xf32> -> vector<4x1xf32>
      %cst_39 = arith.constant dense<0.000000e+00> : vector<4x1xf32>
      %67 = tpu.matmul %39, %65, %cst_39 {dimension_numbers = #tpu.dot_dimension_numbers<[0], [0], [1], [1], [0, 1, 1, 1], [], []>} : vector<1x4xf32>, vector<1x1xf32>, vector<4x1xf32> -> vector<4x1xf32>
      %c0_40 = arith.constant 0 : index
      %c0_41 = arith.constant 0 : index
      %68 = vector.load %arg4[%c0_40, %c0_41] : memref<4x1xf32, #tpu.memory_space<vmem>>, vector<4x1xf32>
      %69 = arith.mulf %67, %68 : vector<4x1xf32>
      %c0_42 = arith.constant 0 : index
      %c0_43 = arith.constant 0 : index
      %70 = vector.load %arg5[%c0_42, %c0_43] : memref<4x1xf32, #tpu.memory_space<vmem>>, vector<4x1xf32>
      %71 = arith.mulf %66, %69 : vector<4x1xf32>
      %72 = arith.subf %70, %71 : vector<4x1xf32>
      %c0_44 = arith.constant 0 : index
      %c0_45 = arith.constant 0 : index
      %73 = vector.load %arg7[%c0_44, %c0_45] : memref<4x4xbf16, #tpu.memory_space<vmem>>, vector<4x4xbf16>
      %c0_46 = arith.constant 0 : index
      %c0_47 = arith.constant 0 : index
      %74 = vector.load %arg8[%c0_46, %c0_47] : memref<4x4xbf16, #tpu.memory_space<vmem>>, vector<4x4xbf16>
      %c0_48 = arith.constant 0 : index
      %c0_49 = arith.constant 0 : index
      %75 = vector.load %arg9[%c0_48, %c0_49] : memref<4x4xbf16, #tpu.memory_space<vmem>>, vector<4x4xbf16>
      %c0_50 = arith.constant 0 : index
      %c0_51 = arith.constant 0 : index
      %76 = vector.load %arg10[%c0_50, %c0_51] : memref<1x4xf32, #tpu.memory_space<vmem>>, vector<1x4xf32>
      %c0_52 = arith.constant 0 : index
      %c0_53 = arith.constant 0 : index
      %77 = vector.load %arg11[%c0_52, %c0_53] : memref<4x1xf32, #tpu.memory_space<vmem>>, vector<4x1xf32>
      %c0_54 = arith.constant 0 : index
      %c0_55 = arith.constant 0 : index
      %78 = vector.load %arg12[%c0_54, %c0_55] : memref<1x4xf32, #tpu.memory_space<vmem>>, vector<1x4xf32>
      %c0_i32_56 = arith.constant 0 : i32
      %c256_i32_57 = arith.constant 256 : i32
      %79 = arith.muli %c0_i32_56, %c256_i32_57 : i32
      %80 = tpu.assume_multiple %79, 256 : i32
      %c0_58 = arith.constant 0 : index
      %81 = arith.index_cast %80 : i32 to index
      %82 = vector.load %arg16[%c0_58, %81] : memref<4x256xf32, #tpu.memory_space<vmem>>, vector<4x256xf32>
      %83 = vector.broadcast %69 : vector<4x1xf32> to vector<4x256xf32>
      %84 = arith.mulf %82, %83 : vector<4x256xf32>
      %85 = vector.broadcast %72 : vector<4x1xf32> to vector<4x256xf32>
      %86 = arith.addf %84, %85 : vector<4x256xf32>
      %87 = arith.truncf %86 : vector<4x256xf32> to vector<4x256xbf16>
      %cst_59 = arith.constant dense<0.000000e+00> : vector<4x256xf32>
      %88 = tpu.matmul %74, %87, %cst_59 {dimension_numbers = #tpu.dot_dimension_numbers<[1], [0], [0], [1], [0, 0, 1, 1], [], []>} : vector<4x4xbf16>, vector<4x256xbf16>, vector<4x256xf32> -> vector<4x256xf32>
      %89 = vector.broadcast %77 : vector<4x1xf32> to vector<4x256xf32>
      %90 = arith.addf %88, %89 : vector<4x256xf32>
      %91 = arith.truncf %90 : vector<4x256xf32> to vector<4x256xbf16>
      %c0_60 = arith.constant 0 : index
      %92 = arith.index_cast %80 : i32 to index
      %93 = vector.load %arg18[%c0_60, %92] : memref<4x256xbf16, #tpu.memory_space<vmem>>, vector<4x256xbf16>
      tpu.vector_store %arg18[%c0_60, %92], %91 {strides = array<i32>} : memref<4x256xbf16, #tpu.memory_space<vmem>>, vector<4x256xbf16>,
      %cst_61 = arith.constant dense<0.000000e+00> : vector<256x4xf32>
      %94 = tpu.matmul %87, %73, %cst_61 {dimension_numbers = #tpu.dot_dimension_numbers<[0], [1], [1], [0], [0, 1, 1, 0], [], []>} : vector<4x256xbf16>, vector<4x4xbf16>, vector<256x4xf32> -> vector<256x4xf32>
      %95 = vector.broadcast %76 : vector<1x4xf32> to vector<256x4xf32>
      %96 = arith.addf %94, %95 : vector<256x4xf32>
      %97 = arith.truncf %96 : vector<256x4xf32> to vector<256x4xbf16>
      %98 = arith.index_cast %80 : i32 to index
      %c0_62 = arith.constant 0 : index
      %99 = vector.load %arg17[%98, %c0_62] : memref<256x4xbf16, #tpu.memory_space<vmem>>, vector<256x4xbf16>
      tpu.vector_store %arg17[%98, %c0_62], %97 {strides = array<i32>} : memref<256x4xbf16, #tpu.memory_space<vmem>>, vector<256x4xbf16>,
      %cst_63 = arith.constant dense<0.000000e+00> : vector<256x4xf32>
      %100 = tpu.matmul %87, %75, %cst_63 {dimension_numbers = #tpu.dot_dimension_numbers<[0], [1], [1], [0], [0, 1, 1, 0], [], []>} : vector<4x256xbf16>, vector<4x4xbf16>, vector<256x4xf32> -> vector<256x4xf32>
      %101 = vector.broadcast %78 : vector<1x4xf32> to vector<256x4xf32>
      %102 = arith.addf %100, %101 : vector<256x4xf32>
      %103 = arith.truncf %102 : vector<256x4xf32> to vector<256x4xbf16>
      %104 = arith.index_cast %80 : i32 to index
      %c0_64 = arith.constant 0 : index
      %105 = vector.load %arg19[%104, %c0_64] : memref<256x4xbf16, #tpu.memory_space<vmem>>, vector<256x4xbf16>
      tpu.vector_store %arg19[%104, %c0_64], %103 {strides = array<i32>} : memref<256x4xbf16, #tpu.memory_space<vmem>>, vector<256x4xbf16>,
      %c1_i32_65 = arith.constant 1 : i32
    } else {
    }
    %c256_i32 = arith.constant 256 : i32
    %3 = arith.muli %arg1, %c256_i32 : i32
    %4 = tpu.assume_multiple %3, 256 : i32
    %5 = arith.index_cast %4 : i32 to index
    %c0 = arith.constant 0 : index
    %6 = vector.load %arg17[%5, %c0] : memref<256x4xbf16, #tpu.memory_space<vmem>>, vector<256x4xbf16>
    %c0_1 = arith.constant 0 : index
    %c0_2 = arith.constant 0 : index
    %7 = vector.load %arg18[%c0_1, %c0_2] : memref<4x256xbf16, #tpu.memory_space<vmem>>, vector<4x256xbf16>
    %cst = arith.constant dense<0.000000e+00> : vector<256x256xf32>
    %8 = tpu.matmul %6, %7, %cst {dimension_numbers = #tpu.dot_dimension_numbers<[1], [0], [0], [1], [0, 0, 1, 1], [], []>} : vector<256x4xbf16>, vector<4x256xbf16>, vector<256x256xf32> -> vector<256x256xf32>
    %cst_3 = arith.constant dense<0xFF800000> : vector<256xf32>
    %9 = vector.multi_reduction <maximumf>, %8, %cst_3 [1] : vector<256x256xf32> to vector<256xf32>
    %10 = vector.shape_cast %9 : vector<256xf32> to vector<256x1xf32>
    %11 = vector.broadcast %10 : vector<256x1xf32> to vector<256x256xf32>
    %12 = arith.subf %8, %11 : vector<256x256xf32>
    %13 = arith.truncf %12 : vector<256x256xf32> to vector<256x256xbf16>
    %14 = math.exp %13 : vector<256x256xbf16>
    %15 = arith.extf %14 : vector<256x256xbf16> to vector<256x256xf32>
    %cst_4 = arith.constant dense<0.000000e+00> : vector<256xf32>
    %16 = vector.multi_reduction <add>, %15, %cst_4 [1] : vector<256x256xf32> to vector<256xf32>
    %17 = vector.shape_cast %16 : vector<256xf32> to vector<256x1xf32>
    %c0_5 = arith.constant 0 : index
    %c0_6 = arith.constant 0 : index
    %18 = vector.load %arg19[%c0_5, %c0_6] : memref<256x4xbf16, #tpu.memory_space<vmem>>, vector<256x4xbf16>
    %cst_7 = arith.constant dense<0.000000e+00> : vector<256x4xf32>
    %19 = tpu.matmul %14, %18, %cst_7 {dimension_numbers = #tpu.dot_dimension_numbers<[1], [0], [0], [1], [0, 0, 1, 1], [], []>} : vector<256x256xbf16>, vector<256x4xbf16>, vector<256x4xf32> -> vector<256x4xf32>
    %20 = tpu.reciprocal %17 : vector<256x1xf32> -> vector<256x1xf32>
    %21 = vector.broadcast %20 : vector<256x1xf32> to vector<256x4xf32>
    %22 = arith.mulf %19, %21 : vector<256x4xf32>
    %23 = arith.truncf %22 : vector<256x4xf32> to vector<256x4xbf16>
    %c0_8 = arith.constant 0 : index
    %c0_9 = arith.constant 0 : index
    %24 = vector.load %arg13[%c0_8, %c0_9] : memref<4x4xbf16, #tpu.memory_space<vmem>>, vector<4x4xbf16>
    %cst_10 = arith.constant dense<0.000000e+00> : vector<4x256xf32>
    %25 = tpu.matmul %24, %23, %cst_10 {dimension_numbers = #tpu.dot_dimension_numbers<[1], [1], [0], [0], [0, 0, 1, 0], [], []>} : vector<4x4xbf16>, vector<256x4xbf16>, vector<4x256xf32> -> vector<4x256xf32>
    %c0_11 = arith.constant 0 : index
    %c0_12 = arith.constant 0 : index
    %26 = vector.load %arg14[%c0_11, %c0_12] : memref<4x1xf32, #tpu.memory_space<vmem>>, vector<4x1xf32>
    %27 = vector.broadcast %26 : vector<4x1xf32> to vector<4x256xf32>
    %28 = arith.addf %25, %27 : vector<4x256xf32>
    %c0_13 = arith.constant 0 : index
    %c0_14 = arith.constant 0 : index
    %c0_15 = arith.constant 0 : index
    %29 = vector.load %arg3[%c0_13, %c0_14, %c0_15] : memref<1x4x256xf32, #tpu.memory_space<vmem>>, vector<1x4x256xf32>
    %30 = vector.shape_cast %29 : vector<1x4x256xf32> to vector<4x256xf32>
    %31 = arith.addf %30, %28 : vector<4x256xf32>
    %c0_16 = arith.constant 0 : index
    %c0_17 = arith.constant 0 : index
    %c0_18 = arith.constant 0 : index
    %32 = vector.load %arg15[%c0_16, %c0_17, %c0_18] : memref<1x4x256xf32, #tpu.memory_space<vmem>>, vector<1x4x256xf32>
    %33 = vector.shape_cast %32 : vector<1x4x256xf32> to vector<4x256xf32>
    %34 = vector.shape_cast %31 : vector<4x256xf32> to vector<1x4x256xf32>
    tpu.vector_store %arg15[%c0_16, %c0_17, %c0_18], %34 {strides = array<i32>} : memref<1x4x256xf32, #tpu.memory_space<vmem>>, vector<1x4x256xf32>,
    return
  }
  func.func @transform_1(%arg0: i32, %arg1: i32) -> (i32, i32, i32) {
    %c0_i32 = arith.constant 0 : i32
    %c0_i32_0 = arith.constant 0 : i32
    return %arg0, %c0_i32, %arg1 : i32, i32, i32
  }
  func.func @transform_2(%arg0: i32, %arg1: i32) -> (i32, i32) {
    %c0_i32 = arith.constant 0 : i32
    %c0_i32_0 = arith.constant 0 : i32
    %c0_i32_1 = arith.constant 0 : i32
    return %c0_i32, %c0_i32_0 : i32, i32
  }
  func.func @transform_3(%arg0: i32, %arg1: i32) -> (i32, i32) {
    %c0_i32 = arith.constant 0 : i32
    %c0_i32_0 = arith.constant 0 : i32
    %c0_i32_1 = arith.constant 0 : i32
    return %c0_i32, %c0_i32_0 : i32, i32
  }
  func.func @transform_4(%arg0: i32, %arg1: i32) -> (i32, i32) {
    %c0_i32 = arith.constant 0 : i32
    %c0_i32_0 = arith.constant 0 : i32
    %c0_i32_1 = arith.constant 0 : i32
    return %c0_i32, %c0_i32_0 : i32, i32
  }
  func.func @transform_5(%arg0: i32, %arg1: i32) -> (i32, i32) {
    %c0_i32 = arith.constant 0 : i32
    %c0_i32_0 = arith.constant 0 : i32
    %c0_i32_1 = arith.constant 0 : i32
    return %c0_i32, %c0_i32_0 : i32, i32
  }
  func.func @transform_6(%arg0: i32, %arg1: i32) -> (i32, i32) {
    %c0_i32 = arith.constant 0 : i32
    %c0_i32_0 = arith.constant 0 : i32
    %c0_i32_1 = arith.constant 0 : i32
    return %c0_i32, %c0_i32_0 : i32, i32
  }
  func.func @transform_7(%arg0: i32, %arg1: i32) -> (i32, i32) {
    %c0_i32 = arith.constant 0 : i32
    %c0_i32_0 = arith.constant 0 : i32
    %c0_i32_1 = arith.constant 0 : i32
    return %c0_i32, %c0_i32_0 : i32, i32
  }
  func.func @transform_8(%arg0: i32, %arg1: i32) -> (i32, i32) {
    %c0_i32 = arith.constant 0 : i32
    %c0_i32_0 = arith.constant 0 : i32
    %c0_i32_1 = arith.constant 0 : i32
    return %c0_i32, %c0_i32_0 : i32, i32
  }
  func.func @transform_9(%arg0: i32, %arg1: i32) -> (i32, i32) {
    %c0_i32 = arith.constant 0 : i32
    %c0_i32_0 = arith.constant 0 : i32
    %c0_i32_1 = arith.constant 0 : i32
    return %c0_i32, %c0_i32_0 : i32, i32
  }
  func.func @transform_10(%arg0: i32, %arg1: i32) -> (i32, i32) {
    %c0_i32 = arith.constant 0 : i32
    %c0_i32_0 = arith.constant 0 : i32
    %c0_i32_1 = arith.constant 0 : i32
    return %c0_i32, %c0_i32_0 : i32, i32
  }
  func.func @transform_11(%arg0: i32, %arg1: i32) -> (i32, i32) {
    %c0_i32 = arith.constant 0 : i32
    %c0_i32_0 = arith.constant 0 : i32
    %c0_i32_1 = arith.constant 0 : i32
    return %c0_i32, %c0_i32_0 : i32, i32
  }
  func.func @transform_12(%arg0: i32, %arg1: i32) -> (i32, i32) {
    %c0_i32 = arith.constant 0 : i32
    %c0_i32_0 = arith.constant 0 : i32
    %c0_i32_1 = arith.constant 0 : i32
    return %c0_i32, %c0_i32_0 : i32, i32
  }
  func.func @transform_13(%arg0: i32, %arg1: i32) -> (i32, i32, i32) {
    %c0_i32 = arith.constant 0 : i32
    %c0_i32_0 = arith.constant 0 : i32
    return %arg0, %c0_i32, %arg1 : i32, i32, i32
  }
}

</mosaic_0001>

<bundles_post_ra>
// kernel: tpu_custom_call.1
= control target key start
LH: loop header
LB: loop body
LE: loop exit
PB: predicated region body
PF: predicated region fallthrough
CT: control target
= control target key end

     0   :  { %s5435_s0 = inlined_call_operand.hbm [shape: f32[2,4,256], index: 0, kind: input, shape index: {}]   ;;  %s5436_s1 = inlined_call_operand.hbm [shape: f32[2,4,256], index: 1, kind: input, shape index: {}]   ;;  %s5437_s2 = inlined_call_operand.vmem [shape: f32[4,1], index: 2, kind: input, shape index: {}]   ;;  %s5438_s3 = inlined_call_operand.vmem [shape: f32[4,1], index: 3, kind: input, shape index: {}]   ;;  %s5439_s4 = inlined_call_operand.vmem [shape: f32[1,4], index: 4, kind: input, shape index: {}]   ;;  %s5440_s5 = inlined_call_operand.vmem [shape: bf16[4,4], index: 5, kind: input, shape index: {}]   ;;  %s5441_s6 = inlined_call_operand.vmem [shape: bf16[4,4], index: 6, kind: input, shape index: {}]   ;;  %s5442_s7 = inlined_call_operand.vmem [shape: bf16[4,4], index: 7, kind: input, shape index: {}]   ;;  %s5443_s8 = inlined_call_operand.vmem [shape: f32[1,4], index: 8, kind: input, shape index: {}]   ;;  %s5444_s9 = inlined_call_operand.vmem [shape: f32[4,1], index: 9, kind: input, shape index: {}]   ;;  %s5445_s10 = inlined_call_operand.vmem [shape: f32[1,4], index: 10, kind: input, shape index: {}]   ;;  %s5446_s11 = inlined_call_operand.vmem [shape: bf16[4,4], index: 11, kind: input, shape index: {}]   ;;  %s5447_s12 = inlined_call_operand.vmem [shape: f32[4,1], index: 12, kind: input, shape index: {}]   ;;  %s5448_s13 = inlined_call_operand.hbm [shape: f32[2,4,256], index: 13, kind: output, shape index: {}]  }
   0x1   :  { %5456 = sst [smem:[#allocation27_spill]] %s5436_s1 }
   0x2   :  { %5457 = sst [smem:[#allocation28_spill]] %s5446_s11 }
   0x3   :  { %5458 = sst [smem:[#allocation29_spill]] %s5447_s12 }
   0x4   :  { %5459 = sst [smem:[#allocation30_spill]] %s5448_s13 }
   0x5   :  { %18 = vsyncpa [#allocation8], 0 }
   0x6   :  { %20 = vsyncpa [#allocation8 + $0x1], 0 }
   0x7   :  { %21 = vsyncpa [#allocation9], 0 }
   0x8   :  { %23 = vsyncpa [#allocation9 + $0x1], 0  ;;  %s3820_s25 = smov 0   ;;  %s3822_s26 = smov 0  }
   0x9   :  { %s3824_s27 = smov 0   ;;  %s3826_s28 = smov 0  }
   0xa   :  { %s3828_s29 = smov 0   ;;  %s3830_s30 = smov 0  }
   0xb LB: > { %5460 = sst [smem:[#allocation18_spill]] %s3724_s25  ;;  %s3079_s14 = sadd.s32 4294967295, %s3744_s30   ;;  %s3744_s30 = sphi %s3830_s30, %s29_s30   ;;  %s3740_s29 = sphi %s3828_s29, %s5561_s29   ;;  %s3736_s28 = sphi %s3826_s28, %s5560_s28   ;;  %s3732_s27 = sphi %s3824_s27, %s5559_s27   ;;  %s3728_s26 = sphi %s3822_s26, %s5563_s26   ;;  %s3724_s25 = sphi %s3820_s25, %s5562_s25  }
   0xc   : > { %5461 = sst [smem:[#allocation19_spill]] %s3732_s27  ;;  %s3080_s15 = sadd.s32 4294967294, %s3744_s30  }
   0xd   : > { %5462 = sst [smem:[#allocation20_spill]] %s3740_s29  ;;  %s41_s16 = sadd.s32 1, %s3740_s29 }
   0xe   : > { %s50_s17 = sadd.s32 1, %s3732_s27  ;;  %p43_p0 = scmp.ge.s32.totalorder %s41_s16, 2 }
   0xf   : > { %p57_p1 = scmp.ne.s32.totalorder %s3732_s27, %s3728_s26  ;;  %p58_p2 = scmp.eq.s32.totalorder %s3744_s30, 0 }
  0x10   : > { %p63_p3 = scmp.ne.s32.totalorder %s3728_s26, %s3724_s25  ;;  %s5565_s16 = smov (%p43_p0, %s41_s16), 0 }
  0x11   : > { %5463 = sst [smem:[#allocation21_spill]] %s5565_s16  ;;  %p3861_p4 = por %p58_p2, %p57_p1 }
  0x12   : > { %p64_p5 = scmp.eq.s32.totalorder %s3079_s14, 0  ;;  %s45_s19 = ssub.s32 %s3740_s29, %s5565_s16 }
  0x13   : > { %p320_p6 = scmp.eq.s32.totalorder %s3079_s14, 1  ;;  %p48_p7 = scmp.eq.s32.totalorder %s45_s19, 0 }
  0x14   : > { %p3867_p8 = por %p64_p5, %p63_p3  ;;  %p326_p10 = scmp.eq.s32.totalorder %s3080_s15, 1 }
  0x15   : > { %p3871_p9 = por %p320_p6, %p57_p1  ;;  %p3082_p12 = scmp.ge.s32.totalorder %s3744_s30, 2 }
  0x16   : > { %s3876_s22 = scalar_select %p48_p7, %s3732_s27, %s50_s17  }
  0x17   : > { %s5466_s21 = scalar_select %p3871_p9, 1, 0 }
  0x18   : > { %5468 = sst [smem:[#allocation23_spill]] %s3876_s22  ;;  %p3878_p11 = por %p326_p10, %p63_p3 }
  0x19   : > { %5467 = sst [smem:[#allocation22_spill]] %s5466_s21  ;;  %p3350_p13 = scmp.lt.s32.totalorder %s3744_s30, 2 }
  0x1a   : > { %s379_s24 = sand.u32 1, %s3732_s27   ;;  %s3301_s19 = sshll.u32 %s3740_s29, 3 }
  0x1b   : > { %s3083_s14 = sshll.u32 %s379_s24, 3  ;;  %s5470_s1 = sld [smem:[#allocation27_spill]] }
  0x1c   : > { %s383_s11 = scalar_lea.vmem [#allocation7], %s3083_s14  ;;  %p3343_p0 = pnand %p3350_p13, %p3861_p4 }
  0x1d   : > { %s394_s21 = sshll.u32 %s383_s11, 4  ;;  %p3086_p1 = scmp.ge.s32.totalorder %s3744_s30, 1  ;;  %s395_s21 = int_to_ptr.vmem [resolvable:$true] %s394_s21 }
  0x1e   : > { %p399_p2 = scmp.lt.s32.totalorder %s3744_s30, 3  ;;  %s380_s15 = scalar_lea.sflag [#allocation8], %s379_s24 }
  0x20   : > { %p400_p3 = pnand %p3086_p1, %p399_p2 }
  0x21   : > { %s390_s13 = scalar_lea.hbm %s5470_s1, %s3301_s19 }
  0x22   : > { %s392_s12 = sshll.u32 %s390_s13, 4  ;;  %403 = sbr.rel (%p400_p3) target bundleno = 1788 (0x6fc), region = 68  ;;  %s393_s12 = int_to_ptr.hbm [resolvable:$true] %s392_s12 }
  0x23   : > { %3345 = dma.hbm_to_vmem [thread:$0]  (!%p3343_p0), %s393_s12, 128, %s395_s21, %s380_s15  }
  0x27   : > { %s3894_s17 = sand.u32 1, %s3728_s26  }
  0x28   : > { %s3087_s25 = sshll.u32 %s3894_s17, 3  ;;  %s406_s16 = scalar_lea.sflag [#allocation8], %s3894_s17 }
  0x29   : > { %s3898_s11 = scalar_lea.vmem [#allocation7], %s3087_s25 }
  0x2a   : > { %3713 = dma.done.wait (%p3867_p8), %s406_s16, 128  }
  0x2b   : > { %3715 = vsyncadd (%p3867_p8), %s406_s16, 4294967168  ;;  %s3302_s12 = sshll.u32 %s3736_s28, 3  ;;  %s3746_s14 = smov [#allocation2]  }
  0x2c   : > { %s460_s21 = scalar_lea.hbm %s5435_s0, %s3302_s12  ;;  %s470_s19 = sshll.u32 %s3746_s14, 4  ;;  %s471_s19 = int_to_ptr.vmem [resolvable:$true] %s470_s19 }
  0x2d   : > { %s468_s24 = sshll.u32 %s460_s21, 4  ;;  %s3640_s16 = scalar_lea.hbm %s5435_s0, 16  ;;  %s469_s24 = int_to_ptr.hbm [resolvable:$true] %s468_s24 }
  0x2e   : > { %s3636_s15 = sshra.s32 %s469_s24, 4  ;;  %s3637_s15 = int_to_ptr.hbm [resolvable:$true] %s3636_s15 }
  0x2f   : > { %s3638_s1 = scalar_lea.hbm %s3637_s15, 8  ;;  %p3641_p5 = scmp.lt.s32.totalorder %s3637_s15, %s5435_s0 }
  0x30   : > { %p3639_p4 = scmp.ne.s32.totalorder %s3637_s15, %s3638_s1  ;;  %p3642_p6 = scmp.lt.s32.totalorder %s3640_s16, %s3638_s1 }
  0x32   : > { %p3643_p7 = por %p3642_p6, %p3641_p5 }
  0x34   : > { %p3644_p8 = pnand %p3643_p7, %p3639_p4 }
  0x36   : > { %3647 = shalt.err (!%p3644_p8)  }
  0x37   : > { %473 = dma.hbm_to_vmem [thread:$0]  %s469_s24, 128, %s471_s19, [#allocation6] }
  0x38   : > { %s3916_s13 = scalar_lea.vmem [#allocation10], %s3087_s25 }
  0x39   : > { %3716 = dma.done.wait [#allocation6], 128 }
  0x3a   : > { %3717 = vsyncadd [#allocation6], 4294967168  ;;  %v3918_v0 = vld [vmem:[#allocation2] sm:$0xff]  ;;  %v478_v1 = vld [vmem:[%s5439_s4] sm:$0x1]  ;;  %vm486_vm0 = vcmask 1043456  }
  0x3b   : > { %481 = vst [vmem:[#allocation1] ss:$2 sm:$0xff] %v3918_v0  ;;  %579 = vxpose.xlu1.b32.start.end [1/1] (short) (narrow) %v478_v1, 8  ;;  %v493_v2 = vmul.f32 %v3918_v0, %v3918_v0  ;;  %vm506_vm1 = vcmask 31744   ;;  %v3747_v15 = vmov 1024.0   ;;  %vm615_vm3 = vcmask 1040384  }
  0x3c   : > { %3410 = vrcp.f32 %v3747_v15  ;;  %vm611_vm4 = vcmask 7168   ;;  %v3748_v38 = vmov 0   ;;  %v662_v39 = vld [vmem:[%s5437_s2] sm:$0xf]  ;;  %v3749_v47 = vmov 839922192  }
  0x3d   : > { %3406 = vset.pattern.permute.xlu2 %v3748_v38  ;;  %3407 = vset.pattern.permute.xlu0 %v3748_v38  ;;  %v664_v43 = vld [vmem:[%s5438_s3] sm:$0xf]  ;;  %v678_v48 = vunpack.c.l.s4 %v3749_v47  ;;  %vm709_vm8 = vcmask 1041408   ;;  %vm949_vm9 = vcmask 27648   ;;  %s5481_s24 = sld [smem:[#allocation29_spill]]  ;;  %s2982_s27 = sshll.u32 %s3916_s13, 4  ;;  %s2983_s27 = int_to_ptr.vmem [resolvable:$true] %s2982_s27 }
  0x3e   : > { %v671_v46 = vld [vmem:[%s5444_s9] sm:$0xf]  ;;  %s5554_s15 = sld [smem:[#allocation28_spill]]  ;;  %s2967_s28 = scalar_lea.sflag [#allocation9], %s3894_s17 }
  0x3f   : > { %v679_v49 = vunpack.c.0.s8 %v678_v48  ;;  %v668_v62 = vld [vmem:[%s5441_s6] sm:$0x3]  ;;  %s5555_s18 = sld [smem:[#allocation30_spill]] }
  0x40   : > { %v667_v63 = vld [vmem:[%s5440_s5] sm:$0x3] }
  0x42   : > { %v482_v3 = vld.sshfl [vmem:[#allocation1] sm:$0xff pattern:$0x75316420]  ;;  %v483_v4 = vld.sshfl [vmem:[#allocation1 + $0x8] sm:$0xff pattern:$0x75316420]  ;;  %v3411_v16 = vpop.eup %3410 }
  0x43   : > { %v487_v5 = vsel %vm486_vm0, %v482_v3, 0.0  ;;  %v488_v6 = vsel %vm486_vm0, %v483_v4, 0.0  ;;  %495 = vst [vmem:[#allocation1] ss:$2 sm:$0xff] %v493_v2  ;;  %v534_v17 = vmul.f32 1024.0, %v3411_v16  ;;  %vm538_vm2 = vweird.f32 %v3411_v16 }
  0x44   : > { %v489_v7 = vadd.f32 %v488_v6, %v487_v5 }
  0x45   : > { %v535_v18 = vsub.f32 1.0, %v534_v17  ;;  %s2980_s21 = scalar_lea.hbm %s5555_s18, %s3302_s12 }
  0x46   : > { %490 = vadd.xlane.f32.xlu0 %v489_v7  ;;  %s2984_s29 = sshll.u32 %s2980_s21, 4  ;;  %s2985_s29 = int_to_ptr.hbm [resolvable:$true] %s2984_s29 }
  0x47   : > { %v536_v19 = vmul.f32 %v3411_v16, %v535_v18  ;;  %s3674_s22 = sshra.s32 %s2985_s29, 4  ;;  %s3675_s22 = int_to_ptr.hbm [resolvable:$true] %s3674_s22 }
  0x48   : > { %s3676_s25 = scalar_lea.hbm %s3675_s22, 8  ;;  %p3681_p1 = scmp.lt.s32.totalorder %s3675_s22, %s5555_s18 }
  0x49   : > { %v537_v20 = vadd.f32 %v3411_v16, %v536_v19  ;;  %p3677_p10 = scmp.ne.s32.totalorder %s3675_s22, %s3676_s25 }
  0x4a   : > { %v496_v8 = vld.sshfl [vmem:[#allocation1] sm:$0xff pattern:$0x75316420]  ;;  %v497_v9 = vld.sshfl [vmem:[#allocation1 + $0x8] sm:$0xff pattern:$0x75316420] }
  0x4b   : > { %v500_v10 = vsel %vm486_vm0, %v496_v8, 0.0  ;;  %v501_v11 = vsel %vm486_vm0, %v497_v9, 0.0  ;;  %v539_v21 = vsel %vm538_vm2, %v3411_v16, %v537_v20  ;;  %p3678_p13 = pnand %p3677_p10, %p3871_p9 }
  0x4c   : > { %v502_v12 = vadd.f32 %v501_v11, %v500_v10 }
  0x4d   : > { %p3679_p0 = pneg %p3678_p13 }
  0x4e   : > { %503 = vadd.xlane.f32.xlu0 %v502_v12 }
  0x62   : > { %703 = vperm.xlu0 %3407, %v671_v46  }
  0x8e   : > { %3405 = vset.pattern.permute.xlu1 %v3748_v38 }
  0xb9   : > { %v491_v13 = vpop.xlane.xlu0 %490 }
  0xba   : > { %3091 = vmatpush.msk.msra.mxu0 %vm486_vm0, %v491_v13 }
  0xbb   : > { %3092 = vmatmul.msk.f32.vlgmr.msra.gmra.mxu0 %vm506_vm1, %v478_v1 }
  0xc1   : > { %v504_v14 = vpop.xlane.xlu0 %503 }
  0xc2   : > { %3093 = vmatpush.msk.msra.mxu1 %vm486_vm0, %v504_v14 }
  0xc3   : > { %3094 = vmatmul.msk.f32.vlgmr.msra.gmra.mxu1 %vm506_vm1, %v478_v1  ;;  %v826_v1 = vsel %vm506_vm1, %v667_v63, 0 }
  0xd4   : > { %v704_v3 = vpop.permute.xlu0 %703 }
  0xdf   : > { %v595_v24 = vpop.trf.xlu1 }
 0x138   : > { %v530_v22 = vpop.f32.mrf.mxu0 }
 0x139   : > { %v540_v23 = vmul.f32 %v539_v21, %v530_v22 }
 0x13b   : > { %3095 = vmatpush.msk.msra.mxu2 %vm615_vm3, %v540_v23  ;;  %v565_v25 = vmul.f32 %v540_v23, %v540_v23 }
 0x13c   : > { %3096 = vmatmul.msk.f32.vlgmr.msra.gmra.mxu2 %vm611_vm4, %v595_v24 }
 0x13d   : > { %3336 = vmatpush.bf16.xpose.msrb.mxu2 %v826_v1 }
 0x140   : > { %v561_v26 = vpop.f32.mrf.mxu1 }
 0x141   : > { %v564_v27 = vmul.f32 %v561_v26, %v539_v21 }
 0x143   : > { %v566_v28 = vsub.f32 %v564_v27, %v565_v25 }
 0x145   : > { %v567_v29 = vmax.f32 %v566_v28, 0.0 }
 0x147   : > { %v568_v30 = vadd.f32 1e-05, %v567_v29 }
 0x149   : > { %3412 = vrsqrt.f32 %v568_v30  ;;  %vm575_vm6 = vweird.f32 %v568_v30 }
 0x14f   : > { %v3413_v31 = vpop.eup %3412 }
 0x150   : > { %v570_v32 = vmul.f32 %v3413_v31, %v568_v30  ;;  %vm576_vm5 = vweird.f32 %v3413_v31 }
 0x151   : > { %vm577_vm7 = vmor %vm575_vm6, %vm576_vm5 }
 0x152   : > { %v571_v33 = vmul.f32 %v3413_v31, %v570_v32 }
 0x154   : > { %v572_v34 = vmul.f32 0.5, %v571_v33  ;;  %v3995_v33 = vld [vmem:[%s5443_s8] ss:$0 sm:$0xff] }
 0x156   : > { %v573_v35 = vsub.f32 1.5, %v572_v34  ;;  %v4000_v34 = vld [vmem:[%s5445_s10] ss:$0 sm:$0xff] }
 0x158   : > { %v574_v36 = vmul.f32 %v3413_v31, %v573_v35 }
 0x15a   : > { %v578_v37 = vsel %vm577_vm7, %v3413_v31, %v574_v36 }
 0x15b   : > { %3097 = vmatpush.msk.msra.mxu3 %vm615_vm3, %v578_v37 }
 0x15c   : > { %3098 = vmatmul.msk.f32.vlgmr.msra.gmra.mxu3 %vm611_vm4, %v595_v24 }
 0x1bf   : > { %v636_v42 = vpop.f32.mrf.mxu2 }
 0x1df   : > { %v659_v40 = vpop.f32.mrf.mxu3 }
 0x1e0   : > { %v663_v41 = vmul.f32 %v662_v39, %v659_v40 }
 0x1e2   : > { %675 = vperm.xlu1 %3405, %v663_v41   ;;  %v665_v44 = vmul.f32 %v663_v41, %v636_v42 }
 0x1e4   : > { %v666_v45 = vsub.f32 %v664_v43, %v665_v44 }
 0x1e6   : > { %685 = vperm.xlu2 %3406, %v666_v45  }
 0x240   : > { %v686_v50 = vpop.permute.xlu2 %685 }
 0x241   : > { %v690_v53 = vperm.slane %v686_v50, %v679_v49 }
 0x254   : > { %v676_v51 = vpop.permute.xlu1 %675 }
 0x255   : > { %v680_v52 = vperm.slane %v676_v51, %v679_v49 }
 0x257   : > { %v682_v54 = vmul.f32 %v680_v52, %v3918_v0  ;;  %v669_v0 = vld [vmem:[%s5442_s7] sm:$0x3] }
 0x258   : > { %v986_v2 = vsel %vm506_vm1, %v669_v0, 0 }
 0x259   : > { %v692_v55 = vadd.f32 %v690_v53, %v682_v54  ;;  %3337 = vmatpush.bf16.xpose.msrb.mxu3 %v986_v2 }
 0x25b   : > { %694 = vst [vmem:[#allocation1] ss:$2 sm:$0xff] %v692_v55 }
 0x262   : > { %v695_v56 = vld.sshfl [vmem:[#allocation1] sm:$0xff pattern:$0x75316420]  ;;  %v696_v57 = vld.sshfl [vmem:[#allocation1 + $0x8] sm:$0xff pattern:$0x75316420] }
 0x263   : > { %v699_v58 = vpack.c.bf16 %v695_v56, %v695_v56  ;;  %v700_v59 = vpack.c.bf16 %v696_v57, %v696_v57 }
 0x265   : > { %753 = vxpose.binary.xlu2.c.b16.start.end [1/2] (short) %v700_v59, %v699_v58, 128  ;;  %v711_v60 = vsel %vm709_vm8, %v699_v58, 0  ;;  %v714_v61 = vsel %vm709_vm8, %v700_v59, 0 }
 0x266   : > { %723 = vmatpush.bf16.msrb.mxu0 %v711_v60  ;;  %736 = vmatpush.bf16.msrb.mxu1 %v714_v61 }
 0x269   : > { %3099 = vmatmul.msk.bf16.vlgmr.msrb.gmra.mxu0 %vm506_vm1, %v668_v62  ;;  %3100 = vmatmul.msk.bf16.vlgmr.msrb.gmra.mxu1 %vm506_vm1, %v668_v62 }
 0x26a   : > { %835 = vmatpush.bf16.xpose.msra.mxu0 %v826_v1  ;;  %995 = vmatpush.bf16.xpose.msra.mxu1 %v986_v2 }
 0x2e6   : > { %v725_v4 = vpop.f32.mrf.mxu0  ;;  %v738_v5 = vpop.f32.mrf.mxu1 }
 0x2e7   : > { %v726_v6 = vadd.f32 %v725_v4, %v704_v3  ;;  %v739_v7 = vadd.f32 %v738_v5, %v704_v3 }
 0x2e9   : > { %v742_v8 = vpack.c.bf16 %v739_v7, %v726_v6 }
 0x2eb   : > { %v744_v9 = vrot.slane %v742_v8, 2 }
 0x2ed   : > { %v747_v10 = vsel %vm709_vm8, %v742_v8, %v744_v9 }
 0x2ee   : > { %749 = vst [vmem:[#allocation4] sm:$0xf] %v747_v10  ;;  %v727_v11 = vpop.f32.mrf.mxu0  ;;  %v740_v12 = vpop.f32.mrf.mxu1 }
 0x2f5   : > { %v1178_v13 = vld [vmem:[#allocation4] sm:$0xf] }
 0x2f6   : > { %1260 = vst [vmem:[#allocation1] ss:$4 sm:$0xff] %v1178_v13 }
 0x2fd   : > { %v1261_v14 = vld.sshfl [vmem:[#allocation1] sm:$0xff pattern:$0x73625140]  ;;  %v1262_v15 = vld.sshfl [vmem:[#allocation1 + $0x8] sm:$0xff pattern:$0x73625140] }
 0x2fe   : > { %v1313_v16 = vsel %vm709_vm8, %v1261_v14, 0  ;;  %v1315_v17 = vsel %vm709_vm8, %v1262_v15, 0 }
 0x2ff   : > { %1324 = vmatpush.bf16.msrb.mxu0 %v1313_v16  ;;  %1413 = vmatpush.bf16.msrb.mxu1 %v1315_v17 }
 0x306   : > { %v761_v18 = vpop.trf.xlu2 }
 0x307   : > { %3101 = vmatmul.msk.bf16.vlgmr.msra.gmra.mxu0 %vm506_vm1, %v761_v18  ;;  %3117 = vmatmul.msk.bf16.vlgmr.msra.gmra.mxu1 %vm506_vm1, %v761_v18 }
 0x30e   : > { %v762_v19 = vpop.trf.xlu2 }
 0x316   : > { %v763_v20 = vpop.trf.xlu2 }
 0x317   : > { %3102 = vmatmul.msk.bf16.gmra.mxu0 %vm506_vm1, %v763_v20  ;;  %3118 = vmatmul.msk.bf16.gmra.mxu1 %vm506_vm1, %v763_v20 }
 0x31e   : > { %v764_v21 = vpop.trf.xlu2 }
 0x326   : > { %v765_v22 = vpop.trf.xlu2 }
 0x327   : > { %3103 = vmatmul.msk.bf16.gmra.mxu0 %vm506_vm1, %v765_v22  ;;  %3119 = vmatmul.msk.bf16.gmra.mxu1 %vm506_vm1, %v765_v22 }
 0x32e   : > { %v3972_v23 = vpop.trf.xlu2 }
 0x336   : > { %v767_v24 = vpop.trf.xlu2 }
 0x337   : > { %3104 = vmatmul.msk.bf16.gmra.mxu0 %vm506_vm1, %v767_v24  ;;  %3120 = vmatmul.msk.bf16.gmra.mxu1 %vm506_vm1, %v767_v24 }
 0x33e   : > { %v3976_v25 = vpop.trf.xlu2 }
 0x346   : > { %v769_v26 = vpop.trf.xlu2 }
 0x347   : > { %3105 = vmatmul.msk.bf16.gmra.mxu0 %vm506_vm1, %v769_v26  ;;  %3121 = vmatmul.msk.bf16.gmra.mxu1 %vm506_vm1, %v769_v26 }
 0x34e   : > { %v3980_v27 = vpop.trf.xlu2 }
 0x356   : > { %v771_v28 = vpop.trf.xlu2 }
 0x357   : > { %3106 = vmatmul.msk.bf16.gmra.mxu0 %vm506_vm1, %v771_v28  ;;  %3122 = vmatmul.msk.bf16.gmra.mxu1 %vm506_vm1, %v771_v28 }
 0x35e   : > { %v3984_v29 = vpop.trf.xlu2 }
 0x366   : > { %v773_v30 = vpop.trf.xlu2 }
 0x367   : > { %3107 = vmatmul.msk.bf16.gmra.mxu0 %vm506_vm1, %v773_v30  ;;  %3123 = vmatmul.msk.bf16.gmra.mxu1 %vm506_vm1, %v773_v30 }
 0x36e   : > { %v3988_v31 = vpop.trf.xlu2 }
 0x376   : > { %v775_v32 = vpop.trf.xlu2 }
 0x377   : > { %3108 = vmatmul.msk.bf16.vlgmr.msrb.gmra.mxu2 %vm506_vm1, %v775_v32  ;;  %3124 = vmatmul.msk.bf16.vlgmr.msrb.gmra.mxu3 %vm506_vm1, %v775_v32 }
 0x384   : > { %v837_v35 = vpop.f32.mrf.mxu0  ;;  %v997_v36 = vpop.f32.mrf.mxu1 }
 0x385   : > { %v838_v37 = vadd.f32 %v3995_v33, %v837_v35  ;;  %v998_v38 = vadd.f32 %v4000_v34, %v997_v36 }
 0x387   : > { %v917_v39 = vpack.c.bf16 %v838_v37, %v838_v37  ;;  %v1077_v40 = vpack.c.bf16 %v998_v38, %v998_v38  ;;  %3109 = vmatmul.msk.bf16.gmra.mxu2 %vm506_vm1, %v762_v19  ;;  %3125 = vmatmul.msk.bf16.gmra.mxu3 %vm506_vm1, %v762_v19 }
 0x389   : > { %950 = vst.msk [vmem:[#allocation3] sm:$0xf] %vm949_vm9, %v917_v39 }
 0x38a   : > { %1109 = vst.msk [vmem:[#allocation5] sm:$0xf] %vm949_vm9, %v1077_v40 }
 0x38c   : > { %v839_v41 = vpop.f32.mrf.mxu0  ;;  %v999_v42 = vpop.f32.mrf.mxu1 }
 0x38d   : > { %v840_v43 = vadd.f32 %v3995_v33, %v839_v41  ;;  %v1000_v44 = vadd.f32 %v4000_v34, %v999_v42 }
 0x38f   : > { %v918_v45 = vpack.c.bf16 %v840_v43, %v840_v43  ;;  %v1078_v46 = vpack.c.bf16 %v1000_v44, %v1000_v44 }
 0x391   : > { %951 = vst.msk [vmem:[#allocation3 + $0x4] sm:$0xf] %vm949_vm9, %v918_v45 }
 0x392   : > { %1110 = vst.msk [vmem:[#allocation5 + $0x4] sm:$0xf] %vm949_vm9, %v1078_v46 }
 0x394   : > { %v842_v47 = vpop.f32.mrf.mxu0  ;;  %v1002_v48 = vpop.f32.mrf.mxu1 }
 0x395   : > { %v843_v49 = vadd.f32 %v3995_v33, %v842_v47  ;;  %v1003_v50 = vadd.f32 %v4000_v34, %v1002_v48 }
 0x397   : > { %v919_v51 = vpack.c.bf16 %v843_v49, %v843_v49  ;;  %v1079_v52 = vpack.c.bf16 %v1003_v50, %v1003_v50  ;;  %3110 = vmatmul.msk.bf16.gmra.mxu2 %vm506_vm1, %v764_v21  ;;  %3126 = vmatmul.msk.bf16.gmra.mxu3 %vm506_vm1, %v764_v21 }
 0x398   : > { %v3303_v53 = vld [vmem:[#allocation3] sm:$0xff] }
 0x399   : > { %952 = vst.msk [vmem:[#allocation3 + $0x8] sm:$0xf] %vm949_vm9, %v919_v51  ;;  %3197 = vmatmul.msk.bf16.vlgmr.msrb.gmra.mxu0 %vm506_vm1, %v3303_v53  ;;  %3213 = vmatmul.msk.bf16.vlgmr.msrb.gmra.mxu1 %vm506_vm1, %v3303_v53 }
 0x39a   : > { %1111 = vst.msk [vmem:[#allocation5 + $0x8] sm:$0xf] %vm949_vm9, %v1079_v52 }
 0x39c   : > { %v844_v54 = vpop.f32.mrf.mxu0  ;;  %v1004_v55 = vpop.f32.mrf.mxu1 }
 0x39d   : > { %v845_v56 = vadd.f32 %v3995_v33, %v844_v54  ;;  %v1005_v57 = vadd.f32 %v4000_v34, %v1004_v55 }
 0x39f   : > { %v920_v58 = vpack.c.bf16 %v845_v56, %v845_v56  ;;  %v1080_v59 = vpack.c.bf16 %v1005_v57, %v1005_v57 }
 0x3a1   : > { %953 = vst.msk [vmem:[#allocation3 + $0xc] sm:$0xf] %vm949_vm9, %v920_v58 }
 0x3a2   : > { %1112 = vst.msk [vmem:[#allocation5 + $0xc] sm:$0xf] %vm949_vm9, %v1080_v59 }
 0x3a4   : > { %v847_v60 = vpop.f32.mrf.mxu0  ;;  %v1007_v61 = vpop.f32.mrf.mxu1 }
 0x3a5   : > { %v848_v62 = vadd.f32 %v3995_v33, %v847_v60  ;;  %v1008_v63 = vadd.f32 %v4000_v34, %v1007_v61 }
 0x3a7   : > { %v921_v0 = vpack.c.bf16 %v848_v62, %v848_v62  ;;  %v1081_v1 = vpack.c.bf16 %v1008_v63, %v1008_v63  ;;  %3111 = vmatmul.msk.bf16.gmra.mxu2 %vm506_vm1, %v3972_v23  ;;  %3127 = vmatmul.msk.bf16.gmra.mxu3 %vm506_vm1, %v3972_v23 }
 0x3a8   : > { %v3304_v2 = vld [vmem:[#allocation3 + $0x8] sm:$0xff] }
 0x3a9   : > { %954 = vst.msk [vmem:[#allocation3 + $0x10] sm:$0xf] %vm949_vm9, %v921_v0  ;;  %3198 = vmatmul.msk.bf16.gmra.mxu0 %vm506_vm1, %v3304_v2  ;;  %3214 = vmatmul.msk.bf16.gmra.mxu1 %vm506_vm1, %v3304_v2 }
 0x3aa   : > { %1113 = vst.msk [vmem:[#allocation5 + $0x10] sm:$0xf] %vm949_vm9, %v1081_v1 }
 0x3ac   : > { %v849_v3 = vpop.f32.mrf.mxu0  ;;  %v1009_v4 = vpop.f32.mrf.mxu1 }
 0x3ad   : > { %v850_v5 = vadd.f32 %v3995_v33, %v849_v3  ;;  %v1010_v6 = vadd.f32 %v4000_v34, %v1009_v4 }
 0x3af   : > { %v922_v7 = vpack.c.bf16 %v850_v5, %v850_v5  ;;  %v1082_v8 = vpack.c.bf16 %v1010_v6, %v1010_v6 }
 0x3b1   : > { %955 = vst.msk [vmem:[#allocation3 + $0x14] sm:$0xf] %vm949_vm9, %v922_v7 }
 0x3b2   : > { %1114 = vst.msk [vmem:[#allocation5 + $0x14] sm:$0xf] %vm949_vm9, %v1082_v8 }
 0x3b4   : > { %v852_v9 = vpop.f32.mrf.mxu0  ;;  %v1012_v10 = vpop.f32.mrf.mxu1 }
 0x3b5   : > { %v853_v11 = vadd.f32 %v3995_v33, %v852_v9  ;;  %v1013_v12 = vadd.f32 %v4000_v34, %v1012_v10 }
 0x3b7   : > { %v923_v13 = vpack.c.bf16 %v853_v11, %v853_v11  ;;  %v1083_v14 = vpack.c.bf16 %v1013_v12, %v1013_v12  ;;  %3112 = vmatmul.msk.bf16.gmra.mxu2 %vm506_vm1, %v3976_v25  ;;  %3128 = vmatmul.msk.bf16.gmra.mxu3 %vm506_vm1, %v3976_v25 }
 0x3b8   : > { %v3305_v15 = vld [vmem:[#allocation3 + $0x10] sm:$0xff] }
 0x3b9   : > { %956 = vst.msk [vmem:[#allocation3 + $0x18] sm:$0xf] %vm949_vm9, %v923_v13  ;;  %3199 = vmatmul.msk.bf16.gmra.mxu0 %vm506_vm1, %v3305_v15  ;;  %3215 = vmatmul.msk.bf16.gmra.mxu1 %vm506_vm1, %v3305_v15 }
 0x3ba   : > { %1115 = vst.msk [vmem:[#allocation5 + $0x18] sm:$0xf] %vm949_vm9, %v1083_v14 }
 0x3bc   : > { %v854_v16 = vpop.f32.mrf.mxu0  ;;  %v1014_v17 = vpop.f32.mrf.mxu1 }
 0x3bd   : > { %v855_v18 = vadd.f32 %v3995_v33, %v854_v16  ;;  %v1015_v19 = vadd.f32 %v4000_v34, %v1014_v17 }
 0x3bf   : > { %v924_v20 = vpack.c.bf16 %v855_v18, %v855_v18  ;;  %v1084_v21 = vpack.c.bf16 %v1015_v19, %v1015_v19 }
 0x3c1   : > { %957 = vst.msk [vmem:[#allocation3 + $0x1c] sm:$0xf] %vm949_vm9, %v924_v20 }
 0x3c2   : > { %1116 = vst.msk [vmem:[#allocation5 + $0x1c] sm:$0xf] %vm949_vm9, %v1084_v21 }
 0x3c4   : > { %v857_v22 = vpop.f32.mrf.mxu0  ;;  %v1017_v23 = vpop.f32.mrf.mxu1 }
 0x3c5   : > { %v858_v24 = vadd.f32 %v3995_v33, %v857_v22  ;;  %v1018_v25 = vadd.f32 %v4000_v34, %v1017_v23 }
 0x3c7   : > { %v925_v26 = vpack.c.bf16 %v858_v24, %v858_v24  ;;  %v1085_v28 = vpack.c.bf16 %v1018_v25, %v1018_v25  ;;  %3113 = vmatmul.msk.bf16.gmra.mxu2 %vm506_vm1, %v3980_v27  ;;  %3129 = vmatmul.msk.bf16.gmra.mxu3 %vm506_vm1, %v3980_v27 }
 0x3c8   : > { %v3306_v30 = vld [vmem:[#allocation3 + $0x18] sm:$0xff] }
 0x3c9   : > { %958 = vst.msk [vmem:[#allocation3 + $0x20] sm:$0xf] %vm949_vm9, %v925_v26  ;;  %3200 = vmatmul.msk.bf16.gmra.mxu0 %vm506_vm1, %v3306_v30  ;;  %3216 = vmatmul.msk.bf16.gmra.mxu1 %vm506_vm1, %v3306_v30 }
 0x3ca   : > { %1117 = vst.msk [vmem:[#allocation5 + $0x20] sm:$0xf] %vm949_vm9, %v1085_v28 }
 0x3cc   : > { %v859_v32 = vpop.f32.mrf.mxu0  ;;  %v1019_v35 = vpop.f32.mrf.mxu1 }
 0x3cd   : > { %v860_v36 = vadd.f32 %v3995_v33, %v859_v32  ;;  %v1020_v37 = vadd.f32 %v4000_v34, %v1019_v35 }
 0x3cf   : > { %v926_v38 = vpack.c.bf16 %v860_v36, %v860_v36  ;;  %v1086_v39 = vpack.c.bf16 %v1020_v37, %v1020_v37 }
 0x3d1   : > { %959 = vst.msk [vmem:[#allocation3 + $0x24] sm:$0xf] %vm949_vm9, %v926_v38 }
 0x3d2   : > { %1118 = vst.msk [vmem:[#allocation5 + $0x24] sm:$0xf] %vm949_vm9, %v1086_v39 }
 0x3d4   : > { %v862_v27 = vpop.f32.mrf.mxu0  ;;  %v1022_v40 = vpop.f32.mrf.mxu1 }
 0x3d5   : > { %v863_v41 = vadd.f32 %v3995_v33, %v862_v27  ;;  %v1023_v42 = vadd.f32 %v4000_v34, %v1022_v40 }
 0x3d7   : > { %v927_v43 = vpack.c.bf16 %v863_v41, %v863_v41  ;;  %v1087_v44 = vpack.c.bf16 %v1023_v42, %v1023_v42  ;;  %3114 = vmatmul.msk.bf16.gmra.mxu2 %vm506_vm1, %v3984_v29  ;;  %3130 = vmatmul.msk.bf16.gmra.mxu3 %vm506_vm1, %v3984_v29 }
 0x3d8   : > { %v3307_v45 = vld [vmem:[#allocation3 + $0x20] sm:$0xff] }
 0x3d9   : > { %960 = vst.msk [vmem:[#allocation3 + $0x28] sm:$0xf] %vm949_vm9, %v927_v43  ;;  %3201 = vmatmul.msk.bf16.gmra.mxu0 %vm506_vm1, %v3307_v45  ;;  %3217 = vmatmul.msk.bf16.gmra.mxu1 %vm506_vm1, %v3307_v45  ;;  %v3323_v40 = vld [vmem:[#allocation5 + $0x20] sm:$0xff] }
 0x3da   : > { %1119 = vst.msk [vmem:[#allocation5 + $0x28] sm:$0xf] %vm949_vm9, %v1087_v44 }
 0x3dc   : > { %v864_v46 = vpop.f32.mrf.mxu0  ;;  %v1024_v47 = vpop.f32.mrf.mxu1 }
 0x3dd   : > { %v865_v48 = vadd.f32 %v3995_v33, %v864_v46  ;;  %v1025_v49 = vadd.f32 %v4000_v34, %v1024_v47  ;;  %v3322_v46 = vld [vmem:[#allocation5 + $0x18] sm:$0xff] }
 0x3df   : > { %v928_v50 = vpack.c.bf16 %v865_v48, %v865_v48  ;;  %v1088_v51 = vpack.c.bf16 %v1025_v49, %v1025_v49 }
 0x3e1   : > { %961 = vst.msk [vmem:[#allocation3 + $0x2c] sm:$0xf] %vm949_vm9, %v928_v50 }
 0x3e2   : > { %1120 = vst.msk [vmem:[#allocation5 + $0x2c] sm:$0xf] %vm949_vm9, %v1088_v51 }
 0x3e4   : > { %v867_v29 = vpop.f32.mrf.mxu0  ;;  %v1027_v52 = vpop.f32.mrf.mxu1 }
 0x3e5   : > { %v868_v53 = vadd.f32 %v3995_v33, %v867_v29  ;;  %v1028_v54 = vadd.f32 %v4000_v34, %v1027_v52  ;;  %v3321_v29 = vld [vmem:[#allocation5 + $0x10] sm:$0xff] }
 0x3e7   : > { %v929_v55 = vpack.c.bf16 %v868_v53, %v868_v53  ;;  %v1089_v56 = vpack.c.bf16 %v1028_v54, %v1028_v54  ;;  %3115 = vmatmul.msk.bf16.gmra.mxu2 %vm506_vm1, %v3988_v31  ;;  %3131 = vmatmul.msk.bf16.gmra.mxu3 %vm506_vm1, %v3988_v31  ;;  %v776_v31 = vpop.trf.xlu2 }
 0x3e8   : > { %v3308_v57 = vld [vmem:[#allocation3 + $0x28] sm:$0xff] }
 0x3e9   : > { %962 = vst.msk [vmem:[#allocation3 + $0x30] sm:$0xf] %vm949_vm9, %v929_v55  ;;  %3202 = vmatmul.msk.bf16.gmra.mxu0 %vm506_vm1, %v3308_v57  ;;  %3218 = vmatmul.msk.bf16.gmra.mxu1 %vm506_vm1, %v3308_v57  ;;  %v3324_v35 = vld [vmem:[#allocation5 + $0x28] sm:$0xff] }
 0x3ea   : > { %1121 = vst.msk [vmem:[#allocation5 + $0x30] sm:$0xf] %vm949_vm9, %v1089_v56  ;;  %v3320_v56 = vld [vmem:[#allocation5 + $0x8] sm:$0xff] }
 0x3ec   : > { %v869_v58 = vpop.f32.mrf.mxu0  ;;  %v1029_v59 = vpop.f32.mrf.mxu1 }
 0x3ed   : > { %v870_v60 = vadd.f32 %v3995_v33, %v869_v58  ;;  %v1030_v61 = vadd.f32 %v4000_v34, %v1029_v59 }
 0x3ef   : > { %v930_v62 = vpack.c.bf16 %v870_v60, %v870_v60  ;;  %v1090_v63 = vpack.c.bf16 %v1030_v61, %v1030_v61 }
 0x3f1   : > { %963 = vst.msk [vmem:[#allocation3 + $0x34] sm:$0xf] %vm949_vm9, %v930_v62  ;;  %v3319_v62 = vld [vmem:[#allocation5] sm:$0xff] }
 0x3f2   : > { %1122 = vst.msk [vmem:[#allocation5 + $0x34] sm:$0xf] %vm949_vm9, %v1090_v63 }
 0x3f7   : > { %3116 = vmatmul.msk.bf16.gmra.mxu2 %vm506_vm1, %v776_v31  ;;  %3132 = vmatmul.msk.bf16.gmra.mxu3 %vm506_vm1, %v776_v31 }
 0x3f8   : > { %v3309_v0 = vld [vmem:[#allocation3 + $0x30] sm:$0xff] }
 0x3f9   : > { %3203 = vmatmul.msk.bf16.gmra.mxu0 %vm506_vm1, %v3309_v0  ;;  %3219 = vmatmul.msk.bf16.gmra.mxu1 %vm506_vm1, %v3309_v0  ;;  %v3325_v25 = vld [vmem:[#allocation5 + $0x30] sm:$0xff] }
 0x3fa   : > { %v872_v1 = vpop.f32.mrf.mxu2  ;;  %v1032_v2 = vpop.f32.mrf.mxu3 }
 0x3fb   : > { %v873_v3 = vadd.f32 %v3995_v33, %v872_v1  ;;  %v1033_v4 = vadd.f32 %v4000_v34, %v1032_v2 }
 0x3fd   : > { %v931_v5 = vpack.c.bf16 %v873_v3, %v873_v3  ;;  %v1091_v6 = vpack.c.bf16 %v1033_v4, %v1033_v4 }
 0x3ff   : > { %964 = vst.msk [vmem:[#allocation3 + $0x38] sm:$0xf] %vm949_vm9, %v931_v5 }
 0x400   : > { %1123 = vst.msk [vmem:[#allocation5 + $0x38] sm:$0xf] %vm949_vm9, %v1091_v6 }
 0x402   : > { %v874_v7 = vpop.f32.mrf.mxu2  ;;  %v1034_v8 = vpop.f32.mrf.mxu3 }
 0x403   : > { %v875_v9 = vadd.f32 %v3995_v33, %v874_v7  ;;  %v1035_v10 = vadd.f32 %v4000_v34, %v1034_v8 }
 0x405   : > { %v932_v11 = vpack.c.bf16 %v875_v9, %v875_v9  ;;  %v1092_v12 = vpack.c.bf16 %v1035_v10, %v1035_v10 }
 0x407   : > { %965 = vst.msk [vmem:[#allocation3 + $0x3c] sm:$0xf] %vm949_vm9, %v932_v11 }
 0x408   : > { %1124 = vst.msk [vmem:[#allocation5 + $0x3c] sm:$0xf] %vm949_vm9, %v1092_v12 }
 0x40a   : > { %v877_v13 = vpop.f32.mrf.mxu2  ;;  %v1037_v14 = vpop.f32.mrf.mxu3 }
 0x40b   : > { %v878_v15 = vadd.f32 %v3995_v33, %v877_v13  ;;  %v1038_v16 = vadd.f32 %v4000_v34, %v1037_v14 }
 0x40d   : > { %v933_v17 = vpack.c.bf16 %v878_v15, %v878_v15  ;;  %v1093_v18 = vpack.c.bf16 %v1038_v16, %v1038_v16 }
 0x40e   : > { %v3310_v19 = vld [vmem:[#allocation3 + $0x38] sm:$0xff] }
 0x40f   : > { %966 = vst.msk [vmem:[#allocation3 + $0x40] sm:$0xf] %vm949_vm9, %v933_v17  ;;  %v3326_v20 = vld [vmem:[#allocation5 + $0x38] sm:$0xff]  ;;  %3204 = vmatmul.msk.bf16.gmra.mxu0 %vm506_vm1, %v3310_v19  ;;  %3220 = vmatmul.msk.bf16.gmra.mxu1 %vm506_vm1, %v3310_v19 }
 0x410   : > { %1125 = vst.msk [vmem:[#allocation5 + $0x40] sm:$0xf] %vm949_vm9, %v1093_v18  ;;  %2199 = vmatpush.bf16.msra.mxu2 %v3326_v20 }
 0x412   : > { %v879_v21 = vpop.f32.mrf.mxu2  ;;  %v1039_v22 = vpop.f32.mrf.mxu3 }
 0x413   : > { %v880_v23 = vadd.f32 %v3995_v33, %v879_v21  ;;  %v1040_v24 = vadd.f32 %v4000_v34, %v1039_v22 }
 0x414   : > { %2200 = vmatpush.bf16.msra.mxu2 %v3325_v25 }
 0x415   : > { %v934_v26 = vpack.c.bf16 %v880_v23, %v880_v23  ;;  %v1094_v28 = vpack.c.bf16 %v1040_v24, %v1040_v24 }
 0x416   : > { %v4115_v30 = vpop.f32.mrf.mxu0  ;;  %v4117_v32 = vpop.f32.mrf.mxu1 }
 0x417   : > { %967 = vst.msk [vmem:[#allocation3 + $0x44] sm:$0xf] %vm949_vm9, %v934_v26  ;;  %v1495_v36 = vmax.f32 %v4115_v30, %v4117_v32 }
 0x418   : > { %1126 = vst.msk [vmem:[#allocation5 + $0x44] sm:$0xf] %vm949_vm9, %v1094_v28  ;;  %2201 = vmatpush.bf16.msra.mxu2 %v3324_v35 }
 0x419   : > { %1496 = vmax.xlane.f32.xlu2 %v1495_v36 }
 0x41a   : > { %v882_v37 = vpop.f32.mrf.mxu2  ;;  %v1042_v38 = vpop.f32.mrf.mxu3 }
 0x41b   : > { %v883_v39 = vadd.f32 %v3995_v33, %v882_v37  ;;  %v1043_v27 = vadd.f32 %v4000_v34, %v1042_v38 }
 0x41c   : > { %2202 = vmatpush.bf16.msra.mxu2 %v3323_v40 }
 0x41d   : > { %v935_v41 = vpack.c.bf16 %v883_v39, %v883_v39  ;;  %v1095_v42 = vpack.c.bf16 %v1043_v27, %v1043_v27 }
 0x41e   : > { %v3311_v43 = vld [vmem:[#allocation3 + $0x40] sm:$0xff]  ;;  %v4125_v44 = vpop.f32.mrf.mxu0  ;;  %v4127_v45 = vpop.f32.mrf.mxu1 }
 0x41f   : > { %968 = vst.msk [vmem:[#allocation3 + $0x48] sm:$0xf] %vm949_vm9, %v935_v41  ;;  %3205 = vmatmul.msk.bf16.gmra.mxu0 %vm506_vm1, %v3311_v43  ;;  %3221 = vmatmul.msk.bf16.gmra.mxu1 %vm506_vm1, %v3311_v43  ;;  %v1498_v47 = vmax.f32 %v4125_v44, %v4127_v45 }
 0x420   : > { %1127 = vst.msk [vmem:[#allocation5 + $0x48] sm:$0xf] %vm949_vm9, %v1095_v42  ;;  %2203 = vmatpush.bf16.msra.mxu2 %v3322_v46 }
 0x421   : > { %1499 = vmax.xlane.f32.xlu0 %v1498_v47 }
 0x422   : > { %v884_v48 = vpop.f32.mrf.mxu2  ;;  %v1044_v49 = vpop.f32.mrf.mxu3 }
 0x423   : > { %v885_v50 = vadd.f32 %v3995_v33, %v884_v48  ;;  %v1045_v51 = vadd.f32 %v4000_v34, %v1044_v49 }
 0x424   : > { %2204 = vmatpush.bf16.msra.mxu2 %v3321_v29 }
 0x425   : > { %v936_v52 = vpack.c.bf16 %v885_v50, %v885_v50  ;;  %v1096_v53 = vpack.c.bf16 %v1045_v51, %v1045_v51 }
 0x426   : > { %v4137_v54 = vpop.f32.mrf.mxu0  ;;  %v4139_v55 = vpop.f32.mrf.mxu1 }
 0x427   : > { %969 = vst.msk [vmem:[#allocation3 + $0x4c] sm:$0xf] %vm949_vm9, %v936_v52  ;;  %v1501_v57 = vmax.f32 %v4137_v54, %v4139_v55 }
 0x428   : > { %1128 = vst.msk [vmem:[#allocation5 + $0x4c] sm:$0xf] %vm949_vm9, %v1096_v53  ;;  %2205 = vmatpush.bf16.msra.mxu2 %v3320_v56 }
 0x429   : > { %1502 = vmax.xlane.f32.xlu0 %v1501_v57 }
 0x42a   : > { %v887_v58 = vpop.f32.mrf.mxu2  ;;  %v1047_v59 = vpop.f32.mrf.mxu3 }
 0x42b   : > { %v888_v60 = vadd.f32 %v3995_v33, %v887_v58  ;;  %v1048_v61 = vadd.f32 %v4000_v34, %v1047_v59 }
 0x42c   : > { %2206 = vmatpush.bf16.msra.mxu2 %v3319_v62 }
 0x42d   : > { %v937_v63 = vpack.c.bf16 %v888_v60, %v888_v60  ;;  %v1097_v31 = vpack.c.bf16 %v1048_v61, %v1048_v61 }
 0x42e   : > { %v3312_v0 = vld [vmem:[#allocation3 + $0x48] sm:$0xff]  ;;  %v4147_v1 = vpop.f32.mrf.mxu0  ;;  %v4149_v2 = vpop.f32.mrf.mxu1 }
 0x42f   : > { %970 = vst.msk [vmem:[#allocation3 + $0x50] sm:$0xf] %vm949_vm9, %v937_v63  ;;  %3206 = vmatmul.msk.bf16.gmra.mxu0 %vm506_vm1, %v3312_v0  ;;  %3222 = vmatmul.msk.bf16.gmra.mxu1 %vm506_vm1, %v3312_v0  ;;  %v1504_v3 = vmax.f32 %v4147_v1, %v4149_v2 }
 0x430   : > { %1129 = vst.msk [vmem:[#allocation5 + $0x50] sm:$0xf] %vm949_vm9, %v1097_v31 }
 0x431   : > { %1505 = vmax.xlane.f32.xlu1 %v1504_v3 }
 0x432   : > { %v889_v4 = vpop.f32.mrf.mxu2  ;;  %v1049_v5 = vpop.f32.mrf.mxu3 }
 0x433   : > { %v890_v6 = vadd.f32 %v3995_v33, %v889_v4  ;;  %v1050_v7 = vadd.f32 %v4000_v34, %v1049_v5 }
 0x435   : > { %v938_v8 = vpack.c.bf16 %v890_v6, %v890_v6  ;;  %v1098_v9 = vpack.c.bf16 %v1050_v7, %v1050_v7 }
 0x436   : > { %v4159_v10 = vpop.f32.mrf.mxu0  ;;  %v4161_v11 = vpop.f32.mrf.mxu1 }
 0x437   : > { %971 = vst.msk [vmem:[#allocation3 + $0x54] sm:$0xf] %vm949_vm9, %v938_v8  ;;  %v1507_v12 = vmax.f32 %v4159_v10, %v4161_v11 }
 0x438   : > { %1130 = vst.msk [vmem:[#allocation5 + $0x54] sm:$0xf] %vm949_vm9, %v1098_v9 }
 0x439   : > { %1508 = vmax.xlane.f32.xlu0 %v1507_v12 }
 0x43a   : > { %v892_v13 = vpop.f32.mrf.mxu2  ;;  %v1052_v14 = vpop.f32.mrf.mxu3 }
 0x43b   : > { %v893_v15 = vadd.f32 %v3995_v33, %v892_v13  ;;  %v1053_v16 = vadd.f32 %v4000_v34, %v1052_v14 }
 0x43d   : > { %v939_v17 = vpack.c.bf16 %v893_v15, %v893_v15  ;;  %v1099_v18 = vpack.c.bf16 %v1053_v16, %v1053_v16 }
 0x43e   : > { %v3313_v19 = vld [vmem:[#allocation3 + $0x50] sm:$0xff]  ;;  %v4169_v20 = vpop.f32.mrf.mxu0  ;;  %v4171_v21 = vpop.f32.mrf.mxu1 }
 0x43f   : > { %972 = vst.msk [vmem:[#allocation3 + $0x58] sm:$0xf] %vm949_vm9, %v939_v17  ;;  %3207 = vmatmul.msk.bf16.gmra.mxu0 %vm506_vm1, %v3313_v19  ;;  %3223 = vmatmul.msk.bf16.gmra.mxu1 %vm506_vm1, %v3313_v19  ;;  %v1510_v22 = vmax.f32 %v4169_v20, %v4171_v21 }
 0x440   : > { %1131 = vst.msk [vmem:[#allocation5 + $0x58] sm:$0xf] %vm949_vm9, %v1099_v18 }
 0x441   : > { %1511 = vmax.xlane.f32.xlu0 %v1510_v22 }
 0x442   : > { %v894_v23 = vpop.f32.mrf.mxu2  ;;  %v1054_v24 = vpop.f32.mrf.mxu3 }
 0x443   : > { %v895_v25 = vadd.f32 %v3995_v33, %v894_v23  ;;  %v1055_v26 = vadd.f32 %v4000_v34, %v1054_v24 }
 0x445   : > { %v940_v28 = vpack.c.bf16 %v895_v25, %v895_v25  ;;  %v1100_v35 = vpack.c.bf16 %v1055_v26, %v1055_v26 }
 0x446   : > { %v4181_v36 = vpop.f32.mrf.mxu0  ;;  %v4183_v37 = vpop.f32.mrf.mxu1 }
 0x447   : > { %973 = vst.msk [vmem:[#allocation3 + $0x5c] sm:$0xf] %vm949_vm9, %v940_v28  ;;  %v1513_v38 = vmax.f32 %v4181_v36, %v4183_v37 }
 0x448   : > { %1132 = vst.msk [vmem:[#allocation5 + $0x5c] sm:$0xf] %vm949_vm9, %v1100_v35 }
 0x449   : > { %1514 = vmax.xlane.f32.xlu0 %v1513_v38 }
 0x44a   : > { %v897_v39 = vpop.f32.mrf.mxu2  ;;  %v1057_v27 = vpop.f32.mrf.mxu3 }
 0x44b   : > { %v898_v40 = vadd.f32 %v3995_v33, %v897_v39  ;;  %v1058_v41 = vadd.f32 %v4000_v34, %v1057_v27 }
 0x44d   : > { %v941_v42 = vpack.c.bf16 %v898_v40, %v898_v40  ;;  %v1101_v43 = vpack.c.bf16 %v1058_v41, %v1058_v41 }
 0x44e   : > { %v3314_v46 = vld [vmem:[#allocation3 + $0x58] sm:$0xff]  ;;  %v4191_v47 = vpop.f32.mrf.mxu0  ;;  %v4193_v48 = vpop.f32.mrf.mxu1 }
 0x44f   : > { %974 = vst.msk [vmem:[#allocation3 + $0x60] sm:$0xf] %vm949_vm9, %v941_v42  ;;  %3208 = vmatmul.msk.bf16.gmra.mxu0 %vm506_vm1, %v3314_v46  ;;  %3224 = vmatmul.msk.bf16.gmra.mxu1 %vm506_vm1, %v3314_v46  ;;  %v1516_v49 = vmax.f32 %v4191_v47, %v4193_v48 }
 0x450   : > { %1133 = vst.msk [vmem:[#allocation5 + $0x60] sm:$0xf] %vm949_vm9, %v1101_v43 }
 0x451   : > { %1517 = vmax.xlane.f32.xlu0 %v1516_v49 }
 0x452   : > { %v899_v50 = vpop.f32.mrf.mxu2  ;;  %v1059_v51 = vpop.f32.mrf.mxu3 }
 0x453   : > { %v900_v29 = vadd.f32 %v3995_v33, %v899_v50  ;;  %v1060_v52 = vadd.f32 %v4000_v34, %v1059_v51 }
 0x455   : > { %v942_v53 = vpack.c.bf16 %v900_v29, %v900_v29  ;;  %v1102_v56 = vpack.c.bf16 %v1060_v52, %v1060_v52 }
 0x456   : > { %v4203_v57 = vpop.f32.mrf.mxu0  ;;  %v4205_v58 = vpop.f32.mrf.mxu1 }
 0x457   : > { %975 = vst.msk [vmem:[#allocation3 + $0x64] sm:$0xf] %vm949_vm9, %v942_v53  ;;  %v1519_v59 = vmax.f32 %v4203_v57, %v4205_v58 }
 0x458   : > { %1134 = vst.msk [vmem:[#allocation5 + $0x64] sm:$0xf] %vm949_vm9, %v1102_v56 }
 0x459   : > { %1520 = vmax.xlane.f32.xlu0 %v1519_v59 }
 0x45a   : > { %v902_v60 = vpop.f32.mrf.mxu2  ;;  %v1062_v61 = vpop.f32.mrf.mxu3 }
 0x45b   : > { %v903_v62 = vadd.f32 %v3995_v33, %v902_v60  ;;  %v1063_v63 = vadd.f32 %v4000_v34, %v1062_v61 }
 0x45d   : > { %v943_v31 = vpack.c.bf16 %v903_v62, %v903_v62  ;;  %v1103_v0 = vpack.c.bf16 %v1063_v63, %v1063_v63 }
 0x45e   : > { %v3315_v3 = vld [vmem:[#allocation3 + $0x60] sm:$0xff]  ;;  %v4213_v4 = vpop.f32.mrf.mxu0  ;;  %v4215_v5 = vpop.f32.mrf.mxu1 }
 0x45f   : > { %976 = vst.msk [vmem:[#allocation3 + $0x68] sm:$0xf] %vm949_vm9, %v943_v31  ;;  %3209 = vmatmul.msk.bf16.gmra.mxu0 %vm506_vm1, %v3315_v3  ;;  %3225 = vmatmul.msk.bf16.gmra.mxu1 %vm506_vm1, %v3315_v3  ;;  %v1522_v6 = vmax.f32 %v4213_v4, %v4215_v5 }
 0x460   : > { %1135 = vst.msk [vmem:[#allocation5 + $0x68] sm:$0xf] %vm949_vm9, %v1103_v0 }
 0x461   : > { %1523 = vmax.xlane.f32.xlu1 %v1522_v6 }
 0x462   : > { %v904_v7 = vpop.f32.mrf.mxu2  ;;  %v1064_v8 = vpop.f32.mrf.mxu3 }
 0x463   : > { %v905_v9 = vadd.f32 %v3995_v33, %v904_v7  ;;  %v1065_v12 = vadd.f32 %v4000_v34, %v1064_v8 }
 0x465   : > { %v944_v13 = vpack.c.bf16 %v905_v9, %v905_v9  ;;  %v1104_v14 = vpack.c.bf16 %v1065_v12, %v1065_v12 }
 0x466   : > { %v4225_v15 = vpop.f32.mrf.mxu0  ;;  %v4227_v16 = vpop.f32.mrf.mxu1 }
 0x467   : > { %977 = vst.msk [vmem:[#allocation3 + $0x6c] sm:$0xf] %vm949_vm9, %v944_v13  ;;  %v1525_v17 = vmax.f32 %v4225_v15, %v4227_v16 }
 0x468   : > { %1136 = vst.msk [vmem:[#allocation5 + $0x6c] sm:$0xf] %vm949_vm9, %v1104_v14 }
 0x469   : > { %1526 = vmax.xlane.f32.xlu0 %v1525_v17 }
 0x46a   : > { %v907_v18 = vpop.f32.mrf.mxu2  ;;  %v1067_v19 = vpop.f32.mrf.mxu3 }
 0x46b   : > { %v908_v22 = vadd.f32 %v3995_v33, %v907_v18  ;;  %v1068_v23 = vadd.f32 %v4000_v34, %v1067_v19 }
 0x46d   : > { %v945_v24 = vpack.c.bf16 %v908_v22, %v908_v22  ;;  %v1105_v25 = vpack.c.bf16 %v1068_v23, %v1068_v23 }
 0x46e   : > { %v3316_v26 = vld [vmem:[#allocation3 + $0x68] sm:$0xff]  ;;  %v4235_v28 = vpop.f32.mrf.mxu0  ;;  %v4237_v35 = vpop.f32.mrf.mxu1 }
 0x46f   : > { %978 = vst.msk [vmem:[#allocation3 + $0x70] sm:$0xf] %vm949_vm9, %v945_v24  ;;  %3210 = vmatmul.msk.bf16.gmra.mxu0 %vm506_vm1, %v3316_v26  ;;  %3226 = vmatmul.msk.bf16.gmra.mxu1 %vm506_vm1, %v3316_v26  ;;  %v1528_v38 = vmax.f32 %v4235_v28, %v4237_v35 }
 0x470   : > { %1137 = vst.msk [vmem:[#allocation5 + $0x70] sm:$0xf] %vm949_vm9, %v1105_v25 }
 0x471   : > { %1529 = vmax.xlane.f32.xlu1 %v1528_v38  ;;  %v3332_v38 = vld [vmem:[#allocation5 + $0x68] sm:$0xff] }
 0x472   : > { %v909_v39 = vpop.f32.mrf.mxu2  ;;  %v1069_v27 = vpop.f32.mrf.mxu3 }
 0x473   : > { %v910_v40 = vadd.f32 %v3995_v33, %v909_v39  ;;  %v1070_v41 = vadd.f32 %v4000_v34, %v1069_v27 }
 0x475   : > { %v946_v42 = vpack.c.bf16 %v910_v40, %v910_v40  ;;  %v1106_v43 = vpack.c.bf16 %v1070_v41, %v1070_v41 }
 0x476   : > { %v4247_v46 = vpop.f32.mrf.mxu0  ;;  %v4249_v49 = vpop.f32.mrf.mxu1 }
 0x477   : > { %979 = vst.msk [vmem:[#allocation3 + $0x74] sm:$0xf] %vm949_vm9, %v946_v42  ;;  %v1531_v50 = vmax.f32 %v4247_v46, %v4249_v49 }
 0x478   : > { %1138 = vst.msk [vmem:[#allocation5 + $0x74] sm:$0xf] %vm949_vm9, %v1106_v43 }
 0x479   : > { %1532 = vmax.xlane.f32.xlu0 %v1531_v50  ;;  %v3331_v50 = vld [vmem:[#allocation5 + $0x60] sm:$0xff] }
 0x47a   : > { %v912_v51 = vpop.f32.mrf.mxu2  ;;  %v1072_v29 = vpop.f32.mrf.mxu3 }
 0x47b   : > { %v913_v52 = vadd.f32 %v3995_v33, %v912_v51  ;;  %v1073_v53 = vadd.f32 %v4000_v34, %v1072_v29 }
 0x47d   : > { %v947_v56 = vpack.c.bf16 %v913_v52, %v913_v52  ;;  %v1107_v59 = vpack.c.bf16 %v1073_v53, %v1073_v53  ;;  %v3330_v53 = vld [vmem:[#allocation5 + $0x58] sm:$0xff] }
 0x47e   : > { %v3317_v60 = vld [vmem:[#allocation3 + $0x70] sm:$0xff]  ;;  %v4257_v61 = vpop.f32.mrf.mxu0  ;;  %v4259_v62 = vpop.f32.mrf.mxu1 }
 0x47f   : > { %980 = vst.msk [vmem:[#allocation3 + $0x78] sm:$0xf] %vm949_vm9, %v947_v56  ;;  %3211 = vmatmul.msk.bf16.gmra.mxu0 %vm506_vm1, %v3317_v60  ;;  %3227 = vmatmul.msk.bf16.gmra.mxu1 %vm506_vm1, %v3317_v60  ;;  %v1534_v63 = vmax.f32 %v4257_v61, %v4259_v62  ;;  %v3329_v60 = vld [vmem:[#allocation5 + $0x50] sm:$0xff] }
 0x480   : > { %1139 = vst.msk [vmem:[#allocation5 + $0x78] sm:$0xf] %vm949_vm9, %v1107_v59 }
 0x481   : > { %1535 = vmax.xlane.f32.xlu1 %v1534_v63 }
 0x482   : > { %v914_v31 = vpop.f32.mrf.mxu2  ;;  %v1074_v0 = vpop.f32.mrf.mxu3 }
 0x483   : > { %v915_v3 = vadd.f32 %v3995_v33, %v914_v31  ;;  %v1075_v6 = vadd.f32 %v4000_v34, %v1074_v0  ;;  %v3333_v34 = vld [vmem:[#allocation5 + $0x70] sm:$0xff] }
 0x485   : > { %v948_v7 = vpack.c.bf16 %v915_v3, %v915_v3  ;;  %v1108_v8 = vpack.c.bf16 %v1075_v6, %v1075_v6 }
 0x487   : > { %981 = vst.msk [vmem:[#allocation3 + $0x7c] sm:$0xf] %vm949_vm9, %v948_v7 }
 0x488   : > { %1140 = vst.msk [vmem:[#allocation5 + $0x7c] sm:$0xf] %vm949_vm9, %v1108_v8 }
 0x48c   : > { %v4270_v9 = vpop.f32.mrf.mxu1  ;;  %v4272_v12 = vpop.f32.mrf.mxu0 }
 0x48d   : > { %v1537_v17 = vmax.f32 %v4272_v12, %v4270_v9  ;;  %v1497_v33 = vpop.xlane.xlu2 %1496 }
 0x48e   : > { %v3318_v13 = vld [vmem:[#allocation3 + $0x78] sm:$0xff]  ;;  %v1591_v22 = vsub.f32 %v4115_v30, %v1497_v33  ;;  %v1592_v23 = vsub.f32 %v4117_v32, %v1497_v33 }
 0x48f   : > { %v3334_v14 = vld [vmem:[#allocation5 + $0x78] sm:$0xff]  ;;  %3212 = vmatmul.msk.bf16.gmra.mxu0 %vm506_vm1, %v3318_v13  ;;  %3228 = vmatmul.msk.bf16.gmra.mxu1 %vm506_vm1, %v3318_v13 }
 0x490   : > { %2288 = vmatpush.bf16.msra.mxu3 %v3334_v14  ;;  %1538 = vmax.xlane.f32.xlu0 %v1537_v17 }
 0x494   : > { %2289 = vmatpush.bf16.msra.mxu3 %v3333_v34  ;;  %v4278_v18 = vpop.f32.mrf.mxu1  ;;  %v1500_v19 = vpop.xlane.xlu0 %1499 }
 0x495   : > { %v1593_v24 = vsub.f32 %v4125_v44, %v1500_v19  ;;  %v1594_v25 = vsub.f32 %v4127_v45, %v1500_v19  ;;  %v4284_v26 = vpop.f32.mrf.mxu0  ;;  %v3328_v19 = vld [vmem:[#allocation5 + $0x48] sm:$0xff] }
 0x496   : > { %v1540_v39 = vmax.f32 %v4284_v26, %v4278_v18 }
 0x497   : > { %v1655_v27 = vpack.c.bf16 %v1593_v24, %v1591_v22  ;;  %v1656_v40 = vpack.c.bf16 %v1594_v25, %v1592_v23 }
 0x498   : > { %2290 = vmatpush.bf16.msra.mxu3 %v3332_v38  ;;  %1541 = vmax.xlane.f32.xlu1 %v1540_v39 }
 0x499   : > { %v1687_v41 = vunpack.c.l.bf16 %v1655_v27  ;;  %v1688_v42 = vunpack.c.l.bf16 %v1656_v40  ;;  %v1689_v43 = vunpack.c.h.bf16 %v1655_v27  ;;  %v1690_v30 = vunpack.c.h.bf16 %v1656_v40 }
 0x49b   : > { %v1751_v32 = vmul.f32 1.442695, %v1687_v41  ;;  %v1753_v51 = vmul.f32 1.442695, %v1688_v42  ;;  %v1755_v44 = vmul.f32 1.442695, %v1689_v43 }
 0x49c   : > { %v1757_v29 = vmul.f32 1.442695, %v1690_v30  ;;  %2291 = vmatpush.bf16.msra.mxu3 %v3331_v50  ;;  %v4288_v45 = vpop.f32.mrf.mxu1  ;;  %v1503_v59 = vpop.xlane.xlu0 %1502 }
 0x49d   : > { %3414 = vpow2.f32 %v1751_v32  ;;  %v4290_v52 = vpop.f32.mrf.mxu0  ;;  %v1595_v7 = vsub.f32 %v4137_v54, %v1503_v59  ;;  %v1596_v8 = vsub.f32 %v4139_v55, %v1503_v59 }
 0x49e   : > { %3416 = vpow2.f32 %v1753_v51  ;;  %v1543_v56 = vmax.f32 %v4290_v52, %v4288_v45 }
 0x49f   : > { %3418 = vpow2.f32 %v1755_v44 }
 0x4a0   : > { %3420 = vpow2.f32 %v1757_v29  ;;  %2292 = vmatpush.bf16.msra.mxu3 %v3330_v53  ;;  %1544 = vmax.xlane.f32.xlu0 %v1543_v56 }
 0x4a3   : > { %v3415_v63 = vpop.eup %3414 }
 0x4a4   : > { %v3417_v31 = vpop.eup %3416  ;;  %2293 = vmatpush.bf16.msra.mxu3 %v3329_v60  ;;  %v4294_v0 = vpop.f32.mrf.mxu1 }
 0x4a5   : > { %v1506_v3 = vpop.xlane.xlu1 %1505  ;;  %v3419_v6 = vpop.eup %3418 }
 0x4a6   : > { %v1597_v13 = vsub.f32 %v4147_v1, %v1506_v3  ;;  %v1598_v14 = vsub.f32 %v4149_v2, %v1506_v3  ;;  %v4300_v17 = vpop.f32.mrf.mxu0  ;;  %v3421_v33 = vpop.eup %3420  ;;  %v1879_v34 = vpack.c.bf16 %v3419_v6, %v3415_v63  ;;  %v3327_v2 = vld [vmem:[#allocation5 + $0x40] sm:$0xff] }
 0x4a7   : > { %v1546_v22 = vmax.f32 %v4300_v17, %v4294_v0  ;;  %v1880_v25 = vpack.c.bf16 %v3421_v33, %v3417_v31 }
 0x4a8   : > { %v1657_v23 = vpack.c.bf16 %v1597_v13, %v1595_v7  ;;  %v1658_v24 = vpack.c.bf16 %v1598_v14, %v1596_v8  ;;  %2207 = vmatmul.bf16.vlgmr.msra.gmra.mxu2 %v1879_v34  ;;  %2294 = vmatpush.bf16.msra.mxu3 %v3328_v19  ;;  %v1913_v54 = vunpack.c.h.bf16 %v1879_v34  ;;  %v1911_v38 = vunpack.c.l.bf16 %v1879_v34 }
 0x4a9   : > { %1547 = vmax.xlane.f32.xlu1 %v1546_v22  ;;  %v1914_v40 = vunpack.c.h.bf16 %v1880_v25  ;;  %v1912_v41 = vunpack.c.l.bf16 %v1880_v25 }
 0x4aa   : > { %v1691_v55 = vunpack.c.l.bf16 %v1657_v23  ;;  %v1692_v39 = vunpack.c.l.bf16 %v1658_v24  ;;  %v1693_v1 = vunpack.c.h.bf16 %v1657_v23  ;;  %v1694_v27 = vunpack.c.h.bf16 %v1658_v24 }
 0x4ab   : > { %v4306_v44 = vadd.f32 %v1914_v40, %v1913_v54  ;;  %v4308_v29 = vadd.f32 %v1912_v41, %v1911_v38 }
 0x4ac   : > { %v1759_v42 = vmul.f32 1.442695, %v1691_v55  ;;  %v1761_v43 = vmul.f32 1.442695, %v1692_v39  ;;  %v1763_v30 = vmul.f32 1.442695, %v1693_v1  ;;  %2295 = vmatpush.bf16.msra.mxu3 %v3327_v2  ;;  %v4304_v32 = vpop.f32.mrf.mxu1  ;;  %v1509_v51 = vpop.xlane.xlu0 %1508 }
 0x4ad   : > { %v1765_v50 = vmul.f32 1.442695, %v1694_v27  ;;  %5471 = vst [vmem:[#allocation24_spill] sm:$0xff] %v4308_v29  ;;  %v1599_v6 = vsub.f32 %v4159_v10, %v1509_v51  ;;  %v1600_v7 = vsub.f32 %v4161_v11, %v1509_v51 }
 0x4ae   : > { %3422 = vpow2.f32 %v1759_v42  ;;  %v4310_v53 = vpop.f32.mrf.mxu0 }
 0x4af   : > { %3424 = vpow2.f32 %v1761_v43  ;;  %v1549_v56 = vmax.f32 %v4310_v53, %v4304_v32  ;;  %2296 = vmatmul.bf16.vlgmr.msra.gmra.mxu3 %v1880_v25 }
 0x4b0   : > { %3426 = vpow2.f32 %v1763_v30 }
 0x4b1   : > { %3428 = vpow2.f32 %v1765_v50  ;;  %1550 = vmax.xlane.f32.xlu0 %v1549_v56 }
 0x4b4   : > { %v3423_v59 = vpop.eup %3422  ;;  %v4314_v63 = vpop.f32.mrf.mxu1 }
 0x4b5   : > { %v3425_v60 = vpop.eup %3424  ;;  %v1512_v31 = vpop.xlane.xlu0 %1511 }
 0x4b6   : > { %v3427_v3 = vpop.eup %3426  ;;  %v1601_v8 = vsub.f32 %v4169_v20, %v1512_v31  ;;  %v1602_v13 = vsub.f32 %v4171_v21, %v1512_v31  ;;  %v4320_v14 = vpop.f32.mrf.mxu0 }
 0x4b7   : > { %v3429_v33 = vpop.eup %3428  ;;  %v1881_v34 = vpack.c.bf16 %v3427_v3, %v3423_v59  ;;  %v1552_v19 = vmax.f32 %v4320_v14, %v4314_v63 }
 0x4b8   : > { %v1659_v22 = vpack.c.bf16 %v1601_v8, %v1599_v6  ;;  %v1660_v23 = vpack.c.bf16 %v1602_v13, %v1600_v7  ;;  %v1882_v24 = vpack.c.bf16 %v3429_v33, %v3425_v60 }
 0x4b9   : > { %2212 = vmatmul.bf16.gmra.mxu2 %v1881_v34  ;;  %1553 = vmax.xlane.f32.xlu1 %v1552_v19  ;;  %v1915_v25 = vunpack.c.l.bf16 %v1881_v34  ;;  %v1917_v10 = vunpack.c.h.bf16 %v1881_v34 }
 0x4ba   : > { %v1695_v54 = vunpack.c.l.bf16 %v1659_v22  ;;  %v1696_v11 = vunpack.c.l.bf16 %v1660_v23  ;;  %v1697_v38 = vunpack.c.h.bf16 %v1659_v22  ;;  %v1698_v20 = vunpack.c.h.bf16 %v1660_v23 }
 0x4bb   : > { %v1916_v55 = vunpack.c.l.bf16 %v1882_v24  ;;  %v1918_v21 = vunpack.c.h.bf16 %v1882_v24 }
 0x4bc   : > { %v1767_v39 = vmul.f32 1.442695, %v1695_v54  ;;  %v1769_v1 = vmul.f32 1.442695, %v1696_v11  ;;  %v1771_v27 = vmul.f32 1.442695, %v1697_v38  ;;  %v4324_v40 = vpop.f32.mrf.mxu1 }
 0x4bd   : > { %v1773_v2 = vmul.f32 1.442695, %v1698_v20  ;;  %v1515_v41 = vpop.xlane.xlu0 %1514  ;;  %v4326_v42 = vadd.f32 %v1916_v55, %v1915_v25  ;;  %v4328_v43 = vadd.f32 %v1918_v21, %v1917_v10 }
 0x4be   : > { %3430 = vpow2.f32 %v1767_v39  ;;  %v4330_v30 = vpop.f32.mrf.mxu0  ;;  %v1603_v3 = vsub.f32 %v4181_v36, %v1515_v41  ;;  %v1604_v6 = vsub.f32 %v4183_v37, %v1515_v41 }
 0x4bf   : > { %5472 = vst [vmem:[#allocation25_spill] sm:$0xff] %v4326_v42  ;;  %3432 = vpow2.f32 %v1769_v1  ;;  %v1555_v50 = vmax.f32 %v4330_v30, %v4324_v40  ;;  %2301 = vmatmul.bf16.gmra.mxu3 %v1882_v24 }
 0x4c0   : > { %5473 = vst [vmem:[#allocation26_spill] sm:$0xff] %v4328_v43  ;;  %3434 = vpow2.f32 %v1771_v27 }
 0x4c1   : > { %3436 = vpow2.f32 %v1773_v2  ;;  %1556 = vmax.xlane.f32.xlu0 %v1555_v50 }
 0x4c4   : > { %v3431_v51 = vpop.eup %3430  ;;  %v4334_v59 = vpop.f32.mrf.mxu1 }
 0x4c5   : > { %v3433_v56 = vpop.eup %3432  ;;  %v1518_v60 = vpop.xlane.xlu0 %1517 }
 0x4c6   : > { %v3435_v31 = vpop.eup %3434  ;;  %v1605_v7 = vsub.f32 %v4191_v47, %v1518_v60  ;;  %v1606_v8 = vsub.f32 %v4193_v48, %v1518_v60  ;;  %v4340_v13 = vpop.f32.mrf.mxu0 }
 0x4c7   : > { %v3437_v33 = vpop.eup %3436  ;;  %v1883_v34 = vpack.c.bf16 %v3435_v31, %v3431_v51  ;;  %v1558_v19 = vmax.f32 %v4340_v13, %v4334_v59 }
 0x4c8   : > { %v1661_v22 = vpack.c.bf16 %v1605_v7, %v1603_v3  ;;  %v1662_v23 = vpack.c.bf16 %v1606_v8, %v1604_v6  ;;  %v1884_v24 = vpack.c.bf16 %v3437_v33, %v3433_v56 }
 0x4c9   : > { %2217 = vmatmul.bf16.gmra.mxu2 %v1883_v34  ;;  %1559 = vmax.xlane.f32.xlu1 %v1558_v19  ;;  %v1919_v25 = vunpack.c.l.bf16 %v1883_v34  ;;  %v1921_v36 = vunpack.c.h.bf16 %v1883_v34 }
 0x4ca   : > { %v1699_v10 = vunpack.c.l.bf16 %v1661_v22  ;;  %v1700_v37 = vunpack.c.l.bf16 %v1662_v23  ;;  %v1701_v54 = vunpack.c.h.bf16 %v1661_v22  ;;  %v1702_v47 = vunpack.c.h.bf16 %v1662_v23 }
 0x4cb   : > { %v1920_v11 = vunpack.c.l.bf16 %v1884_v24  ;;  %v1922_v48 = vunpack.c.h.bf16 %v1884_v24 }
 0x4cc   : > { %v1775_v38 = vmul.f32 1.442695, %v1699_v10  ;;  %v1777_v20 = vmul.f32 1.442695, %v1700_v37  ;;  %v1779_v55 = vmul.f32 1.442695, %v1701_v54  ;;  %v4344_v39 = vpop.f32.mrf.mxu1 }
 0x4cd   : > { %v1781_v21 = vmul.f32 1.442695, %v1702_v47  ;;  %v4346_v1 = vadd.f32 %v1920_v11, %v1919_v25  ;;  %v4348_v27 = vadd.f32 %v1922_v48, %v1921_v36  ;;  %v1521_v50 = vpop.xlane.xlu0 %1520 }
 0x4ce   : > { %3438 = vpow2.f32 %v1775_v38  ;;  %v4350_v2 = vpop.f32.mrf.mxu0  ;;  %v1607_v6 = vsub.f32 %v4203_v57, %v1521_v50  ;;  %v1608_v7 = vsub.f32 %v4205_v58, %v1521_v50 }
 0x4cf   : > { %3440 = vpow2.f32 %v1777_v20  ;;  %v1561_v41 = vmax.f32 %v4350_v2, %v4344_v39  ;;  %2306 = vmatmul.bf16.gmra.mxu3 %v1884_v24 }
 0x4d0   : > { %3442 = vpow2.f32 %v1779_v55 }
 0x4d1   : > { %3444 = vpow2.f32 %v1781_v21  ;;  %1562 = vmax.xlane.f32.xlu0 %v1561_v41 }
 0x4d4   : > { %v3439_v51 = vpop.eup %3438  ;;  %v4354_v60 = vpop.f32.mrf.mxu1 }
 0x4d5   : > { %v3441_v56 = vpop.eup %3440  ;;  %v1524_v31 = vpop.xlane.xlu1 %1523 }
 0x4d6   : > { %v3443_v3 = vpop.eup %3442  ;;  %v1609_v8 = vsub.f32 %v4213_v4, %v1524_v31  ;;  %v1610_v33 = vsub.f32 %v4215_v5, %v1524_v31  ;;  %v4360_v34 = vpop.f32.mrf.mxu0 }
 0x4d7   : > { %v3445_v19 = vpop.eup %3444  ;;  %v1885_v22 = vpack.c.bf16 %v3443_v3, %v3439_v51  ;;  %v1564_v23 = vmax.f32 %v4360_v34, %v4354_v60 }
 0x4d8   : > { %v1663_v24 = vpack.c.bf16 %v1609_v8, %v1607_v6  ;;  %v1664_v25 = vpack.c.bf16 %v1610_v33, %v1608_v7  ;;  %v1886_v36 = vpack.c.bf16 %v3445_v19, %v3441_v56 }
 0x4d9   : > { %2222 = vmatmul.bf16.gmra.mxu2 %v1885_v22  ;;  %1565 = vmax.xlane.f32.xlu1 %v1564_v23  ;;  %v1925_v10 = vunpack.c.h.bf16 %v1885_v22  ;;  %v1923_v57 = vunpack.c.l.bf16 %v1885_v22 }
 0x4da   : > { %v1703_v37 = vunpack.c.l.bf16 %v1663_v24  ;;  %v1704_v58 = vunpack.c.l.bf16 %v1664_v25  ;;  %v1705_v54 = vunpack.c.h.bf16 %v1663_v24  ;;  %v1706_v4 = vunpack.c.h.bf16 %v1664_v25 }
 0x4db   : > { %v1926_v47 = vunpack.c.h.bf16 %v1886_v36  ;;  %v1924_v5 = vunpack.c.l.bf16 %v1886_v36 }
 0x4dc   : > { %v1783_v11 = vmul.f32 1.442695, %v1703_v37  ;;  %v1785_v48 = vmul.f32 1.442695, %v1704_v58  ;;  %v1787_v38 = vmul.f32 1.442695, %v1705_v54  ;;  %v4364_v55 = vpop.f32.mrf.mxu1  ;;  %v1527_v56 = vpop.xlane.xlu0 %1526 }
 0x4dd   : > { %v1789_v20 = vmul.f32 1.442695, %v1706_v4  ;;  %v4366_v21 = vadd.f32 %v1926_v47, %v1925_v10  ;;  %v4368_v41 = vadd.f32 %v1924_v5, %v1923_v57  ;;  %v1611_v33 = vsub.f32 %v4225_v15, %v1527_v56 }
 0x4de   : > { %3446 = vpow2.f32 %v1783_v11  ;;  %v4370_v50 = vpop.f32.mrf.mxu0  ;;  %v1612_v19 = vsub.f32 %v4227_v16, %v1527_v56 }
 0x4df   : > { %3448 = vpow2.f32 %v1785_v48  ;;  %v1567_v51 = vmax.f32 %v4370_v50, %v4364_v55  ;;  %2311 = vmatmul.bf16.gmra.mxu3 %v1886_v36 }
 0x4e0   : > { %3450 = vpow2.f32 %v1787_v38 }
 0x4e1   : > { %3452 = vpow2.f32 %v1789_v20  ;;  %1568 = vmax.xlane.f32.xlu0 %v1567_v51 }
 0x4e4   : > { %v3447_v31 = vpop.eup %3446  ;;  %v4374_v6 = vpop.f32.mrf.mxu1 }
 0x4e5   : > { %v3449_v3 = vpop.eup %3448  ;;  %v1530_v7 = vpop.xlane.xlu1 %1529 }
 0x4e6   : > { %v3451_v8 = vpop.eup %3450  ;;  %v1613_v22 = vsub.f32 %v4235_v28, %v1530_v7  ;;  %v1614_v23 = vsub.f32 %v4237_v35, %v1530_v7  ;;  %v4380_v24 = vpop.f32.mrf.mxu0 }
 0x4e7   : > { %v3453_v25 = vpop.eup %3452  ;;  %v1887_v36 = vpack.c.bf16 %v3451_v8, %v3447_v31  ;;  %v1570_v10 = vmax.f32 %v4380_v24, %v4374_v6 }
 0x4e8   : > { %v1665_v57 = vpack.c.bf16 %v1613_v22, %v1611_v33  ;;  %v1666_v37 = vpack.c.bf16 %v1614_v23, %v1612_v19  ;;  %v1888_v58 = vpack.c.bf16 %v3453_v25, %v3449_v3 }
 0x4e9   : > { %2227 = vmatmul.bf16.gmra.mxu2 %v1887_v36  ;;  %1571 = vmax.xlane.f32.xlu1 %v1570_v10  ;;  %v1927_v54 = vunpack.c.l.bf16 %v1887_v36  ;;  %v1929_v15 = vunpack.c.h.bf16 %v1887_v36 }
 0x4ea   : > { %v1707_v4 = vunpack.c.l.bf16 %v1665_v57  ;;  %v1708_v16 = vunpack.c.l.bf16 %v1666_v37  ;;  %v1709_v47 = vunpack.c.h.bf16 %v1665_v57  ;;  %v1710_v28 = vunpack.c.h.bf16 %v1666_v37 }
 0x4eb   : > { %v1928_v5 = vunpack.c.l.bf16 %v1888_v58  ;;  %v1930_v35 = vunpack.c.h.bf16 %v1888_v58 }
 0x4ec   : > { %v1791_v11 = vmul.f32 1.442695, %v1707_v4  ;;  %v1793_v48 = vmul.f32 1.442695, %v1708_v16  ;;  %v1795_v38 = vmul.f32 1.442695, %v1709_v47  ;;  %v4384_v51 = vpop.f32.mrf.mxu1  ;;  %v1533_v8 = vpop.xlane.xlu0 %1532 }
 0x4ed   : > { %v1797_v20 = vmul.f32 1.442695, %v1710_v28  ;;  %v4386_v56 = vadd.f32 %v1928_v5, %v1927_v54  ;;  %v4388_v31 = vadd.f32 %v1930_v35, %v1929_v15  ;;  %v1615_v36 = vsub.f32 %v4247_v46, %v1533_v8 }
 0x4ee   : > { %3454 = vpow2.f32 %v1791_v11  ;;  %v4390_v3 = vpop.f32.mrf.mxu0  ;;  %v1616_v10 = vsub.f32 %v4249_v49, %v1533_v8 }
 0x4ef   : > { %3456 = vpow2.f32 %v1793_v48  ;;  %v1573_v7 = vmax.f32 %v4390_v3, %v4384_v51  ;;  %2316 = vmatmul.bf16.gmra.mxu3 %v1888_v58 }
 0x4f0   : > { %3458 = vpow2.f32 %v1795_v38 }
 0x4f1   : > { %3460 = vpow2.f32 %v1797_v20  ;;  %1574 = vmax.xlane.f32.xlu0 %v1573_v7 }
 0x4f4   : > { %v3455_v33 = vpop.eup %3454  ;;  %v4394_v22 = vpop.f32.mrf.mxu1 }
 0x4f5   : > { %v3457_v19 = vpop.eup %3456  ;;  %v1536_v23 = vpop.xlane.xlu1 %1535 }
 0x4f6   : > { %v3459_v25 = vpop.eup %3458  ;;  %v1617_v57 = vsub.f32 %v4257_v61, %v1536_v23  ;;  %v1618_v37 = vsub.f32 %v4259_v62, %v1536_v23  ;;  %v4400_v54 = vpop.f32.mrf.mxu0 }
 0x4f7   : > { %v3461_v58 = vpop.eup %3460  ;;  %v1889_v15 = vpack.c.bf16 %v3459_v25, %v3455_v33  ;;  %v1576_v4 = vmax.f32 %v4400_v54, %v4394_v22 }
 0x4f8   : > { %v1667_v16 = vpack.c.bf16 %v1617_v57, %v1615_v36  ;;  %v1668_v47 = vpack.c.bf16 %v1618_v37, %v1616_v10  ;;  %v1890_v28 = vpack.c.bf16 %v3461_v58, %v3457_v19 }
 0x4f9   : > { %2232 = vmatmul.bf16.gmra.mxu2 %v1889_v15  ;;  %1577 = vmax.xlane.f32.xlu1 %v1576_v4  ;;  %v1931_v5 = vunpack.c.l.bf16 %v1889_v15  ;;  %v1933_v46 = vunpack.c.h.bf16 %v1889_v15 }
 0x4fa   : > { %v1711_v35 = vunpack.c.l.bf16 %v1667_v16  ;;  %v1713_v49 = vunpack.c.h.bf16 %v1667_v16  ;;  %v1932_v11 = vunpack.c.l.bf16 %v1890_v28  ;;  %v1934_v61 = vunpack.c.h.bf16 %v1890_v28 }
 0x4fb   : > { %v1712_v48 = vunpack.c.l.bf16 %v1668_v47  ;;  %v1714_v20 = vunpack.c.h.bf16 %v1668_v47 }
 0x4fc   : > { %v1799_v62 = vmul.f32 1.442695, %v1711_v35  ;;  %v1803_v38 = vmul.f32 1.442695, %v1713_v49  ;;  %v2005_v7 = vadd.f32 %v1932_v11, %v1931_v5  ;;  %v4404_v8 = vpop.f32.mrf.mxu1  ;;  %v4406_v33 = vadd.f32 %v1934_v61, %v1933_v46 }
 0x4fd   : > { %v1801_v25 = vmul.f32 1.442695, %v1712_v48  ;;  %v1805_v36 = vmul.f32 1.442695, %v1714_v20 }
 0x4fe   : > { %3462 = vpow2.f32 %v1799_v62  ;;  %v4408_v23 = vpop.f32.mrf.mxu0  ;;  %2006 = vadd.xlane.f32.xlu2 %v2005_v7 }
 0x4ff   : > { %v1579_v19 = vmax.f32 %v4408_v23, %v4404_v8  ;;  %3464 = vpow2.f32 %v1803_v38  ;;  %2321 = vmatmul.bf16.gmra.mxu3 %v1890_v28 }
 0x500   : > { %3466 = vpow2.f32 %v1801_v25 }
 0x501   : > { %1580 = vmax.xlane.f32.xlu0 %v1579_v19  ;;  %3468 = vpow2.f32 %v1805_v36 }
 0x503   : > { %v1539_v47 = vpop.xlane.xlu0 %1538 }
 0x504   : > { %v3463_v10 = vpop.eup %3462  ;;  %v4412_v57 = vpop.f32.mrf.mxu1  ;;  %v1619_v46 = vsub.f32 %v4272_v12, %v1539_v47  ;;  %v1620_v35 = vsub.f32 %v4270_v9, %v1539_v47 }
 0x505   : > { %v3465_v37 = vpop.eup %3464 }
 0x506   : > { %v4414_v58 = vpop.f32.mrf.mxu0  ;;  %v1891_v15 = vpack.c.bf16 %v3465_v37, %v3463_v10  ;;  %v3467_v16 = vpop.eup %3466 }
 0x507   : > { %v1582_v4 = vmax.f32 %v4414_v58, %v4412_v57  ;;  %v3469_v5 = vpop.eup %3468 }
 0x508   : > { %v1892_v62 = vpack.c.bf16 %v3469_v5, %v3467_v16  ;;  %v1935_v9 = vunpack.c.l.bf16 %v1891_v15 }
 0x509   : > { %2237 = vmatmul.bf16.gmra.mxu2 %v1891_v15  ;;  %1583 = vmax.xlane.f32.xlu1 %v1582_v4 }
 0x50a   : > { %v1936_v37 = vunpack.c.l.bf16 %v1892_v62 }
 0x50b   : > { %v1542_v28 = vpop.xlane.xlu1 %1541 }
 0x50c   : > { %v1621_v49 = vsub.f32 %v4284_v26, %v1542_v28  ;;  %v1622_v11 = vsub.f32 %v4278_v18, %v1542_v28  ;;  %v4422_v61 = vpop.f32.mrf.mxu1  ;;  %v2011_v5 = vadd.f32 %v1936_v37, %v1935_v9 }
 0x50e   : > { %v4424_v48 = vpop.f32.mrf.mxu0  ;;  %v1669_v38 = vpack.c.bf16 %v1621_v49, %v1619_v46  ;;  %v1670_v20 = vpack.c.bf16 %v1622_v11, %v1620_v35  ;;  %v1937_v49 = vunpack.c.h.bf16 %v1891_v15  ;;  %v1938_v11 = vunpack.c.h.bf16 %v1892_v62 }
 0x50f   : > { %v1585_v7 = vmax.f32 %v4424_v48, %v4422_v61  ;;  %2326 = vmatmul.bf16.gmra.mxu3 %v1892_v62 }
 0x510   : > { %v1715_v19 = vunpack.c.l.bf16 %v1669_v38  ;;  %v1716_v25 = vunpack.c.l.bf16 %v1670_v20  ;;  %v1717_v12 = vunpack.c.h.bf16 %v1669_v38  ;;  %v1718_v36 = vunpack.c.h.bf16 %v1670_v20 }
 0x511   : > { %1586 = vmax.xlane.f32.xlu0 %v1585_v7 }
 0x512   : > { %v1807_v26 = vmul.f32 1.442695, %v1715_v19  ;;  %v1809_v10 = vmul.f32 1.442695, %v1716_v25  ;;  %v1811_v18 = vmul.f32 1.442695, %v1717_v12 }
 0x513   : > { %v1813_v4 = vmul.f32 1.442695, %v1718_v36  ;;  %v1545_v46 = vpop.xlane.xlu0 %1544 }
 0x514   : > { %3470 = vpow2.f32 %v1807_v26  ;;  %v4428_v47 = vpop.f32.mrf.mxu1  ;;  %v1623_v7 = vsub.f32 %v4290_v52, %v1545_v46  ;;  %v1624_v12 = vsub.f32 %v4288_v45, %v1545_v46 }
 0x515   : > { %3472 = vpow2.f32 %v1809_v10 }
 0x516   : > { %v4430_v16 = vpop.f32.mrf.mxu0  ;;  %3474 = vpow2.f32 %v1811_v18  ;;  %v2014_v18 = vadd.f32 %v1938_v11, %v1937_v49 }
 0x517   : > { %v1588_v28 = vmax.f32 %v4430_v16, %v4428_v47  ;;  %3476 = vpow2.f32 %v1813_v4 }
 0x519   : > { %2012 = vadd.xlane.f32.xlu0 %v2011_v5  ;;  %1589 = vmax.xlane.f32.xlu1 %v1588_v28 }
 0x51a   : > { %v3471_v35 = vpop.eup %3470 }
 0x51b   : > { %v3473_v38 = vpop.eup %3472 }
 0x51c   : > { %v3475_v20 = vpop.eup %3474  ;;  %v1548_v19 = vpop.xlane.xlu1 %1547 }
 0x51d   : > { %v3477_v25 = vpop.eup %3476  ;;  %v1625_v36 = vsub.f32 %v4300_v17, %v1548_v19  ;;  %v1626_v9 = vsub.f32 %v4294_v0, %v1548_v19  ;;  %v1893_v26 = vpack.c.bf16 %v3475_v20, %v3471_v35 }
 0x51e   : > { %v1894_v10 = vpack.c.bf16 %v3477_v25, %v3473_v38 }
 0x51f   : > { %v1671_v37 = vpack.c.bf16 %v1625_v36, %v1623_v7  ;;  %v1672_v4 = vpack.c.bf16 %v1626_v9, %v1624_v12  ;;  %2242 = vmatmul.bf16.gmra.mxu2 %v1893_v26  ;;  %v1939_v15 = vunpack.c.l.bf16 %v1893_v26  ;;  %v1941_v45 = vunpack.c.h.bf16 %v1893_v26 }
 0x520   : > { %2331 = vmatmul.bf16.gmra.mxu3 %v1894_v10  ;;  %v1940_v62 = vunpack.c.l.bf16 %v1894_v10  ;;  %v1942_v46 = vunpack.c.h.bf16 %v1894_v10 }
 0x521   : > { %2015 = vadd.xlane.f32.xlu1 %v2014_v18  ;;  %v1719_v5 = vunpack.c.l.bf16 %v1671_v37  ;;  %v1720_v52 = vunpack.c.l.bf16 %v1672_v4  ;;  %v1721_v28 = vunpack.c.h.bf16 %v1671_v37  ;;  %v1722_v29 = vunpack.c.h.bf16 %v1672_v4 }
 0x522   : > { %v2017_v43 = vadd.f32 %v1940_v62, %v1939_v15  ;;  %v2020_v49 = vadd.f32 %v1942_v46, %v1941_v45 }
 0x523   : > { %v1815_v17 = vmul.f32 1.442695, %v1719_v5  ;;  %v1817_v42 = vmul.f32 1.442695, %v1720_v52  ;;  %v1819_v0 = vmul.f32 1.442695, %v1721_v28 }
 0x524   : > { %v1821_v35 = vmul.f32 1.442695, %v1722_v29  ;;  %2018 = vadd.xlane.f32.xlu0 %v2017_v43  ;;  %v1551_v11 = vpop.xlane.xlu0 %1550 }
 0x525   : > { %3478 = vpow2.f32 %v1815_v17  ;;  %v1627_v25 = vsub.f32 %v4310_v53, %v1551_v11  ;;  %v1628_v12 = vsub.f32 %v4304_v32, %v1551_v11 }
 0x526   : > { %3480 = vpow2.f32 %v1817_v42 }
 0x527   : > { %3482 = vpow2.f32 %v1819_v0 }
 0x528   : > { %3484 = vpow2.f32 %v1821_v35 }
 0x529   : > { %2021 = vadd.xlane.f32.xlu1 %v2020_v49 }
 0x52b   : > { %v3479_v38 = vpop.eup %3478  ;;  %v2208_v20 = vpop.f32.mrf.mxu2 }
 0x52c   : > { %v1554_v7 = vpop.xlane.xlu1 %1553  ;;  %v3481_v19 = vpop.eup %3480 }
 0x52d   : > { %v1629_v36 = vsub.f32 %v4320_v14, %v1554_v7  ;;  %v1630_v29 = vsub.f32 %v4314_v63, %v1554_v7  ;;  %v3483_v43 = vpop.eup %3482 }
 0x52e   : > { %v3485_v9 = vpop.eup %3484  ;;  %v1895_v10 = vpack.c.bf16 %v3483_v43, %v3479_v38 }
 0x52f   : > { %v1673_v42 = vpack.c.bf16 %v1629_v36, %v1627_v25  ;;  %v1674_v26 = vpack.c.bf16 %v1630_v29, %v1628_v12  ;;  %v1896_v18 = vpack.c.bf16 %v3485_v9, %v3481_v19 }
 0x530   : > { %2247 = vmatmul.bf16.gmra.mxu2 %v1895_v10  ;;  %v1943_v5 = vunpack.c.l.bf16 %v1895_v10  ;;  %v1945_v52 = vunpack.c.h.bf16 %v1895_v10 }
 0x531   : > { %v1723_v37 = vunpack.c.l.bf16 %v1673_v42  ;;  %v1724_v4 = vunpack.c.l.bf16 %v1674_v26  ;;  %v1725_v15 = vunpack.c.h.bf16 %v1673_v42  ;;  %v1726_v62 = vunpack.c.h.bf16 %v1674_v26  ;;  %2336 = vmatmul.bf16.gmra.mxu3 %v1896_v18 }
 0x532   : > { %v1944_v53 = vunpack.c.l.bf16 %v1896_v18  ;;  %v1946_v32 = vunpack.c.h.bf16 %v1896_v18  ;;  %v2297_v63 = vpop.f32.mrf.mxu3 }
 0x533   : > { %v1823_v28 = vmul.f32 1.442695, %v1723_v37  ;;  %v1825_v14 = vmul.f32 1.442695, %v1724_v4  ;;  %v1827_v45 = vmul.f32 1.442695, %v1725_v15  ;;  %v2210_v17 = vpop.f32.mrf.mxu2  ;;  %v4442_v0 = vadd.f32 %v2297_v63, %v2208_v20 }
 0x534   : > { %v1829_v46 = vmul.f32 1.442695, %v1726_v62  ;;  %v4444_v35 = vadd.f32 %v1944_v53, %v1943_v5  ;;  %v4446_v49 = vadd.f32 %v1946_v32, %v1945_v52  ;;  %v1557_v11 = vpop.xlane.xlu0 %1556 }
 0x535   : > { %3486 = vpow2.f32 %v1823_v28  ;;  %v1631_v20 = vsub.f32 %v4330_v30, %v1557_v11  ;;  %v1632_v43 = vsub.f32 %v4324_v40, %v1557_v11 }
 0x536   : > { %3488 = vpow2.f32 %v1825_v14 }
 0x537   : > { %3490 = vpow2.f32 %v1827_v45 }
 0x538   : > { %3492 = vpow2.f32 %v1829_v46 }
 0x53a   : > { %v2299_v7 = vpop.f32.mrf.mxu3 }
 0x53b   : > { %v3487_v38 = vpop.eup %3486  ;;  %v4448_v12 = vadd.f32 %v2299_v7, %v2210_v17 }
 0x53c   : > { %v3489_v19 = vpop.eup %3488  ;;  %v2213_v25 = vpop.f32.mrf.mxu2 }
 0x53d   : > { %v1560_v36 = vpop.xlane.xlu1 %1559  ;;  %v3491_v29 = vpop.eup %3490 }
 0x53e   : > { %v1633_v9 = vsub.f32 %v4340_v13, %v1560_v36  ;;  %v1634_v42 = vsub.f32 %v4334_v59, %v1560_v36  ;;  %v3493_v26 = vpop.eup %3492  ;;  %v1897_v10 = vpack.c.bf16 %v3491_v29, %v3487_v38 }
 0x53f   : > { %v1898_v4 = vpack.c.bf16 %v3493_v26, %v3489_v19 }
 0x540   : > { %v1675_v18 = vpack.c.bf16 %v1633_v9, %v1631_v20  ;;  %v1676_v37 = vpack.c.bf16 %v1634_v42, %v1632_v43  ;;  %v1949_v15 = vunpack.c.h.bf16 %v1897_v10  ;;  %v1947_v62 = vunpack.c.l.bf16 %v1897_v10  ;;  %2252 = vmatmul.bf16.gmra.mxu2 %v1897_v10 }
 0x541   : > { %2341 = vmatmul.bf16.gmra.mxu3 %v1898_v4  ;;  %v1950_v30 = vunpack.c.h.bf16 %v1898_v4  ;;  %v1948_v28 = vunpack.c.l.bf16 %v1898_v4 }
 0x542   : > { %v1727_v5 = vunpack.c.l.bf16 %v1675_v18  ;;  %v1728_v53 = vunpack.c.l.bf16 %v1676_v37  ;;  %v1729_v52 = vunpack.c.h.bf16 %v1675_v18  ;;  %v1730_v32 = vunpack.c.h.bf16 %v1676_v37  ;;  %v2302_v45 = vpop.f32.mrf.mxu3 }
 0x543   : > { %v4454_v46 = vadd.f32 %v2302_v45, %v2213_v25  ;;  %v4456_v17 = vadd.f32 %v1950_v30, %v1949_v15  ;;  %v4458_v11 = vadd.f32 %v1948_v28, %v1947_v62 }
 0x544   : > { %v1831_v40 = vmul.f32 1.442695, %v1727_v5  ;;  %v1833_v14 = vmul.f32 1.442695, %v1728_v53  ;;  %v1835_v13 = vmul.f32 1.442695, %v1729_v52  ;;  %v2215_v63 = vpop.f32.mrf.mxu2  ;;  %v1563_v38 = vpop.xlane.xlu0 %1562 }
 0x545   : > { %v1837_v59 = vmul.f32 1.442695, %v1730_v32  ;;  %v1635_v25 = vsub.f32 %v4350_v2, %v1563_v38  ;;  %v1636_v42 = vsub.f32 %v4344_v39, %v1563_v38 }
 0x546   : > { %3494 = vpow2.f32 %v1831_v40 }
 0x547   : > { %3496 = vpow2.f32 %v1833_v14 }
 0x548   : > { %3498 = vpow2.f32 %v1835_v13 }
 0x549   : > { %3500 = vpow2.f32 %v1837_v59 }
 0x54a   : > { %v2304_v19 = vpop.f32.mrf.mxu3 }
 0x54b   : > { %v4460_v20 = vadd.f32 %v2304_v19, %v2215_v63 }
 0x54c   : > { %v3495_v7 = vpop.eup %3494  ;;  %v2218_v29 = vpop.f32.mrf.mxu2 }
 0x54d   : > { %v3497_v36 = vpop.eup %3496  ;;  %v1566_v43 = vpop.xlane.xlu1 %1565 }
 0x54e   : > { %v3499_v9 = vpop.eup %3498  ;;  %v1637_v26 = vsub.f32 %v4360_v34, %v1566_v43  ;;  %v1638_v10 = vsub.f32 %v4354_v60, %v1566_v43 }
 0x54f   : > { %v3501_v18 = vpop.eup %3500  ;;  %v1899_v37 = vpack.c.bf16 %v3499_v9, %v3495_v7 }
 0x550   : > { %v1677_v4 = vpack.c.bf16 %v1637_v26, %v1635_v25  ;;  %v1678_v15 = vpack.c.bf16 %v1638_v10, %v1636_v42  ;;  %v1900_v62 = vpack.c.bf16 %v3501_v18, %v3497_v36 }
 0x551   : > { %v1951_v5 = vunpack.c.l.bf16 %v1899_v37  ;;  %v1953_v53 = vunpack.c.h.bf16 %v1899_v37  ;;  %2257 = vmatmul.bf16.gmra.mxu2 %v1899_v37 }
 0x552   : > { %v1731_v52 = vunpack.c.l.bf16 %v1677_v4  ;;  %v1732_v32 = vunpack.c.l.bf16 %v1678_v15  ;;  %v1733_v30 = vunpack.c.h.bf16 %v1677_v4  ;;  %v1734_v28 = vunpack.c.h.bf16 %v1678_v15  ;;  %2346 = vmatmul.bf16.gmra.mxu3 %v1900_v62  ;;  %v2307_v13 = vpop.f32.mrf.mxu3 }
 0x553   : > { %v1952_v2 = vunpack.c.l.bf16 %v1900_v62  ;;  %v1954_v40 = vunpack.c.h.bf16 %v1900_v62  ;;  %v4466_v59 = vadd.f32 %v2307_v13, %v2218_v29 }
 0x554   : > { %v1839_v39 = vmul.f32 1.442695, %v1731_v52  ;;  %v1841_v14 = vmul.f32 1.442695, %v1732_v32  ;;  %v1843_v34 = vmul.f32 1.442695, %v1733_v30  ;;  %v2220_v45 = vpop.f32.mrf.mxu2  ;;  %v1569_v7 = vpop.xlane.xlu0 %1568 }
 0x555   : > { %v1845_v60 = vmul.f32 1.442695, %v1734_v28  ;;  %v4468_v63 = vadd.f32 %v1952_v2, %v1951_v5  ;;  %v4470_v38 = vadd.f32 %v1954_v40, %v1953_v53  ;;  %v1639_v29 = vsub.f32 %v4370_v50, %v1569_v7 }
 0x556   : > { %3502 = vpow2.f32 %v1839_v39  ;;  %v1640_v10 = vsub.f32 %v4364_v55, %v1569_v7 }
 0x557   : > { %3504 = vpow2.f32 %v1841_v14 }
 0x558   : > { %3506 = vpow2.f32 %v1843_v34 }
 0x559   : > { %3508 = vpow2.f32 %v1845_v60 }
 0x55a   : > { %v2309_v36 = vpop.f32.mrf.mxu3 }
 0x55b   : > { %v4472_v25 = vadd.f32 %v2309_v36, %v2220_v45 }
 0x55c   : > { %v3503_v19 = vpop.eup %3502  ;;  %v2223_v9 = vpop.f32.mrf.mxu2 }
 0x55d   : > { %v3505_v43 = vpop.eup %3504  ;;  %v1572_v42 = vpop.xlane.xlu1 %1571 }
 0x55e   : > { %v3507_v26 = vpop.eup %3506  ;;  %v1641_v18 = vsub.f32 %v4380_v24, %v1572_v42  ;;  %v1642_v37 = vsub.f32 %v4374_v6, %v1572_v42 }
 0x55f   : > { %v3509_v4 = vpop.eup %3508  ;;  %v4478_v15 = vpack.c.bf16 %v3507_v26, %v3503_v19 }
 0x560   : > { %v1679_v62 = vpack.c.bf16 %v1641_v18, %v1639_v29  ;;  %v1680_v5 = vpack.c.bf16 %v1642_v37, %v1640_v10  ;;  %v4480_v53 = vpack.c.bf16 %v3509_v4, %v3505_v43 }
 0x561   : > { %v1957_v52 = vunpack.c.h.bf16 %v4478_v15  ;;  %2262 = vmatmul.bf16.gmra.mxu2 %v4478_v15 }
 0x562   : > { %v1735_v32 = vunpack.c.l.bf16 %v1679_v62  ;;  %v1736_v30 = vunpack.c.l.bf16 %v1680_v5  ;;  %v1737_v28 = vunpack.c.h.bf16 %v1679_v62  ;;  %v1738_v2 = vunpack.c.h.bf16 %v1680_v5  ;;  %2351 = vmatmul.bf16.gmra.mxu3 %v4480_v53  ;;  %v2312_v40 = vpop.f32.mrf.mxu3 }
 0x563   : > { %v1958_v55 = vunpack.c.h.bf16 %v4480_v53  ;;  %v4486_v34 = vadd.f32 %v2312_v40, %v2223_v9 }
 0x564   : > { %v1847_v50 = vmul.f32 1.442695, %v1735_v32  ;;  %v1849_v6 = vmul.f32 1.442695, %v1736_v30  ;;  %v1851_v24 = vmul.f32 1.442695, %v1737_v28  ;;  %v2225_v14 = vpop.f32.mrf.mxu2  ;;  %v1575_v60 = vpop.xlane.xlu0 %1574 }
 0x565   : > { %v1853_v39 = vmul.f32 1.442695, %v1738_v2  ;;  %v4488_v13 = vadd.f32 %v1958_v55, %v1957_v52  ;;  %v1643_v29 = vsub.f32 %v4390_v3, %v1575_v60  ;;  %v1644_v9 = vsub.f32 %v4384_v51, %v1575_v60 }
 0x566   : > { %3510 = vpow2.f32 %v1847_v50 }
 0x567   : > { %3512 = vpow2.f32 %v1849_v6 }
 0x568   : > { %3514 = vpow2.f32 %v1851_v24 }
 0x569   : > { %3516 = vpow2.f32 %v1853_v39 }
 0x56a   : > { %v2314_v7 = vpop.f32.mrf.mxu3 }
 0x56b   : > { %v4490_v43 = vadd.f32 %v2314_v7, %v2225_v14  ;;  %v1955_v7 = vunpack.c.l.bf16 %v4478_v15 }
 0x56c   : > { %v3511_v45 = vpop.eup %3510  ;;  %v2228_v36 = vpop.f32.mrf.mxu2 }
 0x56d   : > { %v3513_v19 = vpop.eup %3512  ;;  %v1578_v42 = vpop.xlane.xlu1 %1577 }
 0x56e   : > { %v3515_v26 = vpop.eup %3514  ;;  %v1645_v10 = vsub.f32 %v4400_v54, %v1578_v42  ;;  %v1646_v18 = vsub.f32 %v4394_v22, %v1578_v42 }
 0x56f   : > { %v3517_v37 = vpop.eup %3516  ;;  %v1903_v4 = vpack.c.bf16 %v3515_v26, %v3511_v45 }
 0x570   : > { %v1681_v62 = vpack.c.bf16 %v1645_v10, %v1643_v29  ;;  %v1682_v5 = vpack.c.bf16 %v1646_v18, %v1644_v9  ;;  %v1904_v52 = vpack.c.bf16 %v3517_v37, %v3513_v19  ;;  %v1956_v19 = vunpack.c.l.bf16 %v4480_v53 }
 0x571   : > { %v1961_v32 = vunpack.c.h.bf16 %v1903_v4  ;;  %2267 = vmatmul.bf16.gmra.mxu2 %v1903_v4  ;;  %v1959_v3 = vunpack.c.l.bf16 %v1903_v4 }
 0x572   : > { %v1739_v30 = vunpack.c.l.bf16 %v1681_v62  ;;  %v1740_v28 = vunpack.c.l.bf16 %v1682_v5  ;;  %v1741_v2 = vunpack.c.h.bf16 %v1681_v62  ;;  %v1742_v55 = vunpack.c.h.bf16 %v1682_v5  ;;  %2356 = vmatmul.bf16.gmra.mxu3 %v1904_v52  ;;  %v2317_v40 = vpop.f32.mrf.mxu3 }
 0x573   : > { %v1962_v50 = vunpack.c.h.bf16 %v1904_v52  ;;  %v1960_v6 = vunpack.c.l.bf16 %v1904_v52  ;;  %v4496_v60 = vadd.f32 %v2317_v40, %v2228_v36  ;;  %v2041_v10 = vadd.f32 %v1956_v19, %v1955_v7 }
 0x574   : > { %v1855_v51 = vmul.f32 1.442695, %v1739_v30  ;;  %v1857_v24 = vmul.f32 1.442695, %v1740_v28  ;;  %v1859_v54 = vmul.f32 1.442695, %v1741_v2  ;;  %v2230_v14 = vpop.f32.mrf.mxu2  ;;  %v1581_v42 = vpop.xlane.xlu0 %1580 }
 0x575   : > { %v1861_v22 = vmul.f32 1.442695, %v1742_v55  ;;  %v2050_v39 = vadd.f32 %v1962_v50, %v1961_v32  ;;  %v4498_v45 = vadd.f32 %v1960_v6, %v1959_v3  ;;  %v1647_v4 = vsub.f32 %v4408_v23, %v1581_v42 }
 0x576   : > { %3518 = vpow2.f32 %v1855_v51  ;;  %v1648_v62 = vsub.f32 %v4404_v8, %v1581_v42 }
 0x577   : > { %3520 = vpow2.f32 %v1857_v24  ;;  %2051 = vadd.xlane.f32.xlu2 %v2050_v39 }
 0x578   : > { %3522 = vpow2.f32 %v1859_v54 }
 0x579   : > { %3524 = vpow2.f32 %v1861_v22 }
 0x57a   : > { %v2319_v29 = vpop.f32.mrf.mxu3 }
 0x57b   : > { %v4502_v18 = vadd.f32 %v2319_v29, %v2230_v14 }
 0x57c   : > { %v3519_v26 = vpop.eup %3518  ;;  %v1584_v36 = vpop.xlane.xlu1 %1583 }
 0x57d   : > { %v3521_v9 = vpop.eup %3520  ;;  %v2233_v5 = vpop.f32.mrf.mxu2  ;;  %v1649_v52 = vsub.f32 %v4414_v58, %v1584_v36  ;;  %v1650_v15 = vsub.f32 %v4412_v57, %v1584_v36 }
 0x57e   : > { %v3523_v37 = vpop.eup %3522 }
 0x57f   : > { %v3525_v32 = vpop.eup %3524  ;;  %2042 = vadd.xlane.f32.xlu2 %v2041_v10  ;;  %v4508_v53 = vpack.c.bf16 %v3523_v37, %v3519_v26  ;;  %v1683_v30 = vpack.c.bf16 %v1649_v52, %v1647_v4  ;;  %v1684_v28 = vpack.c.bf16 %v1650_v15, %v1648_v62 }
 0x580   : > { %v4510_v2 = vpack.c.bf16 %v3525_v32, %v3521_v9 }
 0x581   : > { %v1963_v55 = vunpack.c.l.bf16 %v4508_v53  ;;  %v1743_v50 = vunpack.c.l.bf16 %v1683_v30  ;;  %v1744_v3 = vunpack.c.l.bf16 %v1684_v28  ;;  %v1745_v23 = vunpack.c.h.bf16 %v1683_v30  ;;  %2272 = vmatmul.bf16.gmra.mxu2 %v4508_v53 }
 0x582   : > { %v1746_v6 = vunpack.c.h.bf16 %v1684_v28  ;;  %2361 = vmatmul.bf16.gmra.mxu3 %v4510_v2  ;;  %v1964_v8 = vunpack.c.l.bf16 %v4510_v2  ;;  %v2322_v24 = vpop.f32.mrf.mxu3 }
 0x583   : > { %v1863_v57 = vmul.f32 1.442695, %v1743_v50  ;;  %v1865_v58 = vmul.f32 1.442695, %v1744_v3  ;;  %v1867_v51 = vmul.f32 1.442695, %v1745_v23  ;;  %v4516_v22 = vadd.f32 %v2322_v24, %v2233_v5 }
 0x584   : > { %v1869_v54 = vmul.f32 1.442695, %v1746_v6  ;;  %v2053_v40 = vadd.f32 %v1964_v8, %v1963_v55  ;;  %v1587_v39 = vpop.xlane.xlu0 %1586 }
 0x585   : > { %3526 = vpow2.f32 %v1863_v57  ;;  %v2235_v14 = vpop.f32.mrf.mxu2  ;;  %v1651_v9 = vsub.f32 %v4424_v48, %v1587_v39  ;;  %v1652_v37 = vsub.f32 %v4422_v61, %v1587_v39 }
 0x586   : > { %3528 = vpow2.f32 %v1865_v58  ;;  %2054 = vadd.xlane.f32.xlu0 %v2053_v40 }
 0x587   : > { %1997 = vadd.xlane.f32.xlu2 %v4366_v21  ;;  %3530 = vpow2.f32 %v1867_v51 }
 0x588   : > { %3532 = vpow2.f32 %v1869_v54 }
 0x58a   : > { %v2324_v19 = vpop.f32.mrf.mxu3 }
 0x58b   : > { %v3527_v7 = vpop.eup %3526  ;;  %v4519_v26 = vadd.f32 %v2324_v19, %v2235_v14 }
 0x58c   : > { %v3529_v42 = vpop.eup %3528  ;;  %v1590_v10 = vpop.xlane.xlu1 %1589 }
 0x58d   : > { %v3531_v29 = vpop.eup %3530  ;;  %v4524_v4 = vpop.xlane.xlu0 %2012  ;;  %v1653_v21 = vsub.f32 %v4430_v16, %v1590_v10  ;;  %v1654_v62 = vsub.f32 %v4428_v47, %v1590_v10 }
 0x58e   : > { %v3533_v36 = vpop.eup %3532  ;;  %v1907_v5 = vpack.c.bf16 %v3531_v29, %v3527_v7  ;;  %v4528_v55 = vpop.f32.mrf.mxu2  ;;  %3534 = vrcp.f32 %v4524_v4  ;;  %vm2550_vm10 = vweird.f32 %v4524_v4 }
 0x58f   : > { %1988 = vadd.xlane.f32.xlu2 %v4346_v1  ;;  %v1908_v52 = vpack.c.bf16 %v3533_v36, %v3529_v42  ;;  %v1685_v15 = vpack.c.bf16 %v1653_v21, %v1651_v9  ;;  %v1686_v32 = vpack.c.bf16 %v1654_v62, %v1652_v37  ;;  %v1965_v21 = vunpack.c.h.bf16 %v4508_v53 }
 0x590   : > { %v1967_v30 = vunpack.c.l.bf16 %v1907_v5  ;;  %v1969_v28 = vunpack.c.h.bf16 %v1907_v5  ;;  %v1966_v62 = vunpack.c.h.bf16 %v4510_v2 }
 0x591   : > { %2277 = vmatmul.bf16.gmra.mxu2 %v1907_v5  ;;  %v1968_v48 = vunpack.c.l.bf16 %v1908_v52  ;;  %v1970_v50 = vunpack.c.h.bf16 %v1908_v52  ;;  %v1747_v61 = vunpack.c.l.bf16 %v1685_v15  ;;  %v1748_v3 = vunpack.c.l.bf16 %v1686_v32 }
 0x592   : > { %v1749_v1 = vunpack.c.h.bf16 %v1685_v15  ;;  %v1750_v23 = vunpack.c.h.bf16 %v1686_v32  ;;  %2366 = vmatmul.bf16.gmra.mxu3 %v1908_v52  ;;  %v4530_v8 = vpop.f32.mrf.mxu3 }
 0x593   : > { %v2059_v6 = vadd.f32 %v1968_v48, %v1967_v30  ;;  %v2062_v16 = vadd.f32 %v1970_v50, %v1969_v28  ;;  %v1871_v47 = vmul.f32 1.442695, %v1747_v61  ;;  %v1873_v57 = vmul.f32 1.442695, %v1748_v3 }
 0x594   : > { %v1875_v58 = vmul.f32 1.442695, %v1749_v1  ;;  %v1877_v51 = vmul.f32 1.442695, %v1750_v23  ;;  %v4533_v24 = vpop.xlane.xlu1 %2015  ;;  %v4539_v40 = vpop.eup %3534 }
 0x595   : > { %2060 = vadd.xlane.f32.xlu0 %v2059_v6  ;;  %2063 = vadd.xlane.f32.xlu1 %v2062_v16  ;;  %3536 = vpow2.f32 %v1871_v47  ;;  %v2546_v29 = vmul.f32 %v4539_v40, %v4524_v4  ;;  %v2056_v6 = vadd.f32 %v1966_v62, %v1965_v21  ;;  %vm2551_vm11 = vweird.f32 %v4539_v40 }
 0x596   : > { %3538 = vpow2.f32 %v1873_v57  ;;  %v4541_v39 = vpop.f32.mrf.mxu2  ;;  %vm2564_vm13 = vweird.f32 %v4533_v24  ;;  %vm2552_vm9 = vmor %vm2550_vm10, %vm2551_vm11 }
 0x597   : > { %2033 = vadd.xlane.f32.xlu2 %v4456_v17  ;;  %3540 = vpow2.f32 %v1875_v58  ;;  %v4536_v54 = vpop.xlane.xlu0 %2018  ;;  %v2547_v30 = vsub.f32 1.0, %v2546_v29 }
 0x598   : > { %3542 = vpow2.f32 %v1877_v51  ;;  %v2584_v51 = vand.u32 2147483648, %v4536_v54  ;;  %vm2578_vm14 = vweird.f32 %v4536_v54 }
 0x599   : > { %3544 = vrcp.f32 %v4533_v24  ;;  %v2548_v57 = vmul.f32 %v4539_v40, %v2547_v30 }
 0x59a   : > { %3546 = vrcp.f32 %v4536_v54  ;;  %v4544_v14 = vpop.f32.mrf.mxu3 }
 0x59b   : > { %v3537_v7 = vpop.eup %3536  ;;  %v2549_v62 = vadd.f32 %v4539_v40, %v2548_v57 }
 0x59c   : > { %v3539_v19 = vpop.eup %3538  ;;  %v4546_v42 = vpop.xlane.xlu1 %2021 }
 0x59d   : > { %v3541_v17 = vpop.eup %3540  ;;  %3548 = vrcp.f32 %v4546_v42  ;;  %v2596_v21 = vand.u32 2147483647, %v4546_v42  ;;  %vm2592_vm5 = vweird.f32 %v4546_v42 }
 0x59e   : > { %v3543_v9 = vpop.eup %3542  ;;  %v1909_v10 = vpack.c.bf16 %v3541_v17, %v3537_v7  ;;  %v2568_v7 = vand.u32 2147483647, %v4533_v24  ;;  %v2582_v17 = vand.u32 2147483647, %v4536_v54 }
 0x59f   : > { %2024 = vadd.xlane.f32.xlu2 %v4444_v35  ;;  %v4552_v36 = vpop.eup %3544  ;;  %v1910_v37 = vpack.c.bf16 %v3543_v9, %v3539_v19  ;;  %v2598_v9 = vand.u32 2147483648, %v4546_v42  ;;  %vm2597_vm8 = vcmp.eq.f32.partialorder %v2596_v21, 8.507059e+37 }
 0x5a0   : > { %v3547_v5 = vpop.eup %3546  ;;  %v2560_v52 = vmul.f32 %v4552_v36, %v4533_v24  ;;  %v1973_v15 = vunpack.c.h.bf16 %v1909_v10  ;;  %v1971_v32 = vunpack.c.l.bf16 %v1909_v10  ;;  %vm2565_vm15 = vweird.f32 %v4552_v36 }
 0x5a1   : > { %2282 = vmatmul.bf16.gmra.mxu2 %v1909_v10  ;;  %v2574_v35 = vmul.f32 %v3547_v5, %v4536_v54  ;;  %v1974_v28 = vunpack.c.h.bf16 %v1910_v37  ;;  %v1972_v48 = vunpack.c.l.bf16 %v1910_v37  ;;  %vm2579_vm12 = vweird.f32 %v3547_v5  ;;  %vm4584_vm4 = vmor %vm2564_vm13, %vm2565_vm15 }
 0x5a2   : > { %2371 = vmatmul.bf16.gmra.mxu3 %v1910_v37  ;;  %v2561_v50 = vsub.f32 1.0, %v2560_v52  ;;  %v2243_v61 = vpop.f32.mrf.mxu2  ;;  %vm4573_vm2 = vmor %vm2578_vm14, %vm2579_vm12  ;;  %v2570_v52 = vand.u32 2147483648, %v4533_v24  ;;  %vm2583_vm6 = vcmp.eq.f32.partialorder %v2582_v17, 8.507059e+37  ;;  %vm2569_vm12 = vcmp.eq.f32.partialorder %v2568_v7, 8.507059e+37 }
 0x5a3   : > { %v3549_v3 = vpop.eup %3548  ;;  %v2575_v1 = vsub.f32 1.0, %v2574_v35  ;;  %v2068_v53 = vadd.f32 %v1974_v28, %v1973_v15  ;;  %v2065_v23 = vadd.f32 %v1972_v48, %v1971_v32  ;;  %v2332_v2 = vpop.f32.mrf.mxu3  ;;  %v2585_v15 = vor.u32 1.1754944e-38, %v2584_v51 }
 0x5a4   : > { %v2562_v16 = vmul.f32 %v4552_v36, %v2561_v50  ;;  %v2588_v47 = vmul.f32 %v3549_v3, %v4546_v42  ;;  %vm2593_vm3 = vweird.f32 %v3549_v3  ;;  %v2333_v30 = vadd.f32 %v2332_v2, %v2243_v61 }
 0x5a5   : > { %v2576_v58 = vmul.f32 %v3547_v5, %v2575_v1  ;;  %2069 = vadd.xlane.f32.xlu1 %v2068_v53  ;;  %2066 = vadd.xlane.f32.xlu0 %v2065_v23  ;;  %v2554_v48 = vand.u32 2147483647, %v4524_v4  ;;  %v2556_v50 = vand.u32 2147483648, %v4524_v4  ;;  %vm2594_vm7 = vmor %vm2592_vm5, %vm2593_vm3  ;;  %v2571_v42 = vor.u32 1.1754944e-38, %v2570_v52  ;;  %v5478_v52 = vld [vmem:[#allocation25_spill] sm:$0xff] }
 0x5a6   : > { %v2589_v19 = vsub.f32 1.0, %v2588_v47  ;;  %v2553_v2 = vsel %vm2552_vm9, %v4539_v40, %v2549_v62  ;;  %v2328_v4 = vadd.f32 %v4530_v8, %v4528_v55 }
 0x5a7   : > { %1979 = vadd.xlane.f32.xlu2 %v4306_v44  ;;  %v2577_v29 = vadd.f32 %v3547_v5, %v2576_v58  ;;  %v2563_v44 = vadd.f32 %v4552_v36, %v2562_v16  ;;  %v2557_v58 = vor.u32 1.1754944e-38, %v2556_v50  ;;  %vm2555_vm13 = vcmp.eq.f32.partialorder %v2554_v48, 8.507059e+37 }
 0x5a8   : > { %v2590_v10 = vmul.f32 %v3549_v3, %v2589_v19 }
 0x5a9   : > { %v2581_v54 = vsel %vm4573_vm2, %v3547_v5, %v2577_v29  ;;  %v2599_v5 = vor.u32 1.1754944e-38, %v2598_v9  ;;  %v2567_v24 = vsel %vm4584_vm4, %v4552_v36, %v2563_v44  ;;  %v2558_v19 = vsel %vm2555_vm13, %v2557_v58, %v2553_v2 }
 0x5aa   : > { %v2245_v35 = vpop.f32.mrf.mxu2  ;;  %v2591_v28 = vadd.f32 %v3549_v3, %v2590_v10  ;;  %v2586_v1 = vsel %vm2583_vm6, %v2585_v15, %v2581_v54  ;;  %v2572_v36 = vsel %vm2569_vm12, %v2571_v42, %v2567_v24  ;;  %v2837_v7 = vmul.f32 %v2558_v19, %v2328_v4  ;;  %v5479_v15 = vld [vmem:[#allocation26_spill] sm:$0xff] }
 0x5ab   : > { %v2334_v53 = vpop.f32.mrf.mxu3  ;;  %v2839_v47 = vmul.f32 %v2586_v1, %v2333_v30  ;;  %v2874_v1 = vld [vmem:[%s5481_s24] sm:$0xf] }
 0x5ac   : > { %v2335_v23 = vadd.f32 %v2334_v53, %v2245_v35  ;;  %v2595_v16 = vsel %vm2594_vm7, %v3549_v3, %v2591_v28  ;;  %v2330_v3 = vadd.f32 %v4544_v14, %v4541_v39 }
 0x5ad   : > { %2057 = vadd.xlane.f32.xlu1 %v2056_v6  ;;  %v2600_v61 = vsel %vm2597_vm8, %v2599_v5, %v2595_v16  ;;  %2009 = vadd.xlane.f32.xlu0 %v4406_v33 }
 0x5ae   : > { %v2840_v57 = vmul.f32 %v2600_v61, %v2335_v23  ;;  %v2838_v6 = vmul.f32 %v2572_v36, %v2330_v3 }
 0x5b0   : > { %v2864_v51 = vpack.c.bf16 %v2840_v57, %v2839_v47  ;;  %v2863_v9 = vpack.c.bf16 %v2838_v6, %v2837_v7 }
 0x5b2   : > { %v2905_v17 = vsel %vm506_vm1, %v2864_v51, 0  ;;  %v2902_v39 = vsel %vm506_vm1, %v2863_v9, 0 }
 0x5b3   : > { %v2248_v40 = vpop.f32.mrf.mxu2  ;;  %2931 = vmatpush.bf16.xpose.msra.mxu0 %v2905_v17 }
 0x5b4   : > { %v2337_v29 = vpop.f32.mrf.mxu3 }
 0x5b5   : > { %2048 = vadd.xlane.f32.xlu1 %v4498_v45  ;;  %v4607_v33 = vadd.f32 %v2337_v29, %v2248_v40  ;;  %2000 = vadd.xlane.f32.xlu0 %v4386_v56 }
 0x5bb   : > { %v2250_v14 = vpop.f32.mrf.mxu2  ;;  %2932 = vmatpush.bf16.xpose.msra.mxu0 %v2902_v39 }
 0x5bc   : > { %v2339_v44 = vpop.f32.mrf.mxu3 }
 0x5bd   : > { %2003 = vadd.xlane.f32.xlu1 %v4388_v31  ;;  %v4612_v55 = vadd.f32 %v2339_v44, %v2250_v14  ;;  %2045 = vadd.xlane.f32.xlu0 %v4488_v13 }
 0x5c3   : > { %v2253_v8 = vpop.f32.mrf.mxu2 }
 0x5c4   : > { %v2342_v10 = vpop.f32.mrf.mxu3 }
 0x5c5   : > { %1994 = vadd.xlane.f32.xlu1 %v4368_v41  ;;  %v4616_v45 = vadd.f32 %v2342_v10, %v2253_v8  ;;  %2036 = vadd.xlane.f32.xlu0 %v4468_v63 }
 0x5cb   : > { %v2255_v56 = vpop.f32.mrf.mxu2 }
 0x5cc   : > { %v2344_v37 = vpop.f32.mrf.mxu3 }
 0x5cd   : > { %2039 = vadd.xlane.f32.xlu1 %v4470_v38  ;;  %v4620_v21 = vadd.f32 %v2344_v37, %v2255_v56  ;;  %1991 = vadd.xlane.f32.xlu0 %v4348_v27  ;;  %v2007_v38 = vpop.xlane.xlu2 %2006  ;;  %v5480_v27 = vld [vmem:[#allocation24_spill] sm:$0xff] }
 0x5ce   : > { %3550 = vrcp.f32 %v2007_v38  ;;  %vm2522_vm11 = vweird.f32 %v2007_v38  ;;  %v2528_v7 = vand.u32 2147483648, %v2007_v38  ;;  %v2526_v9 = vand.u32 2147483647, %v2007_v38 }
 0x5d0   : > { %v2529_v56 = vor.u32 1.1754944e-38, %v2528_v7  ;;  %vm2527_vm15 = vcmp.eq.f32.partialorder %v2526_v9, 8.507059e+37 }
 0x5d4   : > { %v2258_v31 = vpop.f32.mrf.mxu2  ;;  %v3551_v53 = vpop.eup %3550 }
 0x5d5   : > { %v2347_v62 = vpop.f32.mrf.mxu3  ;;  %2030 = vadd.xlane.f32.xlu1 %v4458_v11  ;;  %1982 = vadd.xlane.f32.xlu0 %v5478_v52  ;;  %v2518_v5 = vmul.f32 %v3551_v53, %v2007_v38  ;;  %vm2523_vm10 = vweird.f32 %v3551_v53 }
 0x5d6   : > { %v4624_v13 = vadd.f32 %v2347_v62, %v2258_v31  ;;  %vm2524_vm14 = vmor %vm2522_vm11, %vm2523_vm10 }
 0x5d7   : > { %v2519_v42 = vsub.f32 1.0, %v2518_v5 }
 0x5d9   : > { %v2520_v58 = vmul.f32 %v3551_v53, %v2519_v42 }
 0x5db   : > { %v2521_v6 = vadd.f32 %v3551_v53, %v2520_v58 }
 0x5dc   : > { %v2260_v41 = vpop.f32.mrf.mxu2 }
 0x5dd   : > { %v2349_v54 = vpop.f32.mrf.mxu3  ;;  %1985 = vadd.xlane.f32.xlu1 %v5479_v15  ;;  %2027 = vadd.xlane.f32.xlu0 %v4446_v49  ;;  %v2525_v44 = vsel %vm2524_vm14, %v3551_v53, %v2521_v6 }
 0x5de   : > { %v4628_v63 = vadd.f32 %v2349_v54, %v2260_v41  ;;  %v2530_v41 = vsel %vm2527_vm15, %v2529_v56, %v2525_v44 }
 0x5e4   : > { %v2263_v32 = vpop.f32.mrf.mxu2 }
 0x5e5   : > { %v2352_v30 = vpop.f32.mrf.mxu3  ;;  %1976 = vadd.xlane.f32.xlu1 %v5480_v27 }
 0x5e6   : > { %v4632_v35 = vadd.f32 %v2352_v30, %v2263_v32 }
 0x5ea   : > { %v4634_v11 = vpop.xlane.xlu2 %2051 }
 0x5eb   : > { %3552 = vrcp.f32 %v4634_v11  ;;  %v2736_v54 = vand.u32 2147483647, %v4634_v11  ;;  %vm2732_vm2 = vweird.f32 %v4634_v11  ;;  %v2738_v32 = vand.u32 2147483648, %v4634_v11 }
 0x5ec   : > { %v2265_v28 = vpop.f32.mrf.mxu2 }
 0x5ed   : > { %v2354_v48 = vpop.f32.mrf.mxu3  ;;  %vm4709_vm6 = vcmp.eq.f32.partialorder %v2736_v54, 8.507059e+37  ;;  %v2739_v7 = vor.u32 1.1754944e-38, %v2738_v32 }
 0x5ee   : > { %v4636_v50 = vadd.f32 %v2354_v48, %v2265_v28 }
 0x5f1   : > { %2877 = vperm.xlu0 %3407, %v2874_v1   ;;  %v4647_v61 = vpop.eup %3552 }
 0x5f2   : > { %v4641_v49 = vpop.xlane.xlu2 %2042  ;;  %v2728_v36 = vmul.f32 %v4647_v61, %v4634_v11  ;;  %vm2733_vm3 = vweird.f32 %v4647_v61 }
 0x5f3   : > { %3554 = vrcp.f32 %v4641_v49  ;;  %v2694_v28 = vand.u32 2147483647, %v4641_v49  ;;  %v2696_v48 = vand.u32 2147483648, %v4641_v49  ;;  %vm4705_vm5 = vmor %vm2732_vm2, %vm2733_vm3  ;;  %vm2690_vm7 = vweird.f32 %v4641_v49 }
 0x5f4   : > { %v2268_v24 = vpop.f32.mrf.mxu2  ;;  %v2729_v17 = vsub.f32 1.0, %v2728_v36 }
 0x5f5   : > { %v2357_v23 = vpop.f32.mrf.mxu3  ;;  %v2697_v6 = vor.u32 1.1754944e-38, %v2696_v48  ;;  %vm4730_vm9 = vcmp.eq.f32.partialorder %v2694_v28, 8.507059e+37 }
 0x5f6   : > { %v4645_v16 = vadd.f32 %v2357_v23, %v2268_v24  ;;  %v2730_v8 = vmul.f32 %v4647_v61, %v2729_v17  ;;  %v4701_v23 = vmul.f32 %v2530_v41, %v4516_v22 }
 0x5f8   : > { %v2731_v38 = vadd.f32 %v4647_v61, %v2730_v8 }
 0x5f9   : > { %v4651_v47 = vpop.xlane.xlu0 %2054  ;;  %v4653_v57 = vpop.eup %3554 }
 0x5fa   : > { %v4649_v2 = vpop.xlane.xlu2 %1997  ;;  %3556 = vrcp.f32 %v4651_v47  ;;  %v2686_v19 = vmul.f32 %v4653_v57, %v4641_v49  ;;  %vm2691_vm4 = vweird.f32 %v4653_v57  ;;  %v2735_v11 = vsel %vm4705_vm5, %v4647_v61, %v2731_v38 }
 0x5fb   : > { %3558 = vrcp.f32 %v4649_v2  ;;  %v2486_v22 = vand.u32 2147483648, %v4649_v2  ;;  %vm4724_vm8 = vmor %vm2690_vm7, %vm2691_vm4  ;;  %vm2480_vm13 = vweird.f32 %v4649_v2  ;;  %vm2746_vm10 = vweird.f32 %v4651_v47 }
 0x5fc   : > { %v2270_v3 = vpop.f32.mrf.mxu2  ;;  %v2687_v39 = vsub.f32 1.0, %v2686_v19  ;;  %v2740_v8 = vsel %vm4709_vm6, %v2739_v7, %v2735_v11 }
 0x5fd   : > { %v2359_v51 = vpop.f32.mrf.mxu3  ;;  %v4749_v41 = vor.u32 1.1754944e-38, %v2486_v22 }
 0x5fe   : > { %v4660_v4 = vadd.f32 %v2359_v51, %v2270_v3  ;;  %v2688_v62 = vmul.f32 %v4653_v57, %v2687_v39  ;;  %v2750_v3 = vand.u32 2147483647, %v4651_v47  ;;  %v2484_v39 = vand.u32 2147483647, %v4649_v2 }
 0x600   : > { %v4663_v40 = vpop.eup %3556  ;;  %v2689_v5 = vadd.f32 %v4653_v57, %v2688_v62  ;;  %v2752_v62 = vand.u32 2147483648, %v4651_v47  ;;  %vm4752_vm11 = vcmp.eq.f32.partialorder %v2750_v3, 8.507059e+37  ;;  %v4782_v22 = vmul.f32 %v2740_v8, %v4660_v4 }
 0x601   : > { %v2742_v14 = vmul.f32 %v4663_v40, %v4651_v47  ;;  %v4675_v31 = vpop.eup %3558  ;;  %vm2747_vm12 = vweird.f32 %v4663_v40  ;;  %vm4785_vm2 = vcmp.eq.f32.partialorder %v2484_v39, 8.507059e+37 }
 0x602   : > { %v4665_v29 = vpop.xlane.xlu2 %1988  ;;  %v2476_v1 = vmul.f32 %v4675_v31, %v4649_v2  ;;  %vm4764_vm14 = vmor %vm2746_vm10, %vm2747_vm12  ;;  %vm2481_vm15 = vweird.f32 %v4675_v31  ;;  %v2753_v3 = vor.u32 1.1754944e-38, %v2752_v62 }
 0x603   : > { %3560 = vrcp.f32 %v4665_v29  ;;  %v2743_v52 = vsub.f32 1.0, %v2742_v14  ;;  %v2693_v14 = vsel %vm4724_vm8, %v4653_v57, %v2689_v5  ;;  %v2442_v54 = vand.u32 2147483647, %v4665_v29  ;;  %vm4816_vm8 = vmor %vm2480_vm13, %vm2481_vm15 }
 0x604   : > { %v4671_v10 = vpop.f32.mrf.mxu2  ;;  %v2477_v17 = vsub.f32 1.0, %v2476_v1  ;;  %v2444_v48 = vand.u32 2147483648, %v4665_v29  ;;  %vm2438_vm3 = vweird.f32 %v4665_v29 }
 0x605   : > { %v4673_v37 = vpop.f32.mrf.mxu3  ;;  %v2744_v24 = vmul.f32 %v4663_v40, %v2743_v52  ;;  %vm4800_vm4 = vcmp.eq.f32.partialorder %v2442_v54, 8.507059e+37 }
 0x606   : > { %v2478_v28 = vmul.f32 %v4675_v31, %v2477_v17 }
 0x607   : > { %v2745_v61 = vadd.f32 %v4663_v40, %v2744_v24  ;;  %v2698_v24 = vsel %vm4730_vm9, %v2697_v6, %v2693_v14 }
 0x608   : > { %v4685_v30 = vpop.xlane.xlu0 %2060  ;;  %v4687_v27 = vpop.xlane.xlu1 %2063  ;;  %v4794_v7 = vmul.f32 %v2698_v24, %v4632_v35  ;;  %v2479_v4 = vadd.f32 %v4675_v31, %v2478_v28 }
 0x609   : > { %v4679_v15 = vpop.eup %3560  ;;  %3562 = vrcp.f32 %v4685_v30  ;;  %v2749_v42 = vsel %vm4764_vm14, %v4663_v40, %v2745_v61  ;;  %v2363_v40 = vadd.f32 %v4673_v37, %v4671_v10  ;;  %v2445_v10 = vor.u32 1.1754944e-38, %v2444_v48 }
 0x60a   : > { %v4693_v53 = vpop.xlane.xlu2 %2033  ;;  %v2434_v36 = vmul.f32 %v4679_v15, %v4665_v29  ;;  %v2754_v49 = vsel %vm4752_vm11, %v2753_v3, %v2749_v42  ;;  %vm2439_vm5 = vweird.f32 %v4679_v15  ;;  %v2778_v35 = vand.u32 2147483647, %v4685_v30 }
 0x60b   : > { %3564 = vrcp.f32 %v4693_v53  ;;  %v2654_v61 = vand.u32 2147483648, %v4693_v53  ;;  %vm2774_vm6 = vweird.f32 %v4685_v30  ;;  %vm2648_vm9 = vweird.f32 %v4693_v53  ;;  %vm4827_vm12 = vmor %vm2438_vm3, %vm2439_vm5 }
 0x60c   : > { %3566 = vrcp.f32 %v4687_v27  ;;  %v4722_v51 = vpop.f32.mrf.mxu2  ;;  %v2435_v56 = vsub.f32 1.0, %v2434_v36  ;;  %v2652_v28 = vand.u32 2147483647, %v4693_v53  ;;  %v2780_v48 = vand.u32 2147483648, %v4685_v30 }
 0x60d   : > { %v4728_v9 = vpop.f32.mrf.mxu3  ;;  %vm2788_vm13 = vweird.f32 %v4687_v27  ;;  %v2483_v42 = vsel %vm4816_vm8, %v4675_v31, %v2479_v4  ;;  %vm4847_vm11 = vcmp.eq.f32.partialorder %v2778_v35, 8.507059e+37  ;;  %v2792_v3 = vand.u32 2147483647, %v4687_v27 }
 0x60e   : > { %v2436_v11 = vmul.f32 %v4679_v15, %v2435_v56 }
 0x60f   : > { %v4740_v44 = vpop.eup %3562 }
 0x610   : > { %v2770_v38 = vmul.f32 %v4740_v44, %v4685_v30  ;;  %v2437_v56 = vadd.f32 %v4679_v15, %v2436_v11  ;;  %vm2775_vm7 = vweird.f32 %v4740_v44 }
 0x611   : > { %v4747_v52 = vpop.eup %3564  ;;  %vm4843_vm10 = vmor %vm2774_vm6, %vm2775_vm7 }
 0x612   : > { %v4758_v32 = vpop.eup %3566  ;;  %v2644_v1 = vmul.f32 %v4747_v52, %v4693_v53  ;;  %v4770_v5 = vpop.xlane.xlu2 %2024  ;;  %v2771_v58 = vsub.f32 1.0, %v2770_v38  ;;  %v4820_v38 = vmul.f32 %v2754_v49, %v2363_v40  ;;  %v2794_v40 = vand.u32 2147483648, %v4687_v27 }
 0x613   : > { %v2784_v36 = vmul.f32 %v4758_v32, %v4687_v27  ;;  %3568 = vrcp.f32 %v4770_v5  ;;  %v2441_v4 = vsel %vm4827_vm12, %v4679_v15, %v2437_v56  ;;  %v2612_v49 = vand.u32 2147483648, %v4770_v5 }
 0x614   : > { %v2772_v6 = vmul.f32 %v4740_v44, %v2771_v58  ;;  %v2278_v17 = vpop.f32.mrf.mxu2  ;;  %v2645_v39 = vsub.f32 1.0, %v2644_v1  ;;  %v4832_v1 = vor.u32 1.1754944e-38, %v2654_v61  ;;  %vm2649_vm14 = vweird.f32 %v4747_v52 }
 0x615   : > { %v2367_v14 = vpop.f32.mrf.mxu3  ;;  %v2785_v37 = vsub.f32 1.0, %v2784_v36  ;;  %vm2789_vm15 = vweird.f32 %v4758_v32  ;;  %v2446_v54 = vsel %vm4800_vm4, %v2445_v10, %v2441_v4  ;;  %vm4890_vm3 = vmor %vm2648_vm9, %vm2649_vm14  ;;  %v2610_v47 = vand.u32 2147483647, %v4770_v5 }
 0x616   : > { %v2773_v62 = vadd.f32 %v4740_v44, %v2772_v6  ;;  %v2646_v2 = vmul.f32 %v4747_v52, %v2645_v39  ;;  %v2781_v39 = vor.u32 1.1754944e-38, %v2780_v48  ;;  %v2368_v35 = vadd.f32 %v2367_v14, %v2278_v17  ;;  %vm4913_vm6 = vmor %vm2788_vm13, %vm2789_vm15 }
 0x617   : > { %v2786_v58 = vmul.f32 %v4758_v32, %v2785_v37  ;;  %v2488_v37 = vsel %vm4785_vm2, %v4749_v41, %v2483_v42  ;;  %v4882_v41 = vadd.f32 %v4728_v9, %v4722_v51  ;;  %vm4884_vm2 = vcmp.eq.f32.partialorder %v2792_v3, 8.507059e+37 }
 0x618   : > { %v4835_v24 = vpop.xlane.xlu1 %2069  ;;  %v4851_v11 = vpop.xlane.xlu0 %2066  ;;  %v2777_v30 = vsel %vm4843_vm10, %v4740_v44, %v2773_v62  ;;  %v2647_v44 = vadd.f32 %v4747_v52, %v2646_v2  ;;  %v2795_v14 = vor.u32 1.1754944e-38, %v2794_v40  ;;  %v4895_v8 = vor.u32 1.1754944e-38, %v2612_v49 }
 0x619   : > { %v4810_v57 = vpop.eup %3568  ;;  %3570 = vrcp.f32 %v4851_v11  ;;  %v2782_v15 = vsel %vm4847_vm11, %v2781_v39, %v2777_v30  ;;  %v2787_v56 = vadd.f32 %v4758_v32, %v2786_v58  ;;  %v4898_v10 = vmul.f32 %v2488_v37, %v4490_v43 }
 0x61a   : > { %v2602_v31 = vmul.f32 %v4810_v57, %v4770_v5  ;;  %v4860_v6 = vpop.xlane.xlu2 %1979  ;;  %3572 = vrcp.f32 %v4835_v24  ;;  %vm4900_vm4 = vcmp.eq.f32.partialorder %v2652_v28, 8.507059e+37  ;;  %vm2607_vm5 = vweird.f32 %v4810_v57 }
 0x61b   : > { %3574 = vrcp.f32 %v4860_v6  ;;  %v4907_v53 = vmul.f32 %v2782_v15, %v2368_v35  ;;  %v4920_v28 = vmul.f32 %v2446_v54, %v4466_v59  ;;  %v2651_v42 = vsel %vm4890_vm3, %v4747_v52, %v2647_v44 }
 0x61c   : > { %v2280_v61 = vpop.f32.mrf.mxu2  ;;  %v2603_v19 = vsub.f32 1.0, %v2602_v31  ;;  %vm2606_vm7 = vweird.f32 %v4770_v5  ;;  %v2400_v29 = vand.u32 2147483647, %v4860_v6  ;;  %v2791_v36 = vsel %vm4913_vm6, %v4758_v32, %v2787_v56 }
 0x61d   : > { %v2369_v62 = vpop.f32.mrf.mxu3  ;;  %v2806_v40 = vand.u32 2147483647, %v4851_v11  ;;  %v2402_v30 = vand.u32 2147483648, %v4860_v6  ;;  %v2808_v39 = vand.u32 2147483648, %v4851_v11  ;;  %vm2802_vm8 = vweird.f32 %v4851_v11  ;;  %vm5002_vm15 = vmor %vm2606_vm7, %vm2607_vm5 }
 0x61e   : > { %v2604_v59 = vmul.f32 %v4810_v57, %v2603_v19  ;;  %v2370_v49 = vadd.f32 %v2369_v62, %v2280_v61  ;;  %v2820_v35 = vand.u32 2147483647, %v4835_v24  ;;  %v2822_v15 = vand.u32 2147483648, %v4835_v24 }
 0x61f   : > { %v4904_v9 = vpop.eup %3570  ;;  %vm2816_vm9 = vweird.f32 %v4835_v24  ;;  %v2796_v54 = vsel %vm4884_vm2, %v2795_v14, %v2791_v36  ;;  %vm4960_vm13 = vcmp.eq.f32.partialorder %v2806_v40, 8.507059e+37  ;;  %v2809_v14 = vor.u32 1.1754944e-38, %v2808_v39 }
 0x620   : > { %v4917_v43 = vpop.xlane.xlu1 %2057  ;;  %v4925_v58 = vpop.eup %3572  ;;  %v2798_v27 = vmul.f32 %v4904_v9, %v4851_v11  ;;  %vm2803_vm12 = vweird.f32 %v4904_v9  ;;  %v4955_v61 = vadd.f32 %v4810_v57, %v2604_v59  ;;  %v2656_v36 = vsel %vm4900_vm4, %v4832_v1, %v2651_v42 }
 0x621   : > { %v4934_v3 = vpop.xlane.xlu0 %2009  ;;  %3576 = vrcp.f32 %v4917_v43  ;;  %v2812_v52 = vmul.f32 %v4925_v58, %v4835_v24  ;;  %v4942_v31 = vpop.eup %3574  ;;  %vm4978_vm10 = vmor %vm2802_vm8, %vm2803_vm12  ;;  %vm2817_vm11 = vweird.f32 %v4925_v58  ;;  %vm4985_vm14 = vcmp.eq.f32.partialorder %v2820_v35, 8.507059e+37 }
 0x622   : > { %3578 = vrcp.f32 %v4934_v3  ;;  %v2799_v4 = vsub.f32 1.0, %v2798_v27  ;;  %v2392_v62 = vmul.f32 %v4942_v31, %v4860_v6  ;;  %v4966_v27 = vmul.f32 %v2796_v54, %v2370_v49  ;;  %vm2818_vm5 = vmor %vm2816_vm9, %vm2817_vm11 }
 0x623   : > { %v2813_v37 = vsub.f32 1.0, %v2812_v52  ;;  %v2823_v1 = vor.u32 1.1754944e-38, %v2822_v15  ;;  %v2542_v54 = vand.u32 2147483648, %v4934_v3  ;;  %vm5017_vm2 = vcmp.eq.f32.partialorder %v2610_v47, 8.507059e+37 }
 0x624   : > { %v2283_v32 = vpop.f32.mrf.mxu2  ;;  %v2800_v56 = vmul.f32 %v4904_v9, %v2799_v4  ;;  %v2393_v35 = vsub.f32 1.0, %v2392_v62  ;;  %vm2536_vm3 = vweird.f32 %v4934_v3  ;;  %vm2760_vm4 = vweird.f32 %v4917_v43 }
 0x625   : > { %v2372_v44 = vpop.f32.mrf.mxu3  ;;  %v2814_v19 = vmul.f32 %v4925_v58, %v2813_v37  ;;  %v2766_v48 = vand.u32 2147483648, %v4917_v43  ;;  %v2543_v24 = vor.u32 1.1754944e-38, %v2542_v54 }
 0x626   : > { %v2801_v17 = vadd.f32 %v4904_v9, %v2800_v56 }
 0x627   : > { %v4964_v2 = vpop.eup %3576  ;;  %v2815_v39 = vadd.f32 %v4925_v58, %v2814_v19  ;;  %v2609_v19 = vsel %vm5002_vm15, %v4810_v57, %v4955_v61 }
 0x628   : > { %v4972_v59 = vpop.eup %3578  ;;  %v2756_v52 = vmul.f32 %v4964_v2, %v4917_v43  ;;  %v4982_v4 = vpop.xlane.xlu1 %2048  ;;  %v2805_v11 = vsel %vm4978_vm10, %v4904_v9, %v2801_v17  ;;  %v5008_v9 = vmul.f32 %v2656_v36, %v4620_v21  ;;  %v2373_v17 = vadd.f32 %v2372_v44, %v2283_v32 }
 0x629   : > { %v2532_v51 = vmul.f32 %v4972_v59, %v4934_v3  ;;  %v4994_v42 = vpop.xlane.xlu0 %2000  ;;  %3580 = vrcp.f32 %v4982_v4  ;;  %v2764_v21 = vand.u32 2147483647, %v4917_v43  ;;  %v2810_v32 = vsel %vm4960_vm13, %v2809_v14, %v2805_v11 }
 0x62a   : > { %v2757_v15 = vsub.f32 1.0, %v2756_v52  ;;  %3582 = vrcp.f32 %v4994_v42  ;;  %v2819_v61 = vsel %vm2818_vm5, %v4925_v58, %v2815_v39  ;;  %v2394_v36 = vmul.f32 %v4942_v31, %v2393_v35 }
 0x62b   : > { %v2533_v56 = vsub.f32 1.0, %v2532_v51  ;;  %v2540_v52 = vand.u32 2147483647, %v4934_v3  ;;  %v2824_v14 = vsel %vm4985_vm14, %v2823_v1, %v2819_v61  ;;  %v2855_v11 = vmul.f32 %v2810_v32, %v2373_v17 }
 0x62c   : > { %v2285_v44 = vpop.f32.mrf.mxu2  ;;  %v2758_v57 = vmul.f32 %v4964_v2, %v2757_v15  ;;  %v2871_v15 = vpack.c.bf16 %v4966_v27, %v4907_v53  ;;  %vm2537_vm6 = vweird.f32 %v4972_v59  ;;  %vm2761_vm7 = vweird.f32 %v4964_v2 }
 0x62d   : > { %v2374_v62 = vpop.f32.mrf.mxu3  ;;  %v2534_v5 = vmul.f32 %v4972_v59, %v2533_v56  ;;  %v5058_v27 = vadd.f32 %v4942_v31, %v2394_v36  ;;  %v2767_v17 = vor.u32 1.1754944e-38, %v2766_v48  ;;  %vm2538_vm8 = vmor %vm2536_vm3, %vm2537_vm6  ;;  %vm2541_vm9 = vcmp.eq.f32.partialorder %v2540_v52, 8.507059e+37 }
 0x62e   : > { %v2375_v47 = vadd.f32 %v2374_v62, %v2285_v44  ;;  %v2759_v39 = vadd.f32 %v4964_v2, %v2758_v57  ;;  %v2500_v62 = vand.u32 2147483648, %v4994_v42  ;;  %vm5069_vm12 = vmor %vm2760_vm4, %vm2761_vm7  ;;  %vm5075_vm13 = vcmp.eq.f32.partialorder %v2764_v21, 8.507059e+37 }
 0x62f   : > { %v5038_v51 = vpop.eup %3580  ;;  %v2535_v58 = vadd.f32 %v4972_v59, %v2534_v5  ;;  %v2724_v5 = vand.u32 2147483648, %v4982_v4  ;;  %v5082_v36 = vsel %vm5017_vm2, %v4895_v8, %v2609_v19  ;;  %v2926_v48 = vsel %vm506_vm1, %v2871_v15, 0 }
 0x630   : > { %v2856_v37 = vmul.f32 %v2824_v14, %v2375_v47  ;;  %v5042_v56 = vpop.eup %3582  ;;  %v2714_v49 = vmul.f32 %v5038_v51, %v4982_v4  ;;  %v5049_v1 = vpop.xlane.xlu1 %2003  ;;  %v2763_v14 = vsel %vm5069_vm12, %v4964_v2, %v2759_v39  ;;  %vm2494_vm10 = vweird.f32 %v4994_v42 }
 0x631   : > { %v2490_v35 = vmul.f32 %v5042_v56, %v4994_v42  ;;  %v5054_v53 = vpop.xlane.xlu0 %2045  ;;  %3584 = vrcp.f32 %v5049_v1  ;;  %v2539_v61 = vsel %vm2538_vm8, %v4972_v59, %v2535_v58  ;;  %v2498_v59 = vand.u32 2147483647, %v4994_v42 }
 0x632   : > { %v2872_v54 = vpack.c.bf16 %v2856_v37, %v2855_v11  ;;  %v2715_v32 = vsub.f32 1.0, %v2714_v49  ;;  %3586 = vrcp.f32 %v5054_v53  ;;  %v2544_v43 = vsel %vm2541_vm9, %v2543_v24, %v2539_v61 }
 0x633   : > { %v2491_v44 = vsub.f32 1.0, %v2490_v35  ;;  %vm2718_vm11 = vweird.f32 %v4982_v4  ;;  %v2836_v40 = vmul.f32 %v2544_v43, %v4519_v26  ;;  %v2501_v21 = vor.u32 1.1754944e-38, %v2500_v62 }
 0x634   : > { %v2929_v47 = vsel %vm506_vm1, %v2872_v54, 0  ;;  %v2716_v52 = vmul.f32 %v5038_v51, %v2715_v32  ;;  %v2722_v24 = vand.u32 2147483647, %v4982_v4  ;;  %v2725_v11 = vor.u32 1.1754944e-38, %v2724_v5 }
 0x635   : > { %2944 = vmatpush.bf16.xpose.msra.mxu1 %v2929_v47  ;;  %v2492_v19 = vmul.f32 %v5042_v56, %v2491_v44  ;;  %vm2719_vm14 = vweird.f32 %v5038_v51  ;;  %v2862_v15 = vpack.c.bf16 %v2836_v40, %v4701_v23  ;;  %v2768_v26 = vsel %vm5075_vm13, %v2767_v17, %v2763_v14 }
 0x636   : > { %vm2495_vm15 = vweird.f32 %v5042_v56  ;;  %v2717_v49 = vadd.f32 %v5038_v51, %v2716_v52  ;;  %v2710_v54 = vand.u32 2147483648, %v5054_v53  ;;  %v2514_v62 = vand.u32 2147483648, %v5049_v1  ;;  %vm2720_vm2 = vmor %vm2718_vm11, %vm2719_vm14 }
 0x637   : > { %v5093_v8 = vpop.eup %3584  ;;  %v2899_v23 = vsel %vm506_vm1, %v2862_v15, 0  ;;  %v2493_v17 = vadd.f32 %v5042_v56, %v2492_v19  ;;  %v2852_v5 = vmul.f32 %v2768_v26, %v4882_v41  ;;  %vm2704_vm3 = vweird.f32 %v5054_v53  ;;  %vm5138_vm7 = vmor %vm2494_vm10, %vm2495_vm15 }
 0x638   : > { %v5097_v37 = vpop.eup %3586  ;;  %v2504_v2 = vmul.f32 %v5093_v8, %v5049_v1  ;;  %v5103_v58 = vpop.xlane.xlu1 %1994  ;;  %2933 = vmatpush.bf16.xpose.msra.mxu0 %v2899_v23  ;;  %vm5126_vm4 = vcmp.eq.f32.partialorder %v2498_v59, 8.507059e+37  ;;  %vm2723_vm5 = vcmp.eq.f32.partialorder %v2722_v24, 8.507059e+37  ;;  %vm2509_vm6 = vweird.f32 %v5093_v8 }
 0x639   : > { %v2700_v39 = vmul.f32 %v5097_v37, %v5054_v53  ;;  %v5111_v35 = vpop.xlane.xlu0 %2036  ;;  %3588 = vrcp.f32 %v5103_v58  ;;  %v2512_v41 = vand.u32 2147483647, %v5049_v1  ;;  %v2721_v3 = vsel %vm2720_vm2, %v5038_v51, %v2717_v49 }
 0x63a   : > { %v2505_v32 = vsub.f32 1.0, %v2504_v2  ;;  %3590 = vrcp.f32 %v5111_v35  ;;  %v2708_v52 = vand.u32 2147483647, %v5054_v53  ;;  %vm2508_vm8 = vweird.f32 %v5049_v1 }
 0x63b   : > { %v2701_v44 = vsub.f32 1.0, %v2700_v39  ;;  %v2726_v14 = vsel %vm2723_vm5, %v2725_v11, %v2721_v3  ;;  %v2515_v40 = vor.u32 1.1754944e-38, %v2514_v62  ;;  %v2870_v51 = vpack.c.bf16 %v2852_v5, %v4820_v38  ;;  %vm5157_vm12 = vmor %vm2508_vm8, %vm2509_vm6 }
 0x63c   : > { %v2506_v57 = vmul.f32 %v5093_v8, %v2505_v32  ;;  %v2497_v42 = vsel %vm5138_vm7, %v5042_v56, %v2493_v17  ;;  %vm2705_vm9 = vweird.f32 %v5097_v37  ;;  %v2849_v2 = vmul.f32 %v2726_v14, %v4645_v16 }
 0x63d   : > { %v2702_v61 = vmul.f32 %v5097_v37, %v2701_v44  ;;  %2945 = vmatpush.bf16.xpose.msra.mxu1 %v2926_v48  ;;  %v2711_v48 = vor.u32 1.1754944e-38, %v2710_v54  ;;  %vm2513_vm13 = vcmp.eq.f32.partialorder %v2512_v41, 8.507059e+37  ;;  %v2668_v49 = vand.u32 2147483648, %v5111_v35  ;;  %vm5180_vm10 = vmor %vm2704_vm3, %vm2705_vm9 }
 0x63e   : > { %v2507_v43 = vadd.f32 %v5093_v8, %v2506_v57  ;;  %v2502_v16 = vsel %vm5126_vm4, %v2501_v21, %v2497_v42  ;;  %v2470_v23 = vand.u32 2147483647, %v5103_v58  ;;  %v2923_v17 = vsel %vm506_vm1, %v2870_v51, 0 }
 0x63f   : > { %v5145_v59 = vpop.eup %3588  ;;  %v2703_v24 = vadd.f32 %v5097_v37, %v2702_v61  ;;  %v2869_v5 = vpack.c.bf16 %v4782_v22, %v2849_v2  ;;  %v2833_v21 = vmul.f32 %v2502_v16, %v4496_v60  ;;  %vm2709_vm14 = vcmp.eq.f32.partialorder %v2708_v52, 8.507059e+37 }
 0x640   : > { %v5151_v19 = vpop.eup %3590  ;;  %v2462_v11 = vmul.f32 %v5145_v59, %v5103_v58  ;;  %v5163_v38 = vpop.xlane.xlu1 %2039  ;;  %v2511_v26 = vsel %vm5157_vm12, %v5093_v8, %v2507_v43  ;;  %v2472_v8 = vand.u32 2147483648, %v5103_v58  ;;  %vm2467_vm11 = vweird.f32 %v5145_v59 }
 0x641   : > { %v2658_v56 = vmul.f32 %v5151_v19, %v5111_v35  ;;  %v5168_v15 = vpop.xlane.xlu0 %1991  ;;  %3592 = vrcp.f32 %v5163_v38  ;;  %v2516_v62 = vsel %vm2513_vm13, %v2515_v40, %v2511_v26  ;;  %v2707_v53 = vsel %vm5180_vm10, %v5097_v37, %v2703_v24 }
 0x642   : > { %v2463_v39 = vsub.f32 1.0, %v2462_v11  ;;  %3594 = vrcp.f32 %v5168_v15  ;;  %v2834_v57 = vmul.f32 %v2516_v62, %v4502_v18  ;;  %vm2662_vm15 = vweird.f32 %v5111_v35 }
 0x643   : > { %v2659_v32 = vsub.f32 1.0, %v2658_v56  ;;  %vm2466_vm2 = vweird.f32 %v5103_v58  ;;  %v2712_v61 = vsel %vm2709_vm14, %v2711_v48, %v2707_v53  ;;  %v2666_v37 = vand.u32 2147483647, %v5111_v35 }
 0x644   : > { %v2464_v44 = vmul.f32 %v5145_v59, %v2463_v39  ;;  %v2669_v3 = vor.u32 1.1754944e-38, %v2668_v49  ;;  %v2861_v4 = vpack.c.bf16 %v2834_v57, %v2833_v21  ;;  %vm5206_vm3 = vmor %vm2466_vm2, %vm2467_vm11  ;;  %v2473_v18 = vor.u32 1.1754944e-38, %v2472_v8 }
 0x645   : > { %2946 = vmatpush.bf16.xpose.msra.mxu1 %v2923_v17  ;;  %v2660_v41 = vmul.f32 %v5151_v19, %v2659_v32  ;;  %vm5214_vm4 = vcmp.eq.f32.partialorder %v2470_v23, 8.507059e+37  ;;  %v2848_v48 = vmul.f32 %v2712_v61, %v4636_v50  ;;  %vm2663_vm5 = vweird.f32 %v5151_v19 }
 0x646   : > { %v2465_v47 = vadd.f32 %v5145_v59, %v2464_v44  ;;  %v2896_v51 = vsel %vm506_vm1, %v2861_v4, 0  ;;  %v2456_v1 = vand.u32 2147483647, %v5168_v15  ;;  %v2458_v56 = vand.u32 2147483648, %v5168_v15  ;;  %vm5250_vm8 = vmor %vm2662_vm15, %vm2663_vm5 }
 0x647   : > { %v5198_v22 = vpop.eup %3592  ;;  %2934 = vmatpush.bf16.xpose.msra.mxu0 %v2896_v51  ;;  %v2661_v50 = vadd.f32 %v5151_v19, %v2660_v41  ;;  %v2682_v26 = vand.u32 2147483648, %v5163_v38  ;;  %v2920_v39 = vsel %vm506_vm1, %v2869_v5, 0  ;;  %v2868_v16 = vpack.c.bf16 %v2848_v48, %v4794_v7 }
 0x648   : > { %v5202_v43 = vpop.eup %3594  ;;  %v2672_v58 = vmul.f32 %v5198_v22, %v5163_v38  ;;  %v5212_v52 = vpop.xlane.xlu1 %2030  ;;  %v2469_v24 = vsel %vm5206_vm3, %v5145_v59, %v2465_v47  ;;  %vm2677_vm6 = vweird.f32 %v5198_v22  ;;  %vm5242_vm7 = vcmp.eq.f32.partialorder %v2666_v37, 8.507059e+37 }
 0x649   : > { %v2448_v40 = vmul.f32 %v5202_v43, %v5168_v15  ;;  %v5222_v42 = vpop.xlane.xlu0 %1982  ;;  %3596 = vrcp.f32 %v5212_v52  ;;  %v2474_v59 = vsel %vm5214_vm4, %v2473_v18, %v2469_v24  ;;  %vm2452_vm9 = vweird.f32 %v5168_v15 }
 0x64a   : > { %v2673_v11 = vsub.f32 1.0, %v2672_v58  ;;  %3598 = vrcp.f32 %v5222_v42  ;;  %v2831_v32 = vmul.f32 %v2474_v59, %v4486_v34  ;;  %vm2676_vm12 = vweird.f32 %v5163_v38 }
 0x64b   : > { %v2449_v2 = vsub.f32 1.0, %v2448_v40  ;;  %v2680_v34 = vand.u32 2147483647, %v5163_v38  ;;  %v2459_v44 = vor.u32 1.1754944e-38, %v2458_v56  ;;  %v2683_v62 = vor.u32 1.1754944e-38, %v2682_v26  ;;  %vm5270_vm10 = vmor %vm2676_vm12, %vm2677_vm6 }
 0x64c   : > { %v2674_v49 = vmul.f32 %v5198_v22, %v2673_v11  ;;  %v2860_v5 = vpack.c.bf16 %v4898_v10, %v2831_v32  ;;  %v2665_v35 = vsel %vm5250_vm8, %v5151_v19, %v2661_v50  ;;  %vm2453_vm13 = vweird.f32 %v5202_v43 }
 0x64d   : > { %v2450_v54 = vmul.f32 %v5202_v43, %v2449_v2  ;;  %2947 = vmatpush.bf16.xpose.msra.mxu1 %v2920_v39  ;;  %vm5278_vm11 = vcmp.eq.f32.partialorder %v2456_v1, 8.507059e+37  ;;  %v2670_v60 = vsel %vm5242_vm7, %v2669_v3, %v2665_v35  ;;  %vm2681_vm14 = vcmp.eq.f32.partialorder %v2680_v34, 8.507059e+37  ;;  %vm2454_vm15 = vmor %vm2452_vm9, %vm2453_vm13 }
 0x64e   : > { %v2675_v7 = vadd.f32 %v5198_v22, %v2674_v49  ;;  %v2893_v61 = vsel %vm506_vm1, %v2860_v5, 0  ;;  %v2638_v58 = vand.u32 2147483647, %v5212_v52  ;;  %v2640_v14 = vand.u32 2147483648, %v5212_v52 }
 0x64f   : > { %v5258_v17 = vpop.eup %3596  ;;  %v2451_v21 = vadd.f32 %v5202_v43, %v2450_v54  ;;  %2935 = vmatpush.bf16.xpose.msra.mxu0 %v2893_v61  ;;  %v2845_v24 = vmul.f32 %v2670_v60, %v4624_v13  ;;  %vm2410_vm3 = vweird.f32 %v5222_v42  ;;  %vm2634_vm4 = vweird.f32 %v5212_v52  ;;  %v2873_v13 = vld [vmem:[%s5554_s15] sm:$0x3] }
 0x650   : > { %v5264_v53 = vpop.eup %3598  ;;  %v2630_v57 = vmul.f32 %v5258_v17, %v5212_v52  ;;  %v5276_v10 = vpop.xlane.xlu1 %1985  ;;  %v2679_v37 = vsel %vm5270_vm10, %v5198_v22, %v2675_v7  ;;  %v2917_v22 = vsel %vm506_vm1, %v2868_v16, 0  ;;  %vm2635_vm2 = vweird.f32 %v5258_v17 }
 0x651   : > { %v2406_v19 = vmul.f32 %v5264_v53, %v5222_v42  ;;  %v5285_v41 = vpop.xlane.xlu0 %2027  ;;  %3600 = vrcp.f32 %v5276_v10  ;;  %v2455_v40 = vsel %vm2454_vm15, %v5202_v43, %v2451_v21  ;;  %v2684_v3 = vsel %vm2681_vm14, %v2683_v62, %v2679_v37  ;;  %vm5319_vm7 = vmor %vm2634_vm4, %vm2635_vm2 }
 0x652   : > { %v2631_v4 = vsub.f32 1.0, %v2630_v57  ;;  %3602 = vrcp.f32 %v5285_v41  ;;  %v2460_v15 = vsel %vm5278_vm11, %v2459_v44, %v2455_v40  ;;  %v2846_v1 = vmul.f32 %v2684_v3, %v4628_v63 }
 0x653   : > { %v2407_v18 = vsub.f32 1.0, %v2406_v19  ;;  %v2830_v50 = vmul.f32 %v2460_v15, %v4472_v25  ;;  %vm2397_vm5 = vweird.f32 %v4942_v31  ;;  %vm2411_vm6 = vweird.f32 %v5264_v53 }
 0x654   : > { %v2632_v48 = vmul.f32 %v5258_v17, %v2631_v4  ;;  %v2414_v2 = vand.u32 2147483647, %v5222_v42  ;;  %v2416_v56 = vand.u32 2147483648, %v5222_v42  ;;  %v2867_v63 = vpack.c.bf16 %v2846_v1, %v2845_v24  ;;  %vm5341_vm12 = vmor %vm2410_vm3, %vm2411_vm6 }
 0x655   : > { %v2408_v51 = vmul.f32 %v5264_v53, %v2407_v18  ;;  %2948 = vmatpush.bf16.xpose.msra.mxu1 %v2917_v22  ;;  %v2859_v49 = vpack.c.bf16 %v2830_v50, %v4920_v28  ;;  %vm2396_vm8 = vweird.f32 %v4860_v6  ;;  %v2641_v16 = vor.u32 1.1754944e-38, %v2640_v14 }
 0x656   : > { %v2633_v11 = vadd.f32 %v5258_v17, %v2632_v48  ;;  %vm2639_vm9 = vcmp.eq.f32.partialorder %v2638_v58, 8.507059e+37  ;;  %v2626_v32 = vand.u32 2147483648, %v5285_v41  ;;  %v2428_v8 = vand.u32 2147483647, %v5276_v10 }
 0x657   : > { %v3601_v43 = vpop.eup %3600  ;;  %v2409_v52 = vadd.f32 %v5264_v53, %v2408_v51  ;;  %v2890_v28 = vsel %vm506_vm1, %v2859_v49, 0  ;;  %v2914_v5 = vsel %vm506_vm1, %v2867_v63, 0  ;;  %v2417_v42 = vor.u32 1.1754944e-38, %v2416_v56  ;;  %v2957_v49 = vld [vmem:[%s3898_s11] sm:$0xff]  ;;  %s3680_s11 = scalar_lea.hbm %s5555_s18, 16 }
 0x658   : > { %v3603_v26 = vpop.eup %3602  ;;  %v2420_v25 = vmul.f32 %v3601_v43, %v5276_v10  ;;  %v5326_v39 = vpop.xlane.xlu1 %1976  ;;  %v2637_v59 = vsel %vm5319_vm7, %v5258_v17, %v2633_v11  ;;  %vm2425_vm13 = vweird.f32 %v3601_v43  ;;  %v2430_v17 = vand.u32 2147483648, %v5276_v10  ;;  %2936 = vmatpush.bf16.xpose.msra.mxu0 %v2890_v28  ;;  %vm5363_vm7 = vmor %vm2396_vm8, %vm2397_vm5  ;;  %p3682_p2 = scmp.lt.s32.totalorder %s3680_s11, %s3676_s25 }
 0x659   : > { %v2616_v54 = vmul.f32 %v3603_v26, %v5285_v41  ;;  %3604 = vrcp.f32 %v5326_v39  ;;  %v2642_v44 = vsel %vm2639_vm9, %v2641_v16, %v2637_v59  ;;  %v2413_v21 = vsel %vm5341_vm12, %v5264_v53, %v2409_v52 }
 0x65a   : > { %v2421_v23 = vsub.f32 1.0, %v2420_v25  ;;  %v2843_v35 = vmul.f32 %v2642_v44, %v4616_v45  ;;  %vm2621_vm10 = vweird.f32 %v3603_v26  ;;  %v2624_v57 = vand.u32 2147483647, %v5285_v41  ;;  %p3683_p3 = por %p3682_p2, %p3681_p1 }
 0x65b   : > { %v2617_v34 = vsub.f32 1.0, %v2616_v54  ;;  %vm2424_vm11 = vweird.f32 %v5276_v10  ;;  %vm2415_vm14 = vcmp.eq.f32.partialorder %v2414_v2, 8.507059e+37  ;;  %vm2620_vm15 = vweird.f32 %v5285_v41 }
 0x65c   : > { %v2422_v62 = vmul.f32 %v3601_v43, %v2421_v23  ;;  %v2866_v19 = vpack.c.bf16 %v5008_v9, %v2843_v35  ;;  %vm2426_vm2 = vmor %vm2424_vm11, %vm2425_vm13  ;;  %v2431_v45 = vor.u32 1.1754944e-38, %v2430_v17  ;;  %v2418_v53 = vsel %vm2415_vm14, %v2417_v42, %v2413_v21  ;;  %p3684_p4 = pnand %p3683_p3, %p3679_p0 }
 0x65d   : > { %v2618_v38 = vmul.f32 %v3603_v26, %v2617_v34  ;;  %2949 = vmatpush.bf16.xpose.msra.mxu1 %v2914_v5  ;;  %vm2622_vm3 = vmor %vm2620_vm15, %vm2621_vm10  ;;  %v2627_v4 = vor.u32 1.1754944e-38, %v2626_v32  ;;  %vm2429_vm4 = vcmp.eq.f32.partialorder %v2428_v8, 8.507059e+37  ;;  %vm2625_vm6 = vcmp.eq.f32.partialorder %v2624_v57, 8.507059e+37 }
 0x65e   : > { %v2423_v47 = vadd.f32 %v3601_v43, %v2422_v62  ;;  %v2841_v9 = vmul.f32 %v5082_v36, %v4607_v33  ;;  %v2827_v22 = vmul.f32 %v2418_v53, %v4454_v46  ;;  %v2386_v3 = vand.u32 2147483647, %v5326_v39 }
 0x65f   : > { %v3605_v61 = vpop.eup %3604  ;;  %v2619_v37 = vadd.f32 %v3603_v26, %v2618_v38  ;;  %v2388_v51 = vand.u32 2147483648, %v5326_v39  ;;  %v2399_v36 = vsel %vm5363_vm7, %v4942_v31, %v5058_v27  ;;  %v2911_v24 = vsel %vm506_vm1, %v2866_v19, 0 }
 0x660   : > { %v2378_v60 = vmul.f32 %v3605_v61, %v5326_v39  ;;  %v2427_v18 = vsel %vm2426_vm2, %v3601_v43, %v2423_v47  ;;  %vm2383_vm5 = vweird.f32 %v3605_v61  ;;  %v2403_v46 = vor.u32 1.1754944e-38, %v2402_v30 }
 0x661   : > { %v2432_v58 = vsel %vm2429_vm4, %v2431_v45, %v2427_v18  ;;  %v2623_v14 = vsel %vm2622_vm3, %v3603_v26, %v2619_v37  ;;  %vm2401_vm8 = vcmp.eq.f32.partialorder %v2400_v29, 8.507059e+37  ;;  %vm2382_vm9 = vweird.f32 %v5326_v39 }
 0x662   : > { %v2379_v41 = vsub.f32 1.0, %v2378_v60  ;;  %v2828_v48 = vmul.f32 %v2432_v58, %v4460_v20  ;;  %v2628_v40 = vsel %vm2625_vm6, %v2627_v4, %v2623_v14  ;;  %vm2384_vm12 = vmor %vm2382_vm9, %vm2383_vm5  ;;  %v2389_v31 = vor.u32 1.1754944e-38, %v2388_v51 }
 0x663   : > { %v2842_v33 = vmul.f32 %v2628_v40, %v4612_v55  ;;  %v2404_v27 = vsel %vm2401_vm8, %v2403_v46, %v2399_v36  ;;  %vm2387_vm13 = vcmp.eq.f32.partialorder %v2386_v3, 8.507059e+37 }
 0x664   : > { %v2380_v15 = vmul.f32 %v3605_v61, %v2379_v41  ;;  %v2858_v1 = vpack.c.bf16 %v2828_v48, %v2827_v22  ;;  %v2826_v2 = vmul.f32 %v2404_v27, %v4448_v12 }
 0x665   : > { %2950 = vmatpush.bf16.xpose.msra.mxu1 %v2911_v24  ;;  %v2865_v20 = vpack.c.bf16 %v2842_v33, %v2841_v9 }
 0x666   : > { %v2381_v11 = vadd.f32 %v3605_v61, %v2380_v15  ;;  %v2887_v55 = vsel %vm506_vm1, %v2858_v1, 0 }
 0x667   : > { %2937 = vmatpush.bf16.xpose.msra.mxu0 %v2887_v55  ;;  %v2908_v6 = vsel %vm506_vm1, %v2865_v20, 0 }
 0x668   : > { %v2385_v50 = vsel %vm2384_vm12, %v3605_v61, %v2381_v11 }
 0x669   : > { %v2390_v43 = vsel %vm2387_vm13, %v2389_v31, %v2385_v50 }
 0x66a   : > { %v2825_v30 = vmul.f32 %v2390_v43, %v4442_v0  ;;  %v2878_v0 = vpop.permute.xlu0 %2877 }
 0x66c   : > { %v2857_v29 = vpack.c.bf16 %v2826_v2, %v2825_v30 }
 0x66d   : > { %2951 = vmatpush.bf16.xpose.msra.mxu1 %v2908_v6 }
 0x66e   : > { %v2884_v56 = vsel %vm506_vm1, %v2857_v29, 0 }
 0x66f   : > { %2938 = vmatpush.bf16.xpose.msra.mxu0 %v2884_v56 }
 0x674   : > { %3294 = vmatmul.msk.bf16.vlgmr.msra.gmra.mxu1 %vm506_vm1, %v2873_v13 }
 0x676   : > { %3293 = vmatmul.msk.bf16.vlgmr.msra.gmra.mxu0 %vm506_vm1, %v2873_v13 }
 0x6f1   : > { %v2953_v12 = vpop.f32.mrf.mxu1 }
 0x6f2   : > { %v2954_v63 = vadd.f32 %v2953_v12, %v2878_v0 }
 0x6f3   : > { %v2940_v26 = vpop.f32.mrf.mxu0 }
 0x6f4   : > { %v2960_v52 = vrot.slane %v2954_v63, 4  ;;  %v2941_v25 = vadd.f32 %v2940_v26, %v2878_v0 }
 0x6f6   : > { %v2962_v39 = vsel %vm486_vm0, %v2941_v25, %v2960_v52 }
 0x6f7   : > { %v2964_v59 = vadd.f32 %v2962_v39, %v2957_v49 }
 0x6f9   : > { %2965 = vst [vmem:[%s3916_s13] sm:$0xff] %v2964_v59  ;;  %v2955_v16 = vpop.f32.mrf.mxu1 }
 0x6fa   : > { %3687 = shalt.err (!%p3684_p4)
}
 0x6fb   : > { %3340 = dma.vmem_to_hbm [thread:$0]  (%p3871_p9), %s2983_s27, 128, %s2985_s29, %s2967_s28   ;;  %v2942_v54 = vpop.f32.mrf.mxu0 }
 0x6fc PF: > { %s5557_s17 = sld [smem:[#allocation18_spill]]  ;;  %p3347_p5 = pnand %p3082_p12, %p3878_p11 }
 0x6fe   : > { %p3348_p6 = pneg %p3347_p5 }
 0x702   : > { %s2996_s13 = sand.u32 1, %s5557_s17  }
 0x703   : > { %s2997_s15 = scalar_lea.sflag [#allocation9], %s2996_s13 }
 0x704   : > { %3719 = dma.done.wait (%p3348_p6), %s2997_s15, 128  }
 0x705   : > { %3721 = vsyncadd (%p3348_p6), %s2997_s15, 4294967168  ;;  %s29_s30 = sadd.s32 1, %s3744_s30   ;;  %s5558_s20 = sld [smem:[#allocation19_spill]] }
 0x706   : > { %p26_p7 = scmp.ge.s32.totalorder %s29_s30, 4   ;;  %s5559_s27 = sld [smem:[#allocation23_spill]] }
 0x707   : > { %s5560_s28 = sld [smem:[#allocation20_spill]]  ;;  %s5562_s25 = smov %s3728_s26 }
 0x708   : > { %s5561_s29 = sld [smem:[#allocation21_spill]]  ;;  %28 = sbr.rel (!%p26_p7) target bundleno = 11 (0xb), region = 123 }
 0x70b   : > { %s5563_s26 = smov %s5558_s20 }
 0x70d   :  { %3003 = vsyncpa [#allocation8], 1 }
 0x70e   :  { %3005 = vsyncpa [#allocation8 + $0x1], 1 }
 0x70f   :  { %3006 = vsyncpa [#allocation9], 1 }
 0x710   :  { %3008 = vsyncpa [#allocation9 + $0x1], 1 }
 0x711   :  { %3009 = vsyncmov [#allocation6] }
 0x714   :  { %s3010_s23 = vpop.sfrf %3009 }
 0x715   :  { %p3300_p9 = scmp.ne.s32.totalorder %s3010_s23, 0 }
 0x717   :  { %3014 = shalt.err (%p3300_p9)  }

</bundles_post_ra>
